<compile_context>
chip_gen: v5e
topology: v5e:2x2
jax: 0.10.0
libtpu: 0.0.40
codegen_flags: <defaults>
</compile_context>

<pallas_src>
import jax
import jax.numpy as jnp
from jax import lax
from jax.experimental import pallas as pl
from jax.experimental.pallas import tpu as pltpu


# --------------------------------------------------------------------------------------
# Pallas kernel: one batch image x one band of TH input rows (= 2*TH output rows).
# --------------------------------------------------------------------------------------
def _residual_block_upsample_kernel(
    xp_ref,      # (1, H+2, W+1, Cin)   bf16, zero row top/bottom + zero col right
    wsub_ref,    # (4*Cin, 4*Cout)      bf16, subpel phase weights, col blocks [EE,EO,OE,OO]
    bsub_ref,    # (1, 4*Cout)          f32
    wconv_ref,   # (9*Cout, Cout)       bf16, conv3x3 im2col weights (tap order dh, dw)
    bconv_ref,   # (1, Cout)            f32
    gammaT_ref,  # (Cout, Cout)         bf16, gammaT[c, o] = gamma[o, c]
    beta_ref,    # (1, Cout)            f32
    wup_ref,     # (Cin, Cout)          bf16, 1x1 skip weights
    bup_ref,     # (1, Cout)            f32
    out_ref,     # (1, 4, TH, W, Cout)  f32, phase-blocked output band
):
    _, _, TH, W, Cout = out_ref.shape
    Cin = xp_ref.shape[3]
    r = pl.program_id(1)
    nr = pl.num_programs(1)
    row0 = r * TH                       # first xp row of this band's (TH+2)-row slab

    # ---- subpel ConvTranspose2d(3, s=2, p=1, op=1), phase-decomposed -------------------
    # one MXU matmul with K = 4*Cin producing all four phases at TH+1 row positions:
    #   EE[m] = P00[r*TH+m],  EO[m] = P01[r*TH+m],
    #   OE[m] = P10[r*TH+m-1], OO[m] = P11[r*TH+m-1]     (m = 0 .. TH, incl. conv halo)
    x00 = xp_ref[0, pl.ds(row0, TH + 1), 0:W, :]          # x[i  , j  ]
    x01 = xp_ref[0, pl.ds(row0, TH + 1), 1:W + 1, :]      # x[i  , j+1]
    x10 = xp_ref[0, pl.ds(row0 + 1, TH + 1), 0:W, :]      # x[i+1, j  ]
    x11 = xp_ref[0, pl.ds(row0 + 1, TH + 1), 1:W + 1, :]  # x[i+1, j+1]
    slab = jnp.concatenate([x00, x01, x10, x11], axis=-1).reshape((TH + 1) * W, 4 * Cin)
    ph = jnp.dot(slab, wsub_ref[...], preferred_element_type=jnp.float32) + bsub_ref[...]
    ph = jnp.where(ph >= 0.0, ph, 0.01 * ph)              # LeakyReLU (f32, VPU)
    ph = ph.reshape(TH + 1, W, 4 * Cout)

    # ---- phase arrays: zero out-of-image halo rows (masks), add zero column halos -----
    row_ids = lax.broadcasted_iota(jnp.int32, (TH + 1, 1, 1), 0)
    keep_bot = jnp.logical_or(row_ids < TH, r < nr - 1)   # even-row phases: bottom halo
    keep_top = jnp.logical_or(row_ids > 0, r > 0)         # odd-row  phases: top halo
    zcol = jnp.zeros((TH + 1, 1, Cout), jnp.bfloat16)
    pads = []                                             # k = 2*row_parity + col_parity
    for k in range(4):
        a = ph[:, :, k * Cout:(k + 1) * Cout]
        a = jnp.where(keep_bot if k < 2 else keep_top, a, 0.0).astype(jnp.bfloat16)
        # even-col phases need a zero col on the RIGHT, odd-col phases on the LEFT
        pads.append(jnp.concatenate([a, zcol], axis=1) if k % 2 == 0
                    else jnp.concatenate([zcol, a], axis=1))   # (TH+1, W+1, Cout)

    # ---- skip branch: ConvTranspose2d(1, s=2, op=1) hits even/even outputs only --------
    xb = xp_ref[0, pl.ds(row0 + 1, TH), 0:W, :].reshape(TH * W, Cin)
    skip = jnp.dot(xb, wup_ref[...], preferred_element_type=jnp.float32)

    wconv = wconv_ref[...]
    bconv = bconv_ref[...]
    gammaT = gammaT_ref[...]
    beta = beta_ref[...]
    bup = bup_ref[...]

    # ---- conv3x3 (stride 1, pad 1) + inverse GDN, one output phase at a time ----------
    # output phase (p, q), tap (dh, dw) reads source phase (rp, cp) with
    #   rp = (p+dh+1) % 2, cp = (q+dw+1) % 2, row shift (p+dh)//2, col shift (q+dw)//2.
    for p in range(2):
        for q in range(2):
            taps = []
            for dh in range(3):
                for dw in range(3):
                    src = pads[2 * ((p + dh + 1) % 2) + ((q + dw + 1) % 2)]
                    r0 = (p + dh) // 2
                    c0 = (q + dw) // 2
                    taps.append(src[r0:r0 + TH, c0:c0 + W, :])
            slab2 = jnp.concatenate(taps, axis=-1).reshape(TH * W, 9 * Cout)   # bf16
            y = jnp.dot(slab2, wconv, preferred_element_type=jnp.float32) + bconv
            # inverse GDN: y * sqrt(beta + sum_c gamma[o, c] * y_c^2)
            z = jnp.dot((y * y).astype(jnp.bfloat16), gammaT,
                        preferred_element_type=jnp.float32) + beta
            o = y * jnp.sqrt(z) + bup                    # ConvTranspose bias everywhere
            if p == 0 and q == 0:                        # fused skip (even/even only)
                o = o + skip
            out_ref[0, 2 * p + q] = o.reshape(TH, W, Cout)


# --------------------------------------------------------------------------------------
# Wrapper: layout glue, weight re-blocking, grid / BlockSpec setup.
# --------------------------------------------------------------------------------------
def _vmem_limit_bytes(H, W, Cin, Cout, TH):
    bf, f4 = 2, 4
    weights = (4 * Cin * 4 * Cout + 9 * Cout * Cout + Cout * Cout + Cin * Cout) * bf \
        + 7 * Cout * f4
    resident_in = (H + 2) * (W + 1) * Cin * bf
    out_band = 4 * TH * W * Cout * f4
    temps = ((TH + 1) * W * 4 * Cin * bf          # subpel im2col slab
             + 2 * (TH + 1) * W * 4 * Cout * f4   # ph (pre/post LeakyReLU)
             + 4 * (TH + 1) * (W + 1) * Cout * bf # padded phase arrays
             + TH * W * 9 * Cout * bf             # per-phase conv im2col slab
             + 4 * TH * W * Cout * f4)            # y / z / o / skip
    est = 2 * (resident_in + weights + out_band) + temps
    return int(min(max(2 * est, 32 * 1024 * 1024), 64 * 1024 * 1024))


def residual_block_upsample(x_nchw, params, *, tile_rows=8):
    (w_sub_t, b_sub, w_conv, b_conv, gamma, beta, w_up_t, b_up) = params
    B, Cin, H, W = x_nchw.shape
    Cout = w_sub_t.shape[1]

    TH = tile_rows if (H % tile_rows == 0) else H          # input rows per band
    R = H // TH
    assert R * TH == H

    # NCHW -> NHWC, pad 1 zero row top/bottom and 1 zero col right, cast to bf16
    x_nhwc = jnp.transpose(x_nchw, (0, 2, 3, 1)).astype(jnp.float32)
    xp = jnp.pad(x_nhwc, ((0, 0), (1, 1), (0, 1), (0, 0))).astype(jnp.bfloat16)

    # --- subpel transposed-conv weights: block matrix for the 4-phase im2col matmul ----
    wt = w_sub_t.astype(jnp.float32)                       # (Cin, Cout, 3, 3)

    def tap(kh, kw):
        return wt[:, :, kh, kw]

    Z = jnp.zeros((Cin, Cout), jnp.float32)
    # slab row blocks: [x(i,j), x(i,j+1), x(i+1,j), x(i+1,j+1)]; col blocks: [EE,EO,OE,OO]
    w_sub_comb = jnp.concatenate([
        jnp.concatenate([Z,         Z,         tap(2, 1), tap(2, 2)], axis=1),
        jnp.concatenate([Z,         Z,         Z,         tap(2, 0)], axis=1),
        jnp.concatenate([tap(1, 1), tap(1, 2), tap(0, 1), tap(0, 2)], axis=1),
        jnp.concatenate([Z,         tap(1, 0), Z,         tap(0, 0)], axis=1),
    ], axis=0).astype(jnp.bfloat16)                        # (4*Cin, 4*Cout)
    b_sub4 = jnp.tile(b_sub.reshape(1, Cout).astype(jnp.float32), (1, 4))

    # conv3x3 weights (O, I, kh, kw) -> im2col layout (kh, kw, I) x O = (9*Cout, Cout)
    w_conv_comb = jnp.transpose(w_conv, (2, 3, 1, 0)).reshape(
        9 * Cout, Cout).astype(jnp.bfloat16)
    gammaT = jnp.transpose(gamma).astype(jnp.bfloat16)     # z[o] = beta[o] + sum_c g[o,c] y_c^2
    w_up = w_up_t[:, :, 0, 0].astype(jnp.bfloat16)         # (Cin, Cout)

    out_phased = pl.pallas_call(
        _residual_block_upsample_kernel,
        out_shape=jax.ShapeDtypeStruct((B, 4, H, W, Cout), jnp.float32),
        grid_spec=pltpu.PrefetchScalarGridSpec(
            num_scalar_prefetch=0,
            grid=(B, R),
            in_specs=[
                pl.BlockSpec((1, H + 2, W + 1, Cin), lambda b, r: (b, 0, 0, 0)),
                pl.BlockSpec((4 * Cin, 4 * Cout), lambda b, r: (0, 0)),
                pl.BlockSpec((1, 4 * Cout), lambda b, r: (0, 0)),
                pl.BlockSpec((9 * Cout, Cout), lambda b, r: (0, 0)),
                pl.BlockSpec((1, Cout), lambda b, r: (0, 0)),
                pl.BlockSpec((Cout, Cout), lambda b, r: (0, 0)),
                pl.BlockSpec((1, Cout), lambda b, r: (0, 0)),
                pl.BlockSpec((Cin, Cout), lambda b, r: (0, 0)),
                pl.BlockSpec((1, Cout), lambda b, r: (0, 0)),
            ],
            out_specs=pl.BlockSpec((1, 4, TH, W, Cout), lambda b, r: (b, 0, r, 0, 0)),
        ),
        # both grid axes are independent -> shard across TensorCores on megacore / v7x
        compiler_params=pltpu.CompilerParams(
            dimension_semantics=("parallel", "parallel"),
            vmem_limit_bytes=_vmem_limit_bytes(H, W, Cin, Cout, TH)),
    )(xp, w_sub_comb, b_sub4, w_conv_comb, b_conv.reshape(1, Cout).astype(jnp.float32),
      gammaT, beta.reshape(1, Cout).astype(jnp.float32),
      w_up, b_up.reshape(1, Cout).astype(jnp.float32))

    # de-interleave the phases while doing the NCHW transpose that was already required;
    # out_phased[b, 2p+q, a, w, c] = O[b, 2a+p, 2w+q, c]
    o = out_phased.reshape(B, 2, 2, H, W, Cout)
    return jnp.transpose(o, (0, 5, 3, 1, 4, 2)).reshape(B, Cout, 2 * H, 2 * W)


# --------------------------------------------------------------------------------------
# Pure-JAX reference (ConvTranspose2d == gradient of Conv2d w.r.t. its input)
# --------------------------------------------------------------------------------------
def _conv_transpose2d_ref(x, w_t, b, stride, padding, out_hw):
    B = x.shape[0]
    Cout = w_t.shape[1]

    def fwd(y):
        return lax.conv_general_dilated(
            y, w_t, window_strides=(stride, stride),
            padding=[(padding, padding), (padding, padding)],
            dimension_numbers=("NCHW", "OIHW", "NCHW"),
            precision=lax.Precision.HIGHEST)

    primal = jnp.zeros((B, Cout, out_hw[0], out_hw[1]), x.dtype)
    _, vjp_fn = jax.vjp(fwd, primal)
    (out,) = vjp_fn(x)
    return out + b[None, :, None, None]


def reference_forward(x, params):
    (w_sub_t, b_sub, w_conv, b_conv, gamma, beta, w_up_t, b_up) = params
    B, Cin, H, W = x.shape
    out = _conv_transpose2d_ref(x, w_sub_t, b_sub, 2, 1, (2 * H, 2 * W))
    out = jnp.where(out >= 0.0, out, 0.01 * out)
    out = lax.conv_general_dilated(
        out, w_conv, (1, 1), [(1, 1), (1, 1)],
        dimension_numbers=("NCHW", "OIHW", "NCHW"),
        precision=lax.Precision.HIGHEST) + b_conv[None, :, None, None]
    z = lax.conv_general_dilated(
        out ** 2, gamma[:, :, None, None], (1, 1), [(0, 0), (0, 0)],
        dimension_numbers=("NCHW", "OIHW", "NCHW"),
        precision=lax.Precision.HIGHEST) + beta[None, :, None, None]
    out = out * jnp.sqrt(z)                     # inverse GDN
    ident = _conv_transpose2d_ref(x, w_up_t, b_up, 2, 0, (2 * H, 2 * W))
    return out + ident


# --------------------------------------------------------------------------------------
if __name__ == "__main__":
    B, in_ch, out_ch, H, W = 2, 4, 4, 16, 16

    key = jax.random.PRNGKey(0)
    ks = jax.random.split(key, 9)
    # deterministic synthetic parameters (shapes follow the PyTorch module's __init__)
    w_sub_t = 0.2 * jax.random.normal(ks[0], (in_ch, out_ch, 3, 3), jnp.float32)
    b_sub = 0.1 * jax.random.normal(ks[1], (out_ch,), jnp.float32)
    w_conv = 0.2 * jax.random.normal(ks[2], (out_ch, out_ch, 3, 3), jnp.float32)
    b_conv = 0.1 * jax.random.normal(ks[3], (out_ch,), jnp.float32)
    gamma = (0.1 * jnp.eye(out_ch, dtype=jnp.float32)
             + 0.01 * jnp.abs(jax.random.normal(ks[4], (out_ch, out_ch), jnp.float32)))
    beta = 1.0 + 0.1 * jnp.abs(jax.random.normal(ks[5], (out_ch,), jnp.float32))
    w_up_t = 0.2 * jax.random.normal(ks[6], (in_ch, out_ch, 1, 1), jnp.float32)
    b_up = 0.1 * jax.random.normal(ks[7], (out_ch,), jnp.float32)
    params = (w_sub_t, b_sub, w_conv, b_conv, gamma, beta, w_up_t, b_up)

    x = jax.random.normal(ks[8], (B, in_ch, H, W), jnp.float32)   # NCHW, like PyTorch

    out = residual_block_upsample(x, params)
    out = jax.block_until_ready(out)

    ref = reference_forward(x, params)
    assert out.shape == (B, out_ch, 2 * H, 2 * W), out.shape
    max_err = float(jnp.max(jnp.abs(out - ref)))
    # bf16 MXU inputs with f32 accumulation -> tolerance loosened vs the pure-f32 v2
    assert jnp.allclose(out, ref, atol=3e-2, rtol=3e-2), f"max abs err = {max_err}"
    print("KERNEL_OK")
</pallas_src>

<mosaic_0001>
module attributes {stable_mosaic.version = 11 : i64} {
  func.func @_residual_block_upsample_kernel(%arg0: i32, %arg1: i32, %arg2: memref<1x18x17x4xbf16, #tpu.memory_space<vmem>>, %arg3: memref<16x16xbf16, #tpu.memory_space<vmem>>, %arg4: memref<1x16xf32, #tpu.memory_space<vmem>>, %arg5: memref<36x4xbf16, #tpu.memory_space<vmem>>, %arg6: memref<1x4xf32, #tpu.memory_space<vmem>>, %arg7: memref<4x4xbf16, #tpu.memory_space<vmem>>, %arg8: memref<1x4xf32, #tpu.memory_space<vmem>>, %arg9: memref<4x4xbf16, #tpu.memory_space<vmem>>, %arg10: memref<1x4xf32, #tpu.memory_space<vmem>>, %arg11: memref<1x4x8x16x4xf32, #tpu.memory_space<vmem>>) attributes {dimension_semantics = [#tpu.dimension_semantics<parallel>, #tpu.dimension_semantics<parallel>], iteration_bounds = array<i64: 2, 2>, scalar_prefetch = 0 : i64, scratch_operands = 0 : i64, tpu.core_type = #tpu.core_type<tc>, window_params = [{transform_indices = @transform_0, window_bounds = array<i64: 1, 18, 17, 4>}, {pipeline_mode = #tpu.pipeline_mode<synchronous>, transform_indices = @transform_1, window_bounds = array<i64: 16, 16>}, {pipeline_mode = #tpu.pipeline_mode<synchronous>, transform_indices = @transform_2, window_bounds = array<i64: 1, 16>}, {pipeline_mode = #tpu.pipeline_mode<synchronous>, transform_indices = @transform_3, window_bounds = array<i64: 36, 4>}, {pipeline_mode = #tpu.pipeline_mode<synchronous>, transform_indices = @transform_4, window_bounds = array<i64: 1, 4>}, {pipeline_mode = #tpu.pipeline_mode<synchronous>, transform_indices = @transform_5, window_bounds = array<i64: 4, 4>}, {pipeline_mode = #tpu.pipeline_mode<synchronous>, transform_indices = @transform_6, window_bounds = array<i64: 1, 4>}, {pipeline_mode = #tpu.pipeline_mode<synchronous>, transform_indices = @transform_7, window_bounds = array<i64: 4, 4>}, {pipeline_mode = #tpu.pipeline_mode<synchronous>, transform_indices = @transform_8, window_bounds = array<i64: 1, 4>}, {transform_indices = @transform_9, window_bounds = array<i64: 1, 4, 8, 16, 4>}]} {
    %c8_i32 = arith.constant 8 : i32
    %0 = arith.muli %arg1, %c8_i32 : i32
    %c0 = arith.constant 0 : index
    %1 = arith.index_cast %0 : i32 to index
    %c0_0 = arith.constant 0 : index
    %c0_1 = arith.constant 0 : index
    %2 = vector.load %arg2[%c0, %1, %c0_0, %c0_1] : memref<1x18x17x4xbf16, #tpu.memory_space<vmem>>, vector<1x9x16x4xbf16>
    %3 = vector.shape_cast %2 : vector<1x9x16x4xbf16> to vector<9x16x4xbf16>
    %c0_2 = arith.constant 0 : index
    %4 = arith.index_cast %0 : i32 to index
    %c1 = arith.constant 1 : index
    %c0_3 = arith.constant 0 : index
    %5 = vector.load %arg2[%c0_2, %4, %c1, %c0_3] : memref<1x18x17x4xbf16, #tpu.memory_space<vmem>>, vector<1x9x16x4xbf16>
    %6 = vector.shape_cast %5 : vector<1x9x16x4xbf16> to vector<9x16x4xbf16>
    %c1_i32 = arith.constant 1 : i32
    %7 = arith.addi %0, %c1_i32 : i32
    %c0_4 = arith.constant 0 : index
    %8 = arith.index_cast %7 : i32 to index
    %c0_5 = arith.constant 0 : index
    %c0_6 = arith.constant 0 : index
    %9 = vector.load %arg2[%c0_4, %8, %c0_5, %c0_6] : memref<1x18x17x4xbf16, #tpu.memory_space<vmem>>, vector<1x9x16x4xbf16>
    %10 = vector.shape_cast %9 : vector<1x9x16x4xbf16> to vector<9x16x4xbf16>
    %c1_i32_7 = arith.constant 1 : i32
    %11 = arith.addi %0, %c1_i32_7 : i32
    %c0_8 = arith.constant 0 : index
    %12 = arith.index_cast %11 : i32 to index
    %c1_9 = arith.constant 1 : index
    %c0_10 = arith.constant 0 : index
    %13 = vector.load %arg2[%c0_8, %12, %c1_9, %c0_10] : memref<1x18x17x4xbf16, #tpu.memory_space<vmem>>, vector<1x9x16x4xbf16>
    %14 = vector.shape_cast %13 : vector<1x9x16x4xbf16> to vector<9x16x4xbf16>
    %15 = tpu.concatenate %3, %6, %10, %14 in 2 : vector<9x16x4xbf16>, vector<9x16x4xbf16>, vector<9x16x4xbf16>, vector<9x16x4xbf16> -> vector<9x16x16xbf16>
    %16 = vector.shape_cast %15 : vector<9x16x16xbf16> to vector<144x16xbf16>
    %c0_11 = arith.constant 0 : index
    %c0_12 = arith.constant 0 : index
    %17 = vector.load %arg3[%c0_11, %c0_12] : memref<16x16xbf16, #tpu.memory_space<vmem>>, vector<16x16xbf16>
    %cst = arith.constant dense<0.000000e+00> : vector<144x16xf32>
    %18 = tpu.matmul %16, %17, %cst {dimension_numbers = #tpu.dot_dimension_numbers<[1], [0], [0], [1], [0, 0, 1, 1], [], []>} : vector<144x16xbf16>, vector<16x16xbf16>, vector<144x16xf32> -> vector<144x16xf32>
    %c0_13 = arith.constant 0 : index
    %c0_14 = arith.constant 0 : index
    %19 = vector.load %arg4[%c0_13, %c0_14] : memref<1x16xf32, #tpu.memory_space<vmem>>, vector<1x16xf32>
    %20 = vector.broadcast %19 : vector<1x16xf32> to vector<144x16xf32>
    %21 = arith.addf %18, %20 : vector<144x16xf32>
    %cst_15 = arith.constant 0.000000e+00 : f32
    %22 = vector.broadcast %cst_15 : f32 to vector<144x16xf32>
    %23 = arith.cmpf oge, %21, %22 : vector<144x16xf32>
    %cst_16 = arith.constant 0.00999999977 : f32
    %24 = vector.broadcast %cst_16 : f32 to vector<144x16xf32>
    %25 = arith.mulf %24, %21 : vector<144x16xf32>
    %26 = arith.select %23, %21, %25 : vector<144x16xi1>, vector<144x16xf32>
    %27 = vector.shape_cast %26 : vector<144x16xf32> to vector<9x16x16xf32>
    %28 = tpu.iota {dimensions = array<i32: 0>} : vector<9x1x1xi32>
    %c8_i32_17 = arith.constant 8 : i32
    %29 = vector.broadcast %c8_i32_17 : i32 to vector<9x1x1xi32>
    %30 = arith.cmpi slt, %28, %29 : vector<9x1x1xi32>
    %c1_i32_18 = arith.constant 1 : i32
    %31 = arith.cmpi slt, %arg1, %c1_i32_18 : i32
    %32 = vector.broadcast %31 : i1 to vector<9x1x1xi1>
    %33 = arith.ori %30, %32 : vector<9x1x1xi1>
    %c0_i32 = arith.constant 0 : i32
    %34 = vector.broadcast %c0_i32 : i32 to vector<9x1x1xi32>
    %35 = arith.cmpi sgt, %28, %34 : vector<9x1x1xi32>
    %c0_i32_19 = arith.constant 0 : i32
    %36 = arith.cmpi sgt, %arg1, %c0_i32_19 : i32
    %37 = vector.broadcast %36 : i1 to vector<9x1x1xi1>
    %38 = arith.ori %35, %37 : vector<9x1x1xi1>
    %cst_20 = arith.constant 0.000000e+00 : bf16
    %39 = vector.broadcast %cst_20 : bf16 to vector<9x1x4xbf16>
    %40 = vector.extract_strided_slice %27 {offsets = [0, 0, 0], sizes = [9, 16, 4], strides = [1, 1, 1]} : vector<9x16x16xf32> to vector<9x16x4xf32>
    %cst_21 = arith.constant 0.000000e+00 : f32
    %41 = vector.shape_cast %33 : vector<9x1x1xi1> to vector<9x1x1xi1>
    %42 = vector.broadcast %41 : vector<9x1x1xi1> to vector<9x16x4xi1>
    %43 = vector.broadcast %cst_21 : f32 to vector<9x16x4xf32>
    %44 = arith.select %42, %40, %43 : vector<9x16x4xi1>, vector<9x16x4xf32>
    %45 = arith.truncf %44 : vector<9x16x4xf32> to vector<9x16x4xbf16>
    %46 = tpu.concatenate %45, %39 in 1 : vector<9x16x4xbf16>, vector<9x1x4xbf16> -> vector<9x17x4xbf16>
    %47 = vector.extract_strided_slice %27 {offsets = [0, 0, 4], sizes = [9, 16, 4], strides = [1, 1, 1]} : vector<9x16x16xf32> to vector<9x16x4xf32>
    %cst_22 = arith.constant 0.000000e+00 : f32
    %48 = vector.shape_cast %33 : vector<9x1x1xi1> to vector<9x1x1xi1>
    %49 = vector.broadcast %48 : vector<9x1x1xi1> to vector<9x16x4xi1>
    %50 = vector.broadcast %cst_22 : f32 to vector<9x16x4xf32>
    %51 = arith.select %49, %47, %50 : vector<9x16x4xi1>, vector<9x16x4xf32>
    %52 = arith.truncf %51 : vector<9x16x4xf32> to vector<9x16x4xbf16>
    %53 = tpu.concatenate %39, %52 in 1 : vector<9x1x4xbf16>, vector<9x16x4xbf16> -> vector<9x17x4xbf16>
    %54 = vector.extract_strided_slice %27 {offsets = [0, 0, 8], sizes = [9, 16, 4], strides = [1, 1, 1]} : vector<9x16x16xf32> to vector<9x16x4xf32>
    %cst_23 = arith.constant 0.000000e+00 : f32
    %55 = vector.shape_cast %38 : vector<9x1x1xi1> to vector<9x1x1xi1>
    %56 = vector.broadcast %55 : vector<9x1x1xi1> to vector<9x16x4xi1>
    %57 = vector.broadcast %cst_23 : f32 to vector<9x16x4xf32>
    %58 = arith.select %56, %54, %57 : vector<9x16x4xi1>, vector<9x16x4xf32>
    %59 = arith.truncf %58 : vector<9x16x4xf32> to vector<9x16x4xbf16>
    %60 = tpu.concatenate %59, %39 in 1 : vector<9x16x4xbf16>, vector<9x1x4xbf16> -> vector<9x17x4xbf16>
    %61 = vector.extract_strided_slice %27 {offsets = [0, 0, 12], sizes = [9, 16, 4], strides = [1, 1, 1]} : vector<9x16x16xf32> to vector<9x16x4xf32>
    %cst_24 = arith.constant 0.000000e+00 : f32
    %62 = vector.shape_cast %38 : vector<9x1x1xi1> to vector<9x1x1xi1>
    %63 = vector.broadcast %62 : vector<9x1x1xi1> to vector<9x16x4xi1>
    %64 = vector.broadcast %cst_24 : f32 to vector<9x16x4xf32>
    %65 = arith.select %63, %61, %64 : vector<9x16x4xi1>, vector<9x16x4xf32>
    %66 = arith.truncf %65 : vector<9x16x4xf32> to vector<9x16x4xbf16>
    %67 = tpu.concatenate %39, %66 in 1 : vector<9x1x4xbf16>, vector<9x16x4xbf16> -> vector<9x17x4xbf16>
    %c1_i32_25 = arith.constant 1 : i32
    %68 = arith.addi %0, %c1_i32_25 : i32
    %c0_26 = arith.constant 0 : index
    %69 = arith.index_cast %68 : i32 to index
    %c0_27 = arith.constant 0 : index
    %c0_28 = arith.constant 0 : index
    %70 = vector.load %arg2[%c0_26, %69, %c0_27, %c0_28] : memref<1x18x17x4xbf16, #tpu.memory_space<vmem>>, vector<1x8x16x4xbf16>
    %71 = vector.shape_cast %70 : vector<1x8x16x4xbf16> to vector<8x16x4xbf16>
    %72 = vector.shape_cast %71 : vector<8x16x4xbf16> to vector<128x4xbf16>
    %c0_29 = arith.constant 0 : index
    %c0_30 = arith.constant 0 : index
    %73 = vector.load %arg9[%c0_29, %c0_30] : memref<4x4xbf16, #tpu.memory_space<vmem>>, vector<4x4xbf16>
    %cst_31 = arith.constant dense<0.000000e+00> : vector<128x4xf32>
    %74 = tpu.matmul %72, %73, %cst_31 {dimension_numbers = #tpu.dot_dimension_numbers<[1], [0], [0], [1], [0, 0, 1, 1], [], []>} : vector<128x4xbf16>, vector<4x4xbf16>, vector<128x4xf32> -> vector<128x4xf32>
    %c0_32 = arith.constant 0 : index
    %c0_33 = arith.constant 0 : index
    %75 = vector.load %arg5[%c0_32, %c0_33] : memref<36x4xbf16, #tpu.memory_space<vmem>>, vector<36x4xbf16>
    %c0_34 = arith.constant 0 : index
    %c0_35 = arith.constant 0 : index
    %76 = vector.load %arg6[%c0_34, %c0_35] : memref<1x4xf32, #tpu.memory_space<vmem>>, vector<1x4xf32>
    %c0_36 = arith.constant 0 : index
    %c0_37 = arith.constant 0 : index
    %77 = vector.load %arg7[%c0_36, %c0_37] : memref<4x4xbf16, #tpu.memory_space<vmem>>, vector<4x4xbf16>
    %c0_38 = arith.constant 0 : index
    %c0_39 = arith.constant 0 : index
    %78 = vector.load %arg8[%c0_38, %c0_39] : memref<1x4xf32, #tpu.memory_space<vmem>>, vector<1x4xf32>
    %c0_40 = arith.constant 0 : index
    %c0_41 = arith.constant 0 : index
    %79 = vector.load %arg10[%c0_40, %c0_41] : memref<1x4xf32, #tpu.memory_space<vmem>>, vector<1x4xf32>
    %80 = vector.extract_strided_slice %67 {offsets = [0, 0, 0], sizes = [8, 16, 4], strides = [1, 1, 1]} : vector<9x17x4xbf16> to vector<8x16x4xbf16>
    %81 = vector.extract_strided_slice %60 {offsets = [0, 0, 0], sizes = [8, 16, 4], strides = [1, 1, 1]} : vector<9x17x4xbf16> to vector<8x16x4xbf16>
    %82 = vector.extract_strided_slice %67 {offsets = [0, 1, 0], sizes = [8, 16, 4], strides = [1, 1, 1]} : vector<9x17x4xbf16> to vector<8x16x4xbf16>
    %83 = vector.extract_strided_slice %53 {offsets = [0, 0, 0], sizes = [8, 16, 4], strides = [1, 1, 1]} : vector<9x17x4xbf16> to vector<8x16x4xbf16>
    %84 = vector.extract_strided_slice %46 {offsets = [0, 0, 0], sizes = [8, 16, 4], strides = [1, 1, 1]} : vector<9x17x4xbf16> to vector<8x16x4xbf16>
    %85 = vector.extract_strided_slice %53 {offsets = [0, 1, 0], sizes = [8, 16, 4], strides = [1, 1, 1]} : vector<9x17x4xbf16> to vector<8x16x4xbf16>
    %86 = vector.extract_strided_slice %67 {offsets = [1, 0, 0], sizes = [8, 16, 4], strides = [1, 1, 1]} : vector<9x17x4xbf16> to vector<8x16x4xbf16>
    %87 = vector.extract_strided_slice %60 {offsets = [1, 0, 0], sizes = [8, 16, 4], strides = [1, 1, 1]} : vector<9x17x4xbf16> to vector<8x16x4xbf16>
    %88 = vector.extract_strided_slice %67 {offsets = [1, 1, 0], sizes = [8, 16, 4], strides = [1, 1, 1]} : vector<9x17x4xbf16> to vector<8x16x4xbf16>
    %89 = tpu.concatenate %80, %81, %82, %83, %84, %85, %86, %87, %88 in 2 : vector<8x16x4xbf16>, vector<8x16x4xbf16>, vector<8x16x4xbf16>, vector<8x16x4xbf16>, vector<8x16x4xbf16>, vector<8x16x4xbf16>, vector<8x16x4xbf16>, vector<8x16x4xbf16>, vector<8x16x4xbf16> -> vector<8x16x36xbf16>
    %90 = vector.shape_cast %89 : vector<8x16x36xbf16> to vector<128x36xbf16>
    %cst_42 = arith.constant dense<0.000000e+00> : vector<128x4xf32>
    %91 = tpu.matmul %90, %75, %cst_42 {dimension_numbers = #tpu.dot_dimension_numbers<[1], [0], [0], [1], [0, 0, 1, 1], [], []>} : vector<128x36xbf16>, vector<36x4xbf16>, vector<128x4xf32> -> vector<128x4xf32>
    %92 = vector.broadcast %76 : vector<1x4xf32> to vector<128x4xf32>
    %93 = arith.addf %91, %92 : vector<128x4xf32>
    %94 = arith.mulf %93, %93 : vector<128x4xf32>
    %95 = arith.truncf %94 : vector<128x4xf32> to vector<128x4xbf16>
    %cst_43 = arith.constant dense<0.000000e+00> : vector<128x4xf32>
    %96 = tpu.matmul %95, %77, %cst_43 {dimension_numbers = #tpu.dot_dimension_numbers<[1], [0], [0], [1], [0, 0, 1, 1], [], []>} : vector<128x4xbf16>, vector<4x4xbf16>, vector<128x4xf32> -> vector<128x4xf32>
    %97 = vector.broadcast %78 : vector<1x4xf32> to vector<128x4xf32>
    %98 = arith.addf %96, %97 : vector<128x4xf32>
    %99 = math.sqrt %98 : vector<128x4xf32>
    %100 = arith.mulf %93, %99 : vector<128x4xf32>
    %101 = vector.broadcast %79 : vector<1x4xf32> to vector<128x4xf32>
    %102 = arith.addf %100, %101 : vector<128x4xf32>
    %103 = arith.addf %102, %74 : vector<128x4xf32>
    %104 = vector.shape_cast %103 : vector<128x4xf32> to vector<8x16x4xf32>
    %c0_44 = arith.constant 0 : index
    %c0_45 = arith.constant 0 : index
    %c0_46 = arith.constant 0 : index
    %c0_47 = arith.constant 0 : index
    %c0_48 = arith.constant 0 : index
    %105 = vector.load %arg11[%c0_44, %c0_45, %c0_46, %c0_47, %c0_48] : memref<1x4x8x16x4xf32, #tpu.memory_space<vmem>>, vector<1x1x8x16x4xf32>
    %106 = vector.shape_cast %105 : vector<1x1x8x16x4xf32> to vector<8x16x4xf32>
    %107 = vector.shape_cast %104 : vector<8x16x4xf32> to vector<1x1x8x16x4xf32>
    tpu.vector_store %arg11[%c0_44, %c0_45, %c0_46, %c0_47, %c0_48], %107 {strides = array<i32>} : memref<1x4x8x16x4xf32, #tpu.memory_space<vmem>>, vector<1x1x8x16x4xf32>,
    %108 = vector.extract_strided_slice %60 {offsets = [0, 0, 0], sizes = [8, 16, 4], strides = [1, 1, 1]} : vector<9x17x4xbf16> to vector<8x16x4xbf16>
    %109 = vector.extract_strided_slice %67 {offsets = [0, 1, 0], sizes = [8, 16, 4], strides = [1, 1, 1]} : vector<9x17x4xbf16> to vector<8x16x4xbf16>
    %110 = vector.extract_strided_slice %60 {offsets = [0, 1, 0], sizes = [8, 16, 4], strides = [1, 1, 1]} : vector<9x17x4xbf16> to vector<8x16x4xbf16>
    %111 = vector.extract_strided_slice %46 {offsets = [0, 0, 0], sizes = [8, 16, 4], strides = [1, 1, 1]} : vector<9x17x4xbf16> to vector<8x16x4xbf16>
    %112 = vector.extract_strided_slice %53 {offsets = [0, 1, 0], sizes = [8, 16, 4], strides = [1, 1, 1]} : vector<9x17x4xbf16> to vector<8x16x4xbf16>
    %113 = vector.extract_strided_slice %46 {offsets = [0, 1, 0], sizes = [8, 16, 4], strides = [1, 1, 1]} : vector<9x17x4xbf16> to vector<8x16x4xbf16>
    %114 = vector.extract_strided_slice %60 {offsets = [1, 0, 0], sizes = [8, 16, 4], strides = [1, 1, 1]} : vector<9x17x4xbf16> to vector<8x16x4xbf16>
    %115 = vector.extract_strided_slice %67 {offsets = [1, 1, 0], sizes = [8, 16, 4], strides = [1, 1, 1]} : vector<9x17x4xbf16> to vector<8x16x4xbf16>
    %116 = vector.extract_strided_slice %60 {offsets = [1, 1, 0], sizes = [8, 16, 4], strides = [1, 1, 1]} : vector<9x17x4xbf16> to vector<8x16x4xbf16>
    %117 = tpu.concatenate %108, %109, %110, %111, %112, %113, %114, %115, %116 in 2 : vector<8x16x4xbf16>, vector<8x16x4xbf16>, vector<8x16x4xbf16>, vector<8x16x4xbf16>, vector<8x16x4xbf16>, vector<8x16x4xbf16>, vector<8x16x4xbf16>, vector<8x16x4xbf16>, vector<8x16x4xbf16> -> vector<8x16x36xbf16>
    %118 = vector.shape_cast %117 : vector<8x16x36xbf16> to vector<128x36xbf16>
    %cst_49 = arith.constant dense<0.000000e+00> : vector<128x4xf32>
    %119 = tpu.matmul %118, %75, %cst_49 {dimension_numbers = #tpu.dot_dimension_numbers<[1], [0], [0], [1], [0, 0, 1, 1], [], []>} : vector<128x36xbf16>, vector<36x4xbf16>, vector<128x4xf32> -> vector<128x4xf32>
    %120 = vector.broadcast %76 : vector<1x4xf32> to vector<128x4xf32>
    %121 = arith.addf %119, %120 : vector<128x4xf32>
    %122 = arith.mulf %121, %121 : vector<128x4xf32>
    %123 = arith.truncf %122 : vector<128x4xf32> to vector<128x4xbf16>
    %cst_50 = arith.constant dense<0.000000e+00> : vector<128x4xf32>
    %124 = tpu.matmul %123, %77, %cst_50 {dimension_numbers = #tpu.dot_dimension_numbers<[1], [0], [0], [1], [0, 0, 1, 1], [], []>} : vector<128x4xbf16>, vector<4x4xbf16>, vector<128x4xf32> -> vector<128x4xf32>
    %125 = vector.broadcast %78 : vector<1x4xf32> to vector<128x4xf32>
    %126 = arith.addf %124, %125 : vector<128x4xf32>
    %127 = math.sqrt %126 : vector<128x4xf32>
    %128 = arith.mulf %121, %127 : vector<128x4xf32>
    %129 = vector.broadcast %79 : vector<1x4xf32> to vector<128x4xf32>
    %130 = arith.addf %128, %129 : vector<128x4xf32>
    %131 = vector.shape_cast %130 : vector<128x4xf32> to vector<8x16x4xf32>
    %c0_51 = arith.constant 0 : index
    %c1_52 = arith.constant 1 : index
    %c0_53 = arith.constant 0 : index
    %c0_54 = arith.constant 0 : index
    %c0_55 = arith.constant 0 : index
    %132 = vector.load %arg11[%c0_51, %c1_52, %c0_53, %c0_54, %c0_55] : memref<1x4x8x16x4xf32, #tpu.memory_space<vmem>>, vector<1x1x8x16x4xf32>
    %133 = vector.shape_cast %132 : vector<1x1x8x16x4xf32> to vector<8x16x4xf32>
    %134 = vector.shape_cast %131 : vector<8x16x4xf32> to vector<1x1x8x16x4xf32>
    tpu.vector_store %arg11[%c0_51, %c1_52, %c0_53, %c0_54, %c0_55], %134 {strides = array<i32>} : memref<1x4x8x16x4xf32, #tpu.memory_space<vmem>>, vector<1x1x8x16x4xf32>,
    %135 = vector.extract_strided_slice %53 {offsets = [0, 0, 0], sizes = [8, 16, 4], strides = [1, 1, 1]} : vector<9x17x4xbf16> to vector<8x16x4xbf16>
    %136 = vector.extract_strided_slice %46 {offsets = [0, 0, 0], sizes = [8, 16, 4], strides = [1, 1, 1]} : vector<9x17x4xbf16> to vector<8x16x4xbf16>
    %137 = vector.extract_strided_slice %53 {offsets = [0, 1, 0], sizes = [8, 16, 4], strides = [1, 1, 1]} : vector<9x17x4xbf16> to vector<8x16x4xbf16>
    %138 = vector.extract_strided_slice %67 {offsets = [1, 0, 0], sizes = [8, 16, 4], strides = [1, 1, 1]} : vector<9x17x4xbf16> to vector<8x16x4xbf16>
    %139 = vector.extract_strided_slice %60 {offsets = [1, 0, 0], sizes = [8, 16, 4], strides = [1, 1, 1]} : vector<9x17x4xbf16> to vector<8x16x4xbf16>
    %140 = vector.extract_strided_slice %67 {offsets = [1, 1, 0], sizes = [8, 16, 4], strides = [1, 1, 1]} : vector<9x17x4xbf16> to vector<8x16x4xbf16>
    %141 = vector.extract_strided_slice %53 {offsets = [1, 0, 0], sizes = [8, 16, 4], strides = [1, 1, 1]} : vector<9x17x4xbf16> to vector<8x16x4xbf16>
    %142 = vector.extract_strided_slice %46 {offsets = [1, 0, 0], sizes = [8, 16, 4], strides = [1, 1, 1]} : vector<9x17x4xbf16> to vector<8x16x4xbf16>
    %143 = vector.extract_strided_slice %53 {offsets = [1, 1, 0], sizes = [8, 16, 4], strides = [1, 1, 1]} : vector<9x17x4xbf16> to vector<8x16x4xbf16>
    %144 = tpu.concatenate %135, %136, %137, %138, %139, %140, %141, %142, %143 in 2 : vector<8x16x4xbf16>, vector<8x16x4xbf16>, vector<8x16x4xbf16>, vector<8x16x4xbf16>, vector<8x16x4xbf16>, vector<8x16x4xbf16>, vector<8x16x4xbf16>, vector<8x16x4xbf16>, vector<8x16x4xbf16> -> vector<8x16x36xbf16>
    %145 = vector.shape_cast %144 : vector<8x16x36xbf16> to vector<128x36xbf16>
    %cst_56 = arith.constant dense<0.000000e+00> : vector<128x4xf32>
    %146 = tpu.matmul %145, %75, %cst_56 {dimension_numbers = #tpu.dot_dimension_numbers<[1], [0], [0], [1], [0, 0, 1, 1], [], []>} : vector<128x36xbf16>, vector<36x4xbf16>, vector<128x4xf32> -> vector<128x4xf32>
    %147 = vector.broadcast %76 : vector<1x4xf32> to vector<128x4xf32>
    %148 = arith.addf %146, %147 : vector<128x4xf32>
    %149 = arith.mulf %148, %148 : vector<128x4xf32>
    %150 = arith.truncf %149 : vector<128x4xf32> to vector<128x4xbf16>
    %cst_57 = arith.constant dense<0.000000e+00> : vector<128x4xf32>
    %151 = tpu.matmul %150, %77, %cst_57 {dimension_numbers = #tpu.dot_dimension_numbers<[1], [0], [0], [1], [0, 0, 1, 1], [], []>} : vector<128x4xbf16>, vector<4x4xbf16>, vector<128x4xf32> -> vector<128x4xf32>
    %152 = vector.broadcast %78 : vector<1x4xf32> to vector<128x4xf32>
    %153 = arith.addf %151, %152 : vector<128x4xf32>
    %154 = math.sqrt %153 : vector<128x4xf32>
    %155 = arith.mulf %148, %154 : vector<128x4xf32>
    %156 = vector.broadcast %79 : vector<1x4xf32> to vector<128x4xf32>
    %157 = arith.addf %155, %156 : vector<128x4xf32>
    %158 = vector.shape_cast %157 : vector<128x4xf32> to vector<8x16x4xf32>
    %c0_58 = arith.constant 0 : index
    %c2 = arith.constant 2 : index
    %c0_59 = arith.constant 0 : index
    %c0_60 = arith.constant 0 : index
    %c0_61 = arith.constant 0 : index
    %159 = vector.load %arg11[%c0_58, %c2, %c0_59, %c0_60, %c0_61] : memref<1x4x8x16x4xf32, #tpu.memory_space<vmem>>, vector<1x1x8x16x4xf32>
    %160 = vector.shape_cast %159 : vector<1x1x8x16x4xf32> to vector<8x16x4xf32>
    %161 = vector.shape_cast %158 : vector<8x16x4xf32> to vector<1x1x8x16x4xf32>
    tpu.vector_store %arg11[%c0_58, %c2, %c0_59, %c0_60, %c0_61], %161 {strides = array<i32>} : memref<1x4x8x16x4xf32, #tpu.memory_space<vmem>>, vector<1x1x8x16x4xf32>,
    %162 = vector.extract_strided_slice %46 {offsets = [0, 0, 0], sizes = [8, 16, 4], strides = [1, 1, 1]} : vector<9x17x4xbf16> to vector<8x16x4xbf16>
    %163 = vector.extract_strided_slice %53 {offsets = [0, 1, 0], sizes = [8, 16, 4], strides = [1, 1, 1]} : vector<9x17x4xbf16> to vector<8x16x4xbf16>
    %164 = vector.extract_strided_slice %46 {offsets = [0, 1, 0], sizes = [8, 16, 4], strides = [1, 1, 1]} : vector<9x17x4xbf16> to vector<8x16x4xbf16>
    %165 = vector.extract_strided_slice %60 {offsets = [1, 0, 0], sizes = [8, 16, 4], strides = [1, 1, 1]} : vector<9x17x4xbf16> to vector<8x16x4xbf16>
    %166 = vector.extract_strided_slice %67 {offsets = [1, 1, 0], sizes = [8, 16, 4], strides = [1, 1, 1]} : vector<9x17x4xbf16> to vector<8x16x4xbf16>
    %167 = vector.extract_strided_slice %60 {offsets = [1, 1, 0], sizes = [8, 16, 4], strides = [1, 1, 1]} : vector<9x17x4xbf16> to vector<8x16x4xbf16>
    %168 = vector.extract_strided_slice %46 {offsets = [1, 0, 0], sizes = [8, 16, 4], strides = [1, 1, 1]} : vector<9x17x4xbf16> to vector<8x16x4xbf16>
    %169 = vector.extract_strided_slice %53 {offsets = [1, 1, 0], sizes = [8, 16, 4], strides = [1, 1, 1]} : vector<9x17x4xbf16> to vector<8x16x4xbf16>
    %170 = vector.extract_strided_slice %46 {offsets = [1, 1, 0], sizes = [8, 16, 4], strides = [1, 1, 1]} : vector<9x17x4xbf16> to vector<8x16x4xbf16>
    %171 = tpu.concatenate %162, %163, %164, %165, %166, %167, %168, %169, %170 in 2 : vector<8x16x4xbf16>, vector<8x16x4xbf16>, vector<8x16x4xbf16>, vector<8x16x4xbf16>, vector<8x16x4xbf16>, vector<8x16x4xbf16>, vector<8x16x4xbf16>, vector<8x16x4xbf16>, vector<8x16x4xbf16> -> vector<8x16x36xbf16>
    %172 = vector.shape_cast %171 : vector<8x16x36xbf16> to vector<128x36xbf16>
    %cst_62 = arith.constant dense<0.000000e+00> : vector<128x4xf32>
    %173 = tpu.matmul %172, %75, %cst_62 {dimension_numbers = #tpu.dot_dimension_numbers<[1], [0], [0], [1], [0, 0, 1, 1], [], []>} : vector<128x36xbf16>, vector<36x4xbf16>, vector<128x4xf32> -> vector<128x4xf32>
    %174 = vector.broadcast %76 : vector<1x4xf32> to vector<128x4xf32>
    %175 = arith.addf %173, %174 : vector<128x4xf32>
    %176 = arith.mulf %175, %175 : vector<128x4xf32>
    %177 = arith.truncf %176 : vector<128x4xf32> to vector<128x4xbf16>
    %cst_63 = arith.constant dense<0.000000e+00> : vector<128x4xf32>
    %178 = tpu.matmul %177, %77, %cst_63 {dimension_numbers = #tpu.dot_dimension_numbers<[1], [0], [0], [1], [0, 0, 1, 1], [], []>} : vector<128x4xbf16>, vector<4x4xbf16>, vector<128x4xf32> -> vector<128x4xf32>
    %179 = vector.broadcast %78 : vector<1x4xf32> to vector<128x4xf32>
    %180 = arith.addf %178, %179 : vector<128x4xf32>
    %181 = math.sqrt %180 : vector<128x4xf32>
    %182 = arith.mulf %175, %181 : vector<128x4xf32>
    %183 = vector.broadcast %79 : vector<1x4xf32> to vector<128x4xf32>
    %184 = arith.addf %182, %183 : vector<128x4xf32>
    %185 = vector.shape_cast %184 : vector<128x4xf32> to vector<8x16x4xf32>
    %c0_64 = arith.constant 0 : index
    %c3 = arith.constant 3 : index
    %c0_65 = arith.constant 0 : index
    %c0_66 = arith.constant 0 : index
    %c0_67 = arith.constant 0 : index
    %186 = vector.load %arg11[%c0_64, %c3, %c0_65, %c0_66, %c0_67] : memref<1x4x8x16x4xf32, #tpu.memory_space<vmem>>, vector<1x1x8x16x4xf32>
    %187 = vector.shape_cast %186 : vector<1x1x8x16x4xf32> to vector<8x16x4xf32>
    %188 = vector.shape_cast %185 : vector<8x16x4xf32> to vector<1x1x8x16x4xf32>
    tpu.vector_store %arg11[%c0_64, %c3, %c0_65, %c0_66, %c0_67], %188 {strides = array<i32>} : memref<1x4x8x16x4xf32, #tpu.memory_space<vmem>>, vector<1x1x8x16x4xf32>,
    return
  }
  func.func @transform_0(%arg0: i32, %arg1: i32) -> (i32, i32, i32, i32) {
    %c0_i32 = arith.constant 0 : i32
    %c0_i32_0 = arith.constant 0 : i32
    %c0_i32_1 = arith.constant 0 : i32
    %c0_i32_2 = arith.constant 0 : i32
    return %arg0, %c0_i32, %c0_i32_0, %c0_i32_1 : i32, i32, i32, i32
  }
  func.func @transform_1(%arg0: i32, %arg1: i32) -> (i32, i32) {
    %c0_i32 = arith.constant 0 : i32
    %c0_i32_0 = arith.constant 0 : i32
    %c0_i32_1 = arith.constant 0 : i32
    return %c0_i32, %c0_i32_0 : i32, i32
  }
  func.func @transform_2(%arg0: i32, %arg1: i32) -> (i32, i32) {
    %c0_i32 = arith.constant 0 : i32
    %c0_i32_0 = arith.constant 0 : i32
    %c0_i32_1 = arith.constant 0 : i32
    return %c0_i32, %c0_i32_0 : i32, i32
  }
  func.func @transform_3(%arg0: i32, %arg1: i32) -> (i32, i32) {
    %c0_i32 = arith.constant 0 : i32
    %c0_i32_0 = arith.constant 0 : i32
    %c0_i32_1 = arith.constant 0 : i32
    return %c0_i32, %c0_i32_0 : i32, i32
  }
  func.func @transform_4(%arg0: i32, %arg1: i32) -> (i32, i32) {
    %c0_i32 = arith.constant 0 : i32
    %c0_i32_0 = arith.constant 0 : i32
    %c0_i32_1 = arith.constant 0 : i32
    return %c0_i32, %c0_i32_0 : i32, i32
  }
  func.func @transform_5(%arg0: i32, %arg1: i32) -> (i32, i32) {
    %c0_i32 = arith.constant 0 : i32
    %c0_i32_0 = arith.constant 0 : i32
    %c0_i32_1 = arith.constant 0 : i32
    return %c0_i32, %c0_i32_0 : i32, i32
  }
  func.func @transform_6(%arg0: i32, %arg1: i32) -> (i32, i32) {
    %c0_i32 = arith.constant 0 : i32
    %c0_i32_0 = arith.constant 0 : i32
    %c0_i32_1 = arith.constant 0 : i32
    return %c0_i32, %c0_i32_0 : i32, i32
  }
  func.func @transform_7(%arg0: i32, %arg1: i32) -> (i32, i32) {
    %c0_i32 = arith.constant 0 : i32
    %c0_i32_0 = arith.constant 0 : i32
    %c0_i32_1 = arith.constant 0 : i32
    return %c0_i32, %c0_i32_0 : i32, i32
  }
  func.func @transform_8(%arg0: i32, %arg1: i32) -> (i32, i32) {
    %c0_i32 = arith.constant 0 : i32
    %c0_i32_0 = arith.constant 0 : i32
    %c0_i32_1 = arith.constant 0 : i32
    return %c0_i32, %c0_i32_0 : i32, i32
  }
  func.func @transform_9(%arg0: i32, %arg1: i32) -> (i32, i32, i32, i32, i32) {
    %c0_i32 = arith.constant 0 : i32
    %c0_i32_0 = arith.constant 0 : i32
    %c0_i32_1 = arith.constant 0 : i32
    %c0_i32_2 = arith.constant 0 : i32
    return %arg0, %c0_i32, %arg1, %c0_i32_0, %c0_i32_1 : i32, i32, i32, i32, i32
  }
}

</mosaic_0001>

<bundles_post_ra>
// kernel: tpu_custom_call.1
= control target key start
LH: loop header
LB: loop body
LE: loop exit
PB: predicated region body
PF: predicated region fallthrough
CT: control target
= control target key end

     0   :  { %s5414_s30 = smov 0   ;;  %s5416_s10 = smov 0   ;;  %s8772_s0 = inlined_call_operand.vmem [shape: bf16[2,18,17,4], index: 0, kind: input, shape index: {}]   ;;  %s8773_s1 = inlined_call_operand.vmem [shape: bf16[16,16], index: 1, kind: input, shape index: {}]   ;;  %s8774_s2 = inlined_call_operand.vmem [shape: f32[1,16], index: 2, kind: input, shape index: {}]   ;;  %s8775_s3 = inlined_call_operand.vmem [shape: bf16[36,4], index: 3, kind: input, shape index: {}]   ;;  %s8776_s4 = inlined_call_operand.vmem [shape: f32[1,4], index: 4, kind: input, shape index: {}]   ;;  %s8777_s5 = inlined_call_operand.vmem [shape: bf16[4,4], index: 5, kind: input, shape index: {}]   ;;  %s8778_s6 = inlined_call_operand.vmem [shape: f32[1,4], index: 6, kind: input, shape index: {}]   ;;  %s8779_s7 = inlined_call_operand.vmem [shape: bf16[4,4], index: 7, kind: input, shape index: {}]   ;;  %s8780_s8 = inlined_call_operand.vmem [shape: f32[1,4], index: 8, kind: input, shape index: {}]   ;;  %s8781_s9 = inlined_call_operand.vmem [shape: f32[2,4,16,16,4], index: 9, kind: output, shape index: {}]  }
   0x1   :  { %s5418_s11 = smov 0   ;;  %s5420_s12 = smov 0  }
   0x2   :  { %s5422_s13 = smov 0   ;;  %s5424_s14 = smov 0  }
   0x3   :  { %s5426_s15 = smov 0  }
   0x4 LB: > { %s28_s16 = sadd.s32 1, %s5342_s13  ;;  %s31_s17 = sadd.s32 1, %s5346_s14  ;;  %s5350_s15 = sphi %s5426_s15, %s19_s15   ;;  %s5346_s14 = sphi %s5424_s14, %s9072_s14   ;;  %s5342_s13 = sphi %s5422_s13, %s9071_s13   ;;  %s5338_s12 = sphi %s5420_s12, %s9070_s12   ;;  %s5334_s11 = sphi %s5418_s11, %s9069_s11   ;;  %s5330_s10 = sphi %s5416_s10, %s9068_s10   ;;  %s5326_s30 = sphi %s5414_s30, %s9067_s30  }
   0x5   : > { %p29_p0 = scmp.ge.s32.totalorder %s28_s16, 2  ;;  %s4749_s18 = sadd.s32 4294967295, %s5350_s15  }
   0x6   : > { %p244_p1 = scmp.ne.s32.totalorder %s5330_s10, %s5326_s30  ;;  %p245_p2 = scmp.eq.s32.totalorder %s4749_s18, 3 }
   0x7   : > { %s9074_s16 = smov (%p29_p0, %s28_s16), 0  ;;  %s9076_s17 = smov (!%p29_p0, %s31_s17), %s5346_s14 }
   0x8   : > { %8864 = sst [smem:[#allocation3_spill]] %s9074_s16  ;;  %s230_s19 = ssub.s32 %s5342_s13, %s9074_s16 }
   0x9   : > { %p33_p3 = scmp.ge.s32.totalorder %s9076_s17, 2  ;;  %p4753_p4 = scmp.ge.s32.totalorder %s5350_s15, 1 }
   0xa   : > { %p5460_p5 = por %p245_p2, %p244_p1  ;;  %p301_p6 = scmp.lt.s32.totalorder %s5350_s15, 5 }
   0xb   : > { %s9078_s17 = smov (%p33_p3, %s9076_s17), 0  ;;  %s234_s23 = sadd.s32 1, %s5330_s10 }
   0xc   : > { %p302_p7 = pnand %p4753_p4, %p301_p6  ;;  %s229_s21 = ssub.s32 %s5346_s14, %s9078_s17 }
   0xd   : > { %s231_s22 = sor.u32 %s230_s19, %s229_s21 }
   0xe   : > { %p232_p8 = scmp.eq.s32.totalorder %s231_s22, 0  ;;  %305 = sbr.rel (%p302_p7) target bundleno = 1499 (0x5db), region = 56 }
  0x10   : > { %s5471_s24 = scalar_select %p232_p8, %s5330_s10, %s234_s23  }
  0x13   : > { %p336_p9 = scmp.lt.s32.totalorder %s5338_s12, 1  ;;  %s5056_s26 = smul.u32 96, %s5334_s11  ;;  %vm477_vm0 = vsmask.f32 7424  ;;  %vm820_vm1 = vcmask 31744   ;;  %vm839_vm2 = vcmask 64512  }
  0x14   : > { %s8819_s19 = smov 8   ;;  %s5353_s21 = smov 4   ;;  %vm858_vm3 = vcmask 97280   ;;  %vm889_vm4 = vcmask 130048  }
  0x15   : > { %s337_s25 = scalar_select %p336_p9, %s5338_s12, 1 }
  0x16   : > { %s8817_s22 = smov 12   ;;  %p1020_p10 = scmp.gt.s32.totalorder %s5334_s11, 0 }
  0x17   : > { %s5089_s27 = smul.u32 216, %s337_s25  ;;  %s8838_s29 = smov 16  }
  0x18   : > { %s1021_s28 = scalar_select %p1020_p10, 1, 0 }
  0x19   : > { %s340_s18 = scalar_lea.vmem %s8772_s0, %s5089_s27  ;;  %s5358_s23 = smov 120  }
  0x1a   : > { %s5479_s16 = scalar_lea.vmem %s340_s18, %s5056_s26  ;;  %s8821_s18 = smov 20  }
  0x1b   : > { %v5066_v0 = vld [vmem:[%s5479_s16 + $0xc] sm:$0xff]  ;;  %v5483_v1 = vld [vmem:[%s5479_s16 + $0x24] sm:$0xff]  ;;  %v4779_v4 = vld [vmem:[%s5479_s16 + $0x14] sm:$0x1]  ;;  %s5359_s25 = smov 124   ;;  %s5360_s26 = smov 116  }
  0x1c   : > { %v5486_v2 = vld [vmem:[%s5479_s16] sm:$0xff]  ;;  %v365_v3 = vld [vmem:[%s5479_s16 + $0x8] sm:$0x1]  ;;  %v5491_v5 = vld [vmem:[%s5479_s16 + $0x18] sm:$0xff]  ;;  %649 = vrot.lane.b32.xlu0 %v5066_v0, %s8819_s19  ;;  %v697_v6 = vshll.u32 %v5066_v0, 16  ;;  %v676_v11 = vunpack.c.l.b16 %v4779_v4  ;;  %v695_v12 = vshrl.u32 %v5066_v0, 16 }
  0x1d   : > { %653 = vrot.lane.b32.xlu1 %v5483_v1, %s8819_s19  ;;  %v459_v7 = vunpack.c.l.b16 %v365_v3  ;;  %v479_v8 = vshrl.u32 %v5486_v2, 16  ;;  %v367_v9 = vld [vmem:[%s5479_s16 + $0x20] sm:$0x1]  ;;  %v481_v10 = vshll.u32 %v5486_v2, 16  ;;  %v366_v14 = vld [vmem:[%s5479_s16 + $0x14] sm:$0x1] }
  0x1e   : > { %v461_v13 = vunpack.c.l.b16 %v367_v9  ;;  %v5067_v15 = vld [vmem:[%s5479_s16 + $0x18] sm:$0xff]  ;;  %v699_v17 = vrot.slane %v697_v6, 1  ;;  %v505_v18 = vshll.u32 %v5491_v5, 16  ;;  %v5503_v19 = vld [vmem:[%s5479_s16 + $0xc] sm:$0xff]  ;;  %v685_v21 = vpack.c.b16 %v676_v11, %v676_v11  ;;  %v4780_v27 = vld [vmem:[%s5479_s16 + $0x20] sm:$0x1] }
  0x1f   : > { %v468_v16 = vpack.c.b16 %v459_v7, %v459_v7  ;;  %v483_v20 = vrot.slane %v481_v10, 1  ;;  %v460_v23 = vunpack.c.l.b16 %v366_v14  ;;  %651 = vrot.lane.b32.xlu2 %v5067_v15, %s8819_s19  ;;  %v503_v26 = vshrl.u32 %v5491_v5, 16  ;;  %v4781_v40 = vld [vmem:[%s5479_s16 + $0x2c] sm:$0x1]  ;;  %v5513_v45 = vld [vmem:[%s5479_s16 + $0x24] sm:$0xff]  ;;  %s8840_s27 = smov 24  }
  0x20   : > { %v470_v22 = vpack.c.b16 %v461_v13, %v461_v13  ;;  %v700_v25 = vor.u32 %v699_v17, %v695_v12  ;;  %v702_v29 = vshll.u32 %v685_v21, 16  ;;  %v507_v30 = vrot.slane %v505_v18, 1  ;;  %v368_v46 = vld [vmem:[%s5479_s16 + $0x2c] sm:$0x1]  ;;  %v4782_v54 = vld [vmem:[%s5479_s16 + $0x38] sm:$0x1] }
  0x21   : > { %v486_v24 = vshll.u32 %v468_v16, 16  ;;  %v484_v28 = vor.u32 %v483_v20, %v479_v8  ;;  %v469_v31 = vpack.c.b16 %v460_v23, %v460_v23  ;;  %v493_v34 = vshll.u32 %v5503_v19, 16  ;;  %v5069_v12 = vld [vmem:[%s5479_s16 + $0x30] sm:$0xff]  ;;  %p1016_p11 = scmp.lt.s32.totalorder %s5334_s11, 1 }
  0x22   : > { %v510_v33 = vshll.u32 %v470_v22, 16  ;;  %v709_v35 = vshll.u32 %v5067_v15, 16  ;;  %v704_v36 = vrot.slane %v702_v29, 1  ;;  %v491_v37 = vshrl.u32 %v5503_v19, 16 }
  0x23   : > { %v488_v32 = vrot.slane %v486_v24, 1  ;;  %v498_v38 = vshll.u32 %v469_v31, 16  ;;  %v677_v39 = vunpack.c.l.b16 %v4780_v27  ;;  %v495_v42 = vrot.slane %v493_v34, 1  ;;  %v369_v27 = vld [vmem:[%s5479_s16 + $0x38] sm:$0x1] }
  0x24   : > { %v707_v43 = vshrl.u32 %v5067_v15, 16  ;;  %v711_v44 = vrot.slane %v709_v35, 1  ;;  %v721_v47 = vshll.u32 %v5483_v1, 16  ;;  %v705_v48 = vsel %vm477_vm0, %v700_v25, %v704_v36 }
  0x25   : > { %v489_v41 = vsel %vm477_vm0, %v484_v28, %v488_v32  ;;  %v686_v49 = vpack.c.b16 %v677_v39, %v677_v39  ;;  %802 = vrot.lane.b32.xlu1 %v705_v48, %s8817_s22  ;;  %v508_v50 = vor.u32 %v507_v30, %v503_v26  ;;  %v512_v51 = vrot.slane %v510_v33, 1  ;;  %v5540_v28 = vld [vmem:[%s5479_s16 + $0x30] sm:$0xff]  ;;  %v5070_v33 = vld [vmem:[%s5479_s16 + $0x3c] sm:$0xff] }
  0x26   : > { %586 = vrot.lane.b32.xlu0 %v489_v41, %s5353_s21  ;;  %v500_v52 = vrot.slane %v498_v38, 1  ;;  %v678_v53 = vunpack.c.l.b16 %v4781_v40  ;;  %v496_v55 = vor.u32 %v495_v42, %v491_v37  ;;  %v712_v56 = vor.u32 %v711_v44, %v707_v43  ;;  %v5075_v39 = vld [vmem:[%s8773_s1] sm:$0xff] }
  0x27   : > { %v714_v57 = vshll.u32 %v686_v49, 16  ;;  %v462_v58 = vunpack.c.l.b16 %v368_v46  ;;  %v719_v60 = vshrl.u32 %v5483_v1, 16  ;;  %v517_v61 = vshll.u32 %v5513_v45, 16  ;;  %915 = vmatpush.bf16.msra.mxu0 %v5075_v39  ;;  %v4783_v40 = vld [vmem:[%s5479_s16 + $0x44] sm:$0x1]  ;;  %v5553_v48 = vld [vmem:[%s5479_s16 + $0x3c] sm:$0xff] }
  0x28   : > { %v687_v59 = vpack.c.b16 %v678_v53, %v678_v53  ;;  %v723_v63 = vrot.slane %v721_v47, 1  ;;  %v679_v3 = vunpack.c.l.b16 %v4782_v54  ;;  %v513_v4 = vsel %vm477_vm0, %v508_v50, %v512_v51  ;;  %v370_v49 = vld [vmem:[%s5479_s16 + $0x44] sm:$0x1]  ;;  %v5071_v50 = vld [vmem:[%s5479_s16 + $0x48] sm:$0xff] }
  0x29   : > { %v716_v62 = vrot.slane %v714_v57, 1  ;;  %v471_v0 = vpack.c.b16 %v462_v58, %v462_v58  ;;  %v515_v7 = vshrl.u32 %v5513_v45, 16  ;;  %v519_v8 = vrot.slane %v517_v61, 1 }
  0x2a   : > { %v726_v6 = vshll.u32 %v687_v59, 16  ;;  %v501_v9 = vsel %vm477_vm0, %v496_v55, %v500_v52  ;;  %v724_v1 = vor.u32 %v723_v63, %v719_v60  ;;  %v733_v14 = vshll.u32 %v5069_v12, 16 }
  0x2b   : > { %v717_v10 = vsel %vm477_vm0, %v712_v56, %v716_v62  ;;  %v522_v11 = vshll.u32 %v471_v0, 16  ;;  %v688_v15 = vpack.c.b16 %v679_v3, %v679_v3  ;;  %v520_v16 = vor.u32 %v519_v8, %v515_v7 }
  0x2c   : > { %804 = vrot.lane.b32.xlu2 %v717_v10, %s8817_s22  ;;  %v728_v13 = vrot.slane %v726_v6, 1  ;;  %v731_v20 = vshrl.u32 %v5069_v12, 16  ;;  %v735_v21 = vrot.slane %v733_v14, 1  ;;  %v463_v29 = vunpack.c.l.b16 %v369_v27  ;;  %v5572_v10 = vld [vmem:[%s5479_s16 + $0x48] sm:$0xff] }
  0x2d   : > { %588 = vrot.lane.b32.xlu1 %v501_v9, %s5353_s21  ;;  %v524_v17 = vrot.slane %v522_v11, 1  ;;  %v738_v22 = vshll.u32 %v688_v15, 16  ;;  %v527_v31 = vshrl.u32 %v5540_v28, 16  ;;  %v529_v32 = vshll.u32 %v5540_v28, 16  ;;  %v371_v11 = vld [vmem:[%s5479_s16 + $0x50] sm:$0x1] }
  0x2e   : > { %590 = vrot.lane.b32.xlu0 %v513_v4, %s5353_s21  ;;  %v729_v18 = vsel %vm477_vm0, %v724_v1, %v728_v13  ;;  %v736_v24 = vor.u32 %v735_v21, %v731_v20  ;;  %v472_v30 = vpack.c.b16 %v463_v29, %v463_v29  ;;  %v745_v41 = vshll.u32 %v5070_v33, 16  ;;  %v4784_v13 = vld [vmem:[%s5479_s16 + $0x50] sm:$0x1]  ;;  %v4785_v15 = vld [vmem:[%s5479_s16 + $0x5c] sm:$0x1] }
  0x2f   : > { %v525_v23 = vsel %vm477_vm0, %v520_v16, %v524_v17  ;;  %v740_v25 = vrot.slane %v738_v22, 1  ;;  %v531_v34 = vrot.slane %v529_v32, 1  ;;  %v680_v42 = vunpack.c.l.b16 %v4783_v40 }
  0x30   : > { %v534_v35 = vshll.u32 %v472_v30, 16  ;;  %v743_v44 = vshrl.u32 %v5070_v33, 16  ;;  %v747_v46 = vrot.slane %v745_v41, 1  ;;  %v464_v53 = vunpack.c.l.b16 %v370_v49  ;;  %v372_v49 = vld [vmem:[%s5479_s16 + $0x5c] sm:$0x1] }
  0x31   : > { %v741_v26 = vsel %vm477_vm0, %v736_v24, %v740_v25  ;;  %v532_v36 = vor.u32 %v531_v34, %v527_v31  ;;  %v689_v43 = vpack.c.b16 %v680_v42, %v680_v42  ;;  %v539_v54 = vshrl.u32 %v5553_v48, 16 }
  0x32   : > { %v536_v37 = vrot.slane %v534_v35, 1  ;;  %v748_v51 = vor.u32 %v747_v46, %v743_v44  ;;  %v541_v55 = vshll.u32 %v5553_v48, 16  ;;  %v473_v59 = vpack.c.b16 %v464_v53, %v464_v53 }
  0x33   : > { %v750_v47 = vshll.u32 %v689_v43, 16  ;;  %v757_v8 = vshll.u32 %v5071_v50, 16  ;;  %v465_v1 = vunpack.c.l.b16 %v371_v11  ;;  %v755_v14 = vshrl.u32 %v5071_v50, 16 }
  0x34   : > { %806 = vrot.lane.b32.xlu2 %v729_v18, %s8817_s22  ;;  %v537_v38 = vsel %vm477_vm0, %v532_v36, %v536_v37  ;;  %v543_v60 = vrot.slane %v541_v55, 1  ;;  %v546_v61 = vshll.u32 %v473_v59, 16  ;;  %v553_v17 = vshll.u32 %v5572_v10, 16 }
  0x35   : > { %655 = vrot.lane.b32.xlu1 %v5069_v12, %s8819_s19  ;;  %v752_v52 = vrot.slane %v750_v47, 1  ;;  %v5072_v12 = vld [vmem:[%s5479_s16 + $0x54] sm:$0xff]  ;;  %v681_v18 = vunpack.c.l.b16 %v4784_v13  ;;  %v759_v20 = vrot.slane %v757_v8, 1  ;;  %v474_v21 = vpack.c.b16 %v465_v1, %v465_v1 }
  0x36   : > { %592 = vrot.lane.b32.xlu0 %v525_v23, %s5353_s21  ;;  %v544_v62 = vor.u32 %v543_v60, %v539_v54  ;;  %v548_v63 = vrot.slane %v546_v61, 1  ;;  %v682_v22 = vunpack.c.l.b16 %v4785_v15  ;;  %v555_v23 = vrot.slane %v553_v17, 1  ;;  %v5592_v47 = vld [vmem:[%s5479_s16 + $0x54] sm:$0xff] }
  0x37   : > { %v753_v58 = vsel %vm477_vm0, %v748_v51, %v752_v52  ;;  %v769_v24 = vshll.u32 %v5072_v12, 16  ;;  %v690_v25 = vpack.c.b16 %v681_v18, %v681_v18  ;;  %v558_v27 = vshll.u32 %v474_v21, 16  ;;  %v4786_v52 = vld [vmem:[%s5479_s16 + $0x68] sm:$0x1] }
  0x38   : > { %v549_v0 = vsel %vm477_vm0, %v544_v62, %v548_v63  ;;  %v691_v29 = vpack.c.b16 %v682_v22, %v682_v22  ;;  %v760_v31 = vor.u32 %v759_v20, %v755_v14  ;;  %v767_v36 = vshrl.u32 %v5072_v12, 16  ;;  %v5617_v20 = vld [vmem:[%s5479_s16 + $0x60] sm:$0xff]  ;;  %v373_v21 = vld [vmem:[%s5479_s16 + $0x68] sm:$0x1] }
  0x39   : > { %v762_v32 = vshll.u32 %v690_v25, 16  ;;  %v560_v34 = vrot.slane %v558_v27, 1  ;;  %v771_v37 = vrot.slane %v769_v24, 1  ;;  %v466_v51 = vunpack.c.l.b16 %v372_v49 }
  0x3a   : > { %v563_v53 = vshrl.u32 %v5592_v47, 16  ;;  %v565_v54 = vshll.u32 %v5592_v47, 16  ;;  %v467_v22 = vunpack.c.l.b16 %v373_v21  ;;  %v577_v24 = vshll.u32 %v5617_v20, 16 }
  0x3b   : > { %v764_v35 = vrot.slane %v762_v32, 1  ;;  %v772_v42 = vor.u32 %v771_v37, %v767_v36  ;;  %v4787_v37 = vld [vmem:[%s5479_s16 + $0x74] sm:$0x1] }
  0x3c   : > { %808 = vrot.lane.b32.xlu2 %v741_v26, %s8817_s22  ;;  %v567_v60 = vrot.slane %v565_v54, 1  ;;  %v579_v25 = vrot.slane %v577_v24, 1  ;;  %v5643_v54 = vld [vmem:[%s8774_s2] ss:$0 sm:$0xff] }
  0x3d   : > { %657 = vrot.lane.b32.xlu1 %v5070_v33, %s8819_s19  ;;  %v765_v41 = vsel %vm477_vm0, %v760_v31, %v764_v35 }
  0x3e   : > { %594 = vrot.lane.b32.xlu0 %v537_v38, %s5353_s21  ;;  %v774_v38 = vshll.u32 %v691_v29, 16 }
  0x40   : > { %v776_v43 = vrot.slane %v774_v38, 1 }
  0x42   : > { %v777_v46 = vsel %vm477_vm0, %v772_v42, %v776_v43 }
  0x44   : > { %810 = vrot.lane.b32.xlu2 %v753_v58, %s8817_s22  ;;  %v475_v58 = vpack.c.b16 %v466_v51, %v466_v51 }
  0x45   : > { %659 = vrot.lane.b32.xlu1 %v5071_v50, %s8819_s19  ;;  %v5073_v50 = vld [vmem:[%s5479_s16 + $0x60] sm:$0xff] }
  0x46   : > { %596 = vrot.lane.b32.xlu0 %v549_v0, %s5353_s21  ;;  %v781_v55 = vshll.u32 %v5073_v50, 16  ;;  %v779_v59 = vshrl.u32 %v5073_v50, 16  ;;  %v570_v63 = vshll.u32 %v475_v58, 16 }
  0x48   : > { %v783_v62 = vrot.slane %v781_v55, 1 }
  0x4c   : > { %812 = vrot.lane.b32.xlu2 %v765_v41, %s8817_s22 }
  0x4d   : > { %661 = vrot.lane.b32.xlu1 %v5072_v12, %s8819_s19 }
  0x54   : > { %814 = vrot.lane.b32.xlu2 %v777_v46, %s8817_s22 }
  0x55   : > { %663 = vrot.lane.b32.xlu1 %v5073_v50, %s8819_s19 }
  0x79   : > { %v652_v16 = vpop.permute.xlu2 %651 }
  0x8e   : > { %v650_v56 = vpop.permute.xlu0 %649 }
  0x8f   : > { %v5560_v57 = vpop.permute.xlu1 %653 }
  0x97   : > { %v803_v6 = vpop.permute.xlu1 %802 }
  0x98   : > { %v587_v3 = vpop.permute.xlu0 %586 }
  0x99   : > { %v822_v4 = vsel %vm820_vm1, %v5486_v2, %v587_v3  ;;  %v551_v2 = vshrl.u32 %v5572_v10, 16  ;;  %v568_v3 = vor.u32 %v567_v60, %v563_v53 }
  0x9a   : > { %v841_v7 = vsel %vm839_vm2, %v822_v4, %v650_v56  ;;  %v683_v56 = vunpack.c.l.b16 %v4786_v52  ;;  %v784_v4 = vor.u32 %v783_v62, %v779_v59  ;;  %v1022_v59 = vstv %s1021_s28  ;;  %s8783_s28 = smov 28  }
  0x9b   : > { %v860_v9 = vsel %vm858_vm3, %v841_v7, %v803_v6  ;;  %v556_v30 = vor.u32 %v555_v23, %v551_v2  ;;  %v572_v7 = vrot.slane %v570_v63, 1  ;;  %v575_v23 = vshrl.u32 %v5617_v20, 16 }
  0x9c   : > { %4864 = vmatmul.msk.bf16.vlgmr.msra.gmra.mxu0 %vm889_vm4, %v860_v9  ;;  %v692_v61 = vpack.c.b16 %v683_v56, %v683_v56  ;;  %vm1023_vm6 = vcmp.eq.s32.totalorder %v1022_v59, 1 }
  0x9d   : > { %v561_v39 = vsel %vm477_vm0, %v556_v30, %v560_v34  ;;  %v573_v11 = vsel %vm477_vm0, %v568_v3, %v572_v7  ;;  %v580_v27 = vor.u32 %v579_v25, %v575_v23 }
  0x9e   : > { %598 = vrot.lane.b32.xlu0 %v561_v39, %s5353_s21  ;;  %v786_v6 = vshll.u32 %v692_v61, 16  ;;  %v684_v39 = vunpack.c.l.b16 %v4787_v37 }
  0x9f   : > { %v589_v26 = vpop.permute.xlu1 %588 }
  0xa0   : > { %v824_v33 = vsel %vm820_vm1, %v5503_v19, %v589_v26  ;;  %v805_v19 = vpop.permute.xlu2 %804  ;;  %v591_v0 = vpop.permute.xlu0 %590  ;;  %v788_v8 = vrot.slane %v786_v6, 1 }
  0xa1   : > { %v843_v40 = vsel %vm839_vm2, %v824_v33, %v652_v16  ;;  %v826_v9 = vsel %vm820_vm1, %v5491_v5, %v591_v0 }
  0xa2   : > { %v862_v44 = vsel %vm858_vm3, %v843_v40, %v805_v19  ;;  %v789_v12 = vsel %vm477_vm0, %v784_v4, %v788_v8  ;;  %v845_v13 = vsel %vm839_vm2, %v826_v9, %v5560_v57  ;;  %v5074_v57 = vld [vmem:[%s5479_s16 + $0x6c] sm:$0xff]  ;;  %v693_v40 = vpack.c.b16 %v684_v39, %v684_v39 }
  0xa3   : > { %816 = vrot.lane.b32.xlu2 %v789_v12, %s8817_s22  ;;  %665 = vrot.lane.b32.xlu1 %v5074_v57, %s8819_s19  ;;  %v793_v38 = vshll.u32 %v5074_v57, 16  ;;  %v791_v41 = vshrl.u32 %v5074_v57, 16 }
  0xa4   : > { %v798_v42 = vshll.u32 %v693_v40, 16 }
  0xa5   : > { %v795_v19 = vrot.slane %v793_v38, 1 }
  0xa6   : > { %600 = vrot.lane.b32.xlu0 %v573_v11, %s5353_s21 }
  0xa7   : > { %v656_v16 = vpop.permute.xlu1 %655  ;;  %v796_v43 = vor.u32 %v795_v19, %v791_v41 }
  0xa8   : > { %v807_v1 = vpop.permute.xlu2 %806  ;;  %v593_v5 = vpop.permute.xlu0 %592 }
  0xa9   : > { %v864_v14 = vsel %vm858_vm3, %v845_v13, %v807_v1  ;;  %v828_v15 = vsel %vm820_vm1, %v5513_v45, %v593_v5  ;;  %v476_v45 = vpack.c.b16 %v467_v22, %v467_v22 }
  0xaa   : > { %v847_v2 = vsel %vm839_vm2, %v828_v15, %v656_v16 }
  0xab   : > { %v582_v26 = vshll.u32 %v476_v45, 16  ;;  %v5356_v45 = vmov 0  }
  0xac   : > { %4865 = vmatmul.msk.bf16.gmra.mxu0 %vm889_vm4, %v862_v44  ;;  %v800_v44 = vrot.slane %v798_v42, 1  ;;  %v5661_v25 = vrot.slane %v5356_v45, 1 }
  0xad   : > { %v584_v29 = vrot.slane %v582_v26, 1 }
  0xae   : > { %v801_v46 = vsel %vm477_vm0, %v796_v43, %v800_v44  ;;  %8867 = vst [vmem:[#allocation5_spill] sm:$0xff] %v5661_v25 }
  0xaf   : > { %v585_v30 = vsel %vm477_vm0, %v580_v27, %v584_v29  ;;  %v658_v31 = vpop.permute.xlu1 %657  ;;  %818 = vrot.lane.b32.xlu2 %v801_v46, %s8817_s22 }
  0xb0   : > { %v809_v17 = vpop.permute.xlu2 %808  ;;  %602 = vrot.lane.b32.xlu0 %v585_v30, %s5353_s21  ;;  %v595_v32 = vpop.permute.xlu0 %594 }
  0xb1   : > { %v866_v18 = vsel %vm858_vm3, %v847_v2, %v809_v17  ;;  %v830_v33 = vsel %vm820_vm1, %v5540_v28, %v595_v32 }
  0xb2   : > { %v849_v34 = vsel %vm839_vm2, %v830_v33, %v658_v31 }
  0xb7   : > { %v660_v50 = vpop.permute.xlu1 %659 }
  0xb8   : > { %v811_v35 = vpop.permute.xlu2 %810  ;;  %v597_v28 = vpop.permute.xlu0 %596 }
  0xb9   : > { %v868_v36 = vsel %vm858_vm3, %v849_v34, %v811_v35  ;;  %v832_v49 = vsel %vm820_vm1, %v5553_v48, %v597_v28 }
  0xba   : > { %v851_v51 = vsel %vm839_vm2, %v832_v49, %v660_v50 }
  0xbc   : > { %4866 = vmatmul.msk.bf16.gmra.mxu0 %vm889_vm4, %v864_v14 }
  0xbf   : > { %v662_v61 = vpop.permute.xlu1 %661 }
  0xc0   : > { %v813_v52 = vpop.permute.xlu2 %812 }
  0xc1   : > { %v870_v53 = vsel %vm858_vm3, %v851_v51, %v813_v52 }
  0xc7   : > { %v664_v44 = vpop.permute.xlu1 %663 }
  0xc8   : > { %v815_v63 = vpop.permute.xlu2 %814 }
  0xcc   : > { %4867 = vmatmul.msk.bf16.gmra.mxu0 %vm889_vm4, %v866_v18 }
  0xdc   : > { %4868 = vmatmul.msk.bf16.gmra.mxu0 %vm889_vm4, %v868_v36 }
  0xec   : > { %4869 = vmatmul.msk.bf16.gmra.mxu0 %vm889_vm4, %v870_v53 }
  0xfd   : > { %v817_v28 = vpop.permute.xlu2 %816 }
 0x110   : > { %v599_v48 = vpop.permute.xlu0 %598 }
 0x111   : > { %v834_v60 = vsel %vm820_vm1, %v5572_v10, %v599_v48 }
 0x112   : > { %v853_v62 = vsel %vm839_vm2, %v834_v60, %v662_v61 }
 0x113   : > { %v872_v3 = vsel %vm858_vm3, %v853_v62, %v815_v63 }
 0x114   : > { %4870 = vmatmul.msk.bf16.gmra.mxu0 %vm889_vm4, %v872_v3 }
 0x118   : > { %v601_v43 = vpop.permute.xlu0 %600 }
 0x119   : > { %v917_v55 = vpop.f32.mrf.mxu0  ;;  %v836_v46 = vsel %vm820_vm1, %v5592_v47, %v601_v43 }
 0x11a   : > { %v918_v56 = vadd.f32 %v5643_v54, %v917_v55  ;;  %v855_v49 = vsel %vm839_vm2, %v836_v46, %v664_v44 }
 0x11b   : > { %v874_v50 = vsel %vm858_vm3, %v855_v49, %v817_v28 }
 0x11c   : > { %v980_v58 = vmul.f32 0.01, %v918_v56  ;;  %vm962_vm5 = vcmp.ge.f32.partialorder %v918_v56, 0.0 }
 0x11e   : > { %v998_v0 = vsel %vm962_vm5, %v918_v56, %v980_v58 }
 0x11f   : > { %v1229_v7 = vsel %vm1023_vm6, %v998_v0, 0.0  ;;  %v1044_v9 = vpack.c.bf16 %v998_v0, %v998_v0 }
 0x120   : > { %v1233_v11 = vpack.c.bf16 %v1229_v7, %v1229_v7 }
 0x121   : > { %v919_v4 = vpop.f32.mrf.mxu0  ;;  %v1080_v14 = vunpack.c.l.b16 %v1044_v9 }
 0x122   : > { %v920_v6 = vadd.f32 %v5643_v54, %v919_v4  ;;  %v1241_v16 = vunpack.c.l.b16 %v1233_v11  ;;  %v603_v9 = vpop.permute.xlu0 %602 }
 0x124   : > { %vm963_vm7 = vcmp.ge.f32.partialorder %v920_v6, 0.0  ;;  %v981_v8 = vmul.f32 0.01, %v920_v6  ;;  %4871 = vmatmul.msk.bf16.gmra.mxu0 %vm889_vm4, %v874_v50 }
 0x126   : > { %v999_v12 = vsel %vm963_vm7, %v920_v6, %v981_v8 }
 0x127   : > { %v1045_v10 = vpack.c.bf16 %v999_v12, %v999_v12  ;;  %v1230_v1 = vsel %vm1023_vm6, %v999_v12, 0.0  ;;  %v838_v12 = vsel %vm820_vm1, %v5617_v20, %v603_v9 }
 0x128   : > { %v1234_v13 = vpack.c.bf16 %v1230_v1, %v1230_v1 }
 0x129   : > { %v1081_v5 = vunpack.c.l.b16 %v1045_v10  ;;  %v922_v15 = vpop.f32.mrf.mxu0  ;;  %v666_v10 = vpop.permute.xlu1 %665 }
 0x12a   : > { %v1242_v2 = vunpack.c.l.b16 %v1234_v13  ;;  %v923_v17 = vadd.f32 %v5643_v54, %v922_v15 }
 0x12b   : > { %v5653_v18 = vpack.c.b16 %v1081_v5, %v1080_v14  ;;  %v857_v5 = vsel %vm839_vm2, %v838_v12, %v666_v10 }
 0x12c   : > { %v982_v21 = vmul.f32 0.01, %v923_v17  ;;  %v1245_v57 = vpack.c.b16 %v1242_v2, %v1241_v16  ;;  %vm964_vm8 = vcmp.ge.f32.partialorder %v923_v17, 0.0  ;;  %v819_v2 = vpop.permute.xlu2 %818 }
 0x12d   : > { %8866 = vst [vmem:[#allocation4_spill] sm:$0xff] %v5653_v18  ;;  %3067 = vrot.lane.b32.xlu1 %v5653_v18, %s5353_s21  ;;  %1610 = vrot.lane.b32.xlu0 %v5653_v18, %s8838_s29  ;;  %v1111_v22 = vshll.u32 %v5653_v18, 16  ;;  %v1108_v24 = vshrl.u32 %v5653_v18, 16  ;;  %v876_v20 = vsel %vm858_vm3, %v857_v5, %v819_v2 }
 0x12e   : > { %v1251_v23 = vshll.u32 %v1245_v57, 16  ;;  %v1000_v27 = vsel %vm964_vm8, %v923_v17, %v982_v21  ;;  %v1248_v29 = vshrl.u32 %v1245_v57, 16 }
 0x12f   : > { %v2479_v26 = vrot.slane %v1111_v22, 1  ;;  %v1046_v35 = vpack.c.bf16 %v1000_v27, %v1000_v27  ;;  %v1110_v42 = vrot.slane %v1108_v24, 7 }
 0x130   : > { %v2419_v30 = vrot.slane %v1251_v23, 1  ;;  %v1250_v52 = vrot.slane %v1248_v29, 7 }
 0x131   : > { %v924_v31 = vpop.f32.mrf.mxu0  ;;  %v2480_v32 = vor.u32 %v2479_v26, %v1108_v24  ;;  %v1082_v39 = vunpack.c.l.b16 %v1046_v35  ;;  %v1113_v51 = vor.u32 %v1111_v22, %v1110_v42 }
 0x132   : > { %v925_v33 = vadd.f32 %v5643_v54, %v924_v31  ;;  %v5664_v34 = vor.u32 %v2419_v30, %v1248_v29  ;;  %v1253_v55 = vor.u32 %v1251_v23, %v1250_v52 }
 0x133   : > { %v2481_v36 = vsel %vm477_vm0, %v2480_v32, %v5661_v25 }
 0x134   : > { %vm965_vm9 = vcmp.ge.f32.partialorder %v925_v33, 0.0  ;;  %v983_v37 = vmul.f32 0.01, %v925_v33  ;;  %2482 = vrot.lane.b32.xlu2 %v2481_v36, %s8821_s18  ;;  %4872 = vmatmul.msk.bf16.gmra.mxu0 %vm889_vm4, %v876_v20 }
 0x135   : > { %2387 = vrot.lane.b32.xlu1 %v1245_v57, %s5358_s23  ;;  %2447 = vrot.lane.b32.xlu0 %v5653_v18, %s8817_s22 }
 0x136   : > { %v1001_v38 = vsel %vm965_vm9, %v925_v33, %v983_v37 }
 0x137   : > { %v1047_v40 = vpack.c.bf16 %v1001_v38, %v1001_v38 }
 0x139   : > { %v1083_v41 = vunpack.c.l.b16 %v1047_v40  ;;  %v927_v53 = vpop.f32.mrf.mxu0 }
 0x13a   : > { %v928_v60 = vadd.f32 %v5643_v54, %v927_v53 }
 0x13b   : > { %v5672_v19 = vpack.c.b16 %v1083_v41, %v1082_v39 }
 0x13c   : > { %v984_v63 = vmul.f32 0.01, %v928_v60  ;;  %vm966_vm11 = vcmp.ge.f32.partialorder %v928_v60, 0.0 }
 0x13d   : > { %8868 = vst [vmem:[#allocation6_spill] sm:$0xff] %v5672_v19  ;;  %1458 = vrot.lane.b32.xlu0 %v1245_v57, %s5359_s25  ;;  %1460 = vrot.lane.b32.xlu2 %v5672_v19, %s5359_s25  ;;  %v1115_v47 = vshrl.u32 %v5672_v19, 16  ;;  %v1118_v59 = vshll.u32 %v5672_v19, 16 }
 0x13e   : > { %1172 = vrot.lane.b32.xlu1 %v1110_v42, %s5359_s25  ;;  %v1002_v3 = vsel %vm966_vm11, %v928_v60, %v984_v63 }
 0x13f   : > { %v1117_v58 = vrot.slane %v1115_v47, 7  ;;  %v1048_v7 = vpack.c.bf16 %v1002_v3, %v1002_v3  ;;  %v2426_v8 = vrot.slane %v1118_v59, 1 }
 0x141   : > { %v929_v56 = vpop.f32.mrf.mxu0  ;;  %v1120_v61 = vor.u32 %v1118_v59, %v1117_v58  ;;  %v1084_v1 = vunpack.c.l.b16 %v1048_v7  ;;  %v2427_v13 = vor.u32 %v2426_v8, %v1115_v47 }
 0x142   : > { %v930_v48 = vadd.f32 %v5643_v54, %v929_v56 }
 0x143   : > { %v5717_v15 = vsel %vm477_vm0, %v2427_v13, %v5661_v25 }
 0x144   : > { %v985_v62 = vmul.f32 0.01, %v930_v48  ;;  %vm967_vm10 = vcmp.ge.f32.partialorder %v930_v48, 0.0 }
 0x145   : > { %1612 = vrot.lane.b32.xlu2 %v5672_v19, %s8838_s29  ;;  %1170 = vrot.lane.b32.xlu0 %v1113_v51, %s5359_s25 }
 0x146   : > { %1263 = vrot.lane.b32.xlu1 %v1250_v52, %s5360_s26  ;;  %v1003_v0 = vsel %vm967_vm10, %v930_v48, %v985_v62 }
 0x147   : > { %v1049_v4 = vpack.c.bf16 %v1003_v0, %v1003_v0 }
 0x149   : > { %v932_v6 = vpop.f32.mrf.mxu0  ;;  %v1085_v11 = vunpack.c.l.b16 %v1049_v4 }
 0x14a   : > { %v933_v17 = vadd.f32 %v5643_v54, %v932_v6 }
 0x14b   : > { %v5712_v14 = vpack.c.b16 %v1085_v11, %v1084_v1 }
 0x14c   : > { %v986_v57 = vmul.f32 0.01, %v933_v17  ;;  %vm968_vm12 = vcmp.ge.f32.partialorder %v933_v17, 0.0 }
 0x14d   : > { %2389 = vrot.lane.b32.xlu2 %v5672_v19, %s5358_s23  ;;  %1261 = vrot.lane.b32.xlu0 %v1253_v55, %s5360_s26  ;;  %v1122_v23 = vshrl.u32 %v5712_v14, 16  ;;  %v1125_v33 = vshll.u32 %v5712_v14, 16 }
 0x14e   : > { %3755 = vrot.lane.b32.xlu1 %v2481_v36, %s8819_s19  ;;  %v1004_v24 = vsel %vm968_vm12, %v933_v17, %v986_v57 }
 0x14f   : > { %v1050_v27 = vpack.c.bf16 %v1004_v24, %v1004_v24  ;;  %v1124_v30 = vrot.slane %v1122_v23, 7  ;;  %v2429_v37 = vrot.slane %v1125_v33, 1 }
 0x151   : > { %v934_v16 = vpop.f32.mrf.mxu0  ;;  %v1086_v31 = vunpack.c.l.b16 %v1050_v27  ;;  %v2430_v40 = vor.u32 %v2429_v37, %v1122_v23  ;;  %v1127_v47 = vor.u32 %v1125_v33, %v1124_v30 }
 0x152   : > { %v935_v21 = vadd.f32 %v5643_v54, %v934_v16 }
 0x153   : > { %v5753_v44 = vsel %vm477_vm0, %v2430_v40, %v5661_v25 }
 0x154   : > { %v987_v22 = vmul.f32 0.01, %v935_v21  ;;  %vm969_vm13 = vcmp.ge.f32.partialorder %v935_v21, 0.0 }
 0x155   : > { %3069 = vrot.lane.b32.xlu2 %v5672_v19, %s5353_s21  ;;  %1762 = vrot.lane.b32.xlu0 %v5672_v19, %s8821_s18 }
 0x156   : > { %2449 = vrot.lane.b32.xlu1 %v5672_v19, %s8817_s22  ;;  %v1005_v45 = vsel %vm969_vm13, %v935_v21, %v987_v22 }
 0x157   : > { %v1051_v29 = vpack.c.bf16 %v1005_v45, %v1005_v45 }
 0x159   : > { %v937_v26 = vpop.f32.mrf.mxu0  ;;  %v1087_v32 = vunpack.c.l.b16 %v1051_v29 }
 0x15a   : > { %v938_v38 = vadd.f32 %v5643_v54, %v937_v26 }
 0x15b   : > { %v5741_v35 = vpack.c.b16 %v1087_v32, %v1086_v31 }
 0x15c   : > { %v988_v42 = vmul.f32 0.01, %v938_v38  ;;  %vm970_vm14 = vcmp.ge.f32.partialorder %v938_v38, 0.0 }
 0x15d   : > { %1174 = vrot.lane.b32.xlu2 %v1120_v61, %s5359_s25  ;;  %3805 = vrot.lane.b32.xlu0 %v5672_v19, %s8840_s27  ;;  %8869 = vst [vmem:[#allocation7_spill] sm:$0xff] %v5741_v35  ;;  %v1132_v41 = vshll.u32 %v5741_v35, 16  ;;  %v1129_v51 = vshrl.u32 %v5741_v35, 16 }
 0x15e   : > { %3115 = vrot.lane.b32.xlu1 %v5672_v19, %s8819_s19  ;;  %v1006_v28 = vsel %vm970_vm14, %v938_v38, %v988_v42  ;;  %vm1215_vm14 = vcmask 1040384  }
 0x15f   : > { %v2432_v46 = vrot.slane %v1132_v41, 1  ;;  %v1052_v53 = vpack.c.bf16 %v1006_v28, %v1006_v28  ;;  %v1131_v60 = vrot.slane %v1129_v51, 7 }
 0x161   : > { %v939_v36 = vpop.f32.mrf.mxu0  ;;  %v2433_v52 = vor.u32 %v2432_v46, %v1129_v51  ;;  %v1134_v62 = vor.u32 %v1132_v41, %v1131_v60 }
 0x162   : > { %v940_v39 = vadd.f32 %v5643_v54, %v939_v36 }
 0x163   : > { %v5766_v56 = vsel %vm477_vm0, %v2433_v52, %v5661_v25 }
 0x164   : > { %v989_v43 = vmul.f32 0.01, %v940_v39  ;;  %vm971_vm15 = vcmp.ge.f32.partialorder %v940_v39, 0.0  ;;  %8870 = vst [vmem:[#allocation8_spill] sm:$0xff] %v5766_v56 }
 0x165   : > { %1265 = vrot.lane.b32.xlu2 %v1120_v61, %s5360_s26  ;;  %1176 = vrot.lane.b32.xlu0 %v1117_v58, %s5359_s25 }
 0x166   : > { %3164 = vrot.lane.b32.xlu1 %v5672_v19, %s8783_s28  ;;  %s8785_s28 = smov 32   ;;  %v1007_v50 = vsel %vm971_vm15, %v940_v39, %v989_v43  ;;  %vm1216_vm15 = vsmask.f32 256 }
 0x167   : > { %v1053_v55 = vpack.c.bf16 %v1007_v50, %v1007_v50 }
 0x169   : > { %v1089_v48 = vunpack.c.l.b16 %v1053_v55  ;;  %v942_v4 = vpop.f32.mrf.mxu0 }
 0x16a   : > { %v943_v1 = vadd.f32 %v5643_v54, %v942_v4 }
 0x16c   : > { %v990_v17 = vmul.f32 0.01, %v943_v1  ;;  %vm972_vm5 = vcmp.ge.f32.partialorder %v943_v1, 0.0 }
 0x16d   : > { %1267 = vrot.lane.b32.xlu0 %v1117_v58, %s5360_s26  ;;  %1764 = vrot.lane.b32.xlu2 %v5712_v14, %s8821_s18  ;;  %v1088_v58 = vunpack.c.l.b16 %v1052_v53 }
 0x16e   : > { %2519 = vrot.lane.b32.xlu1 %v5717_v15, %s8840_s27  ;;  %v1008_v22 = vsel %vm972_vm5, %v943_v1, %v990_v17  ;;  %vm6007_vm5 = vmand %vm1215_vm14, %vm1216_vm15 }
 0x16f   : > { %v5775_v61 = vpack.c.b16 %v1089_v48, %v1088_v58  ;;  %v1054_v26 = vpack.c.bf16 %v1008_v22, %v1008_v22 }
 0x171   : > { %8871 = vst [vmem:[#allocation9_spill] sm:$0xff] %v5775_v61  ;;  %v1136_v9 = vshrl.u32 %v5775_v61, 16  ;;  %v944_v11 = vpop.f32.mrf.mxu0  ;;  %v1139_v2 = vshll.u32 %v5775_v61, 16 }
 0x172   : > { %v945_v16 = vadd.f32 %v5643_v54, %v944_v11 }
 0x173   : > { %v1138_v10 = vrot.slane %v1136_v9, 7  ;;  %v2435_v38 = vrot.slane %v1139_v2, 1 }
 0x174   : > { %v991_v21 = vmul.f32 0.01, %v945_v16  ;;  %vm973_vm6 = vcmp.ge.f32.partialorder %v945_v16, 0.0 }
 0x175   : > { %2484 = vrot.lane.b32.xlu0 %v5717_v15, %s8821_s18  ;;  %2451 = vrot.lane.b32.xlu2 %v5712_v14, %s8817_s22  ;;  %v1141_v20 = vor.u32 %v1139_v2, %v1138_v10  ;;  %v2436_v41 = vor.u32 %v2435_v38, %v1136_v9 }
 0x176   : > { %3789 = vrot.lane.b32.xlu1 %v5717_v15, %s8817_s22  ;;  %v1009_v23 = vsel %vm973_vm6, %v945_v16, %v991_v21  ;;  %vm1396_vm6 = vcmask 1041408  }
 0x177   : > { %v1055_v27 = vpack.c.bf16 %v1009_v23, %v1009_v23  ;;  %v5850_v52 = vsel %vm477_vm0, %v2436_v41, %v5661_v25 }
 0x178   : > { %8876 = vst [vmem:[#allocation14_spill] sm:$0xff] %v5850_v52 }
 0x179   : > { %v1091_v31 = vunpack.c.l.b16 %v1055_v27 }
 0x17d   : > { %2391 = vrot.lane.b32.xlu0 %v5712_v14, %s5358_s23  ;;  %1180 = vrot.lane.b32.xlu2 %v1124_v30, %s5359_s25 }
 0x17e   : > { %3840 = vrot.lane.b32.xlu1 %v5717_v15, %s8785_s28  ;;  %s1017_s28 = scalar_select %p1016_p11, 1, 0 }
 0x185   : > { %1271 = vrot.lane.b32.xlu2 %v1124_v30, %s5360_s26  ;;  %1464 = vrot.lane.b32.xlu0 %v5741_v35, %s5359_s25  ;;  %v1090_v30 = vunpack.c.l.b16 %v1054_v26 }
 0x186   : > { %1462 = vrot.lane.b32.xlu1 %v5712_v14, %s5359_s25 }
 0x187   : > { %v5834_v37 = vpack.c.b16 %v1091_v31, %v1090_v30 }
 0x189   : > { %8875 = vst [vmem:[#allocation13_spill] sm:$0xff] %v5834_v37  ;;  %v1143_v55 = vshrl.u32 %v5834_v37, 16  ;;  %v1146_v2 = vshll.u32 %v5834_v37, 16 }
 0x18b   : > { %v1145_v11 = vrot.slane %v1143_v55, 7  ;;  %v2438_v23 = vrot.slane %v1146_v2, 1 }
 0x18d   : > { %2521 = vrot.lane.b32.xlu2 %v5753_v44, %s8840_s27  ;;  %1616 = vrot.lane.b32.xlu0 %v5741_v35, %s8838_s29  ;;  %v2439_v30 = vor.u32 %v2438_v23, %v1143_v55 }
 0x18e   : > { %1614 = vrot.lane.b32.xlu1 %v5712_v14, %s8838_s29  ;;  %v5761_v49 = vpop.permute.xlu2 %2482 }
 0x191   : > { %v947_v29 = vpop.f32.mrf.mxu0 }
 0x192   : > { %v948_v42 = vadd.f32 %v5643_v54, %v947_v29 }
 0x194   : > { %v992_v50 = vmul.f32 0.01, %v948_v42  ;;  %vm974_vm7 = vcmp.ge.f32.partialorder %v948_v42, 0.0 }
 0x195   : > { %2453 = vrot.lane.b32.xlu0 %v5741_v35, %s8817_s22  ;;  %2488 = vrot.lane.b32.xlu2 %v5766_v56, %s8821_s18 }
 0x196   : > { %1178 = vrot.lane.b32.xlu1 %v1127_v47, %s5359_s25 }
 0x197   : > { %v5773_v59 = vpop.permute.xlu2 %1460 }
 0x199   : > { %v949_v39 = vpop.f32.mrf.mxu0 }
 0x19a   : > { %v950_v43 = vadd.f32 %v5643_v54, %v949_v39 }
 0x19c   : > { %v993_v51 = vmul.f32 0.01, %v950_v43  ;;  %vm975_vm8 = vcmp.ge.f32.partialorder %v950_v43, 0.0 }
 0x19d   : > { %1182 = vrot.lane.b32.xlu0 %v1134_v62, %s5359_s25  ;;  %1466 = vrot.lane.b32.xlu2 %v5775_v61, %s5359_s25 }
 0x19e   : > { %1269 = vrot.lane.b32.xlu1 %v1127_v47, %s5360_s26  ;;  %v1010_v47 = vsel %vm974_vm7, %v948_v42, %v992_v50  ;;  %v1011_v58 = vsel %vm975_vm8, %v950_v43, %v993_v51  ;;  %v5895_v43 = vsel %vm477_vm0, %v2439_v30, %v5661_v25  ;;  %vm1870_vm7 = vcmask 162816  }
 0x19f   : > { %v5781_v63 = vpop.permute.xlu1 %3067  ;;  %v5783_v0 = vpop.permute.xlu2 %1612  ;;  %v1056_v4 = vpack.c.bf16 %v1010_v47, %v1010_v47  ;;  %v1057_v9 = vpack.c.bf16 %v1011_v58, %v1011_v58  ;;  %8881 = vst [vmem:[#allocation19_spill] sm:$0xff] %v5895_v43  ;;  %vm1887_vm8 = vcmask 195584  }
 0x1a0   : > { %8872 = vst [vmem:[#allocation10_spill] sm:$0xff] %v5781_v63  ;;  %v5785_v3 = vpop.permute.xlu0 %1610 }
 0x1a1   : > { %v1093_v1 = vunpack.c.l.b16 %v1057_v9 }
 0x1a5   : > { %1273 = vrot.lane.b32.xlu0 %v1134_v62, %s5360_s26  ;;  %1618 = vrot.lane.b32.xlu2 %v5775_v61, %s8838_s29  ;;  %v952_v62 = vpop.f32.mrf.mxu0 }
 0x1a6   : > { %2486 = vrot.lane.b32.xlu1 %v5753_v44, %s8821_s18  ;;  %v953_v26 = vadd.f32 %v5643_v54, %v952_v62 }
 0x1a7   : > { %v5792_v6 = vpop.permute.xlu1 %2387  ;;  %v5794_v7 = vpop.permute.xlu2 %2389 }
 0x1a8   : > { %v5796_v8 = vpop.permute.xlu0 %2447  ;;  %v994_v41 = vmul.f32 0.01, %v953_v26  ;;  %vm976_vm9 = vcmp.ge.f32.partialorder %v953_v26, 0.0 }
 0x1aa   : > { %v1012_v51 = vsel %vm976_vm9, %v953_v26, %v994_v41  ;;  %vm1921_vm9 = vcmask 261120  }
 0x1ad   : > { %2523 = vrot.lane.b32.xlu0 %v5766_v56, %s8840_s27  ;;  %2395 = vrot.lane.b32.xlu2 %v5775_v61, %s5358_s23  ;;  %v954_v22 = vpop.f32.mrf.mxu0 }
 0x1ae   : > { %1766 = vrot.lane.b32.xlu1 %v5741_v35, %s8821_s18  ;;  %v955_v27 = vadd.f32 %v5643_v54, %v954_v22  ;;  %v1148_v22 = vor.u32 %v1146_v2, %v1145_v11 }
 0x1af   : > { %v5805_v12 = vpop.permute.xlu2 %3069 }
 0x1b0   : > { %8873 = vst [vmem:[#allocation11_spill] sm:$0xff] %v5805_v12  ;;  %v5808_v13 = vpop.permute.xlu1 %1172  ;;  %v5810_v5 = vpop.permute.xlu0 %1458  ;;  %v995_v42 = vmul.f32 0.01, %v955_v27  ;;  %vm977_vm10 = vcmp.ge.f32.partialorder %v955_v27, 0.0 }
 0x1b2   : > { %v1013_v55 = vsel %vm977_vm10, %v955_v27, %v995_v42  ;;  %v1018_v42 = vstv %s1017_s28  ;;  %vm1904_vm10 = vcmask 228352  }
 0x1b3   : > { %vm5931_vm12 = vcmp.eq.s32.totalorder %v1018_v42, 1 }
 0x1b5   : > { %1768 = vrot.lane.b32.xlu0 %v5775_v61, %s8821_s18  ;;  %1186 = vrot.lane.b32.xlu2 %v1141_v20, %s5359_s25  ;;  %v957_v26 = vpop.f32.mrf.mxu0 }
 0x1b6   : > { %2393 = vrot.lane.b32.xlu1 %v5741_v35, %s5358_s23  ;;  %v958_v41 = vadd.f32 %v5643_v54, %v957_v26 }
 0x1b7   : > { %v5819_v57 = vpop.permute.xlu2 %1174 }
 0x1b8   : > { %v5821_v24 = vpop.permute.xlu1 %1263  ;;  %v5823_v45 = vpop.permute.xlu0 %1170  ;;  %vm978_vm11 = vcmp.ge.f32.partialorder %v958_v41, 0.0 }
 0x1bd   : > { %1188 = vrot.lane.b32.xlu0 %v1138_v10, %s5359_s25  ;;  %1277 = vrot.lane.b32.xlu2 %v1141_v20, %s5360_s26 }
 0x1be   : > { %1184 = vrot.lane.b32.xlu1 %v1131_v60, %s5359_s25 }
 0x1bf   : > { %v5828_v32 = vpop.permute.xlu2 %1265 }
 0x1c0   : > { %v5830_v33 = vpop.permute.xlu1 %3755  ;;  %v5832_v36 = vpop.permute.xlu0 %1261 }
 0x1c1   : > { %8874 = vst [vmem:[#allocation12_spill] sm:$0xff] %v5830_v33 }
 0x1c5   : > { %1279 = vrot.lane.b32.xlu0 %v1138_v10, %s5360_s26  ;;  %1770 = vrot.lane.b32.xlu2 %v5834_v37, %s8821_s18  ;;  %v1092_v10 = vunpack.c.l.b16 %v1056_v4 }
 0x1c6   : > { %1275 = vrot.lane.b32.xlu1 %v1131_v60, %s5360_s26 }
 0x1c7   : > { %v5840_v40 = vpop.permute.xlu2 %1764  ;;  %v5877_v21 = vpack.c.b16 %v1093_v1, %v1092_v10  ;;  %v1058_v10 = vpack.c.bf16 %v1012_v51, %v1012_v51  ;;  %v1059_v1 = vpack.c.bf16 %v1013_v55, %v1013_v55  ;;  %v996_v55 = vmul.f32 0.01, %v958_v41 }
 0x1c8   : > { %v5844_v46 = vpop.permute.xlu1 %2449  ;;  %v5846_v28 = vpop.permute.xlu0 %1762 }
 0x1c9   : > { %8880 = vst [vmem:[#allocation18_spill] sm:$0xff] %v5877_v21  ;;  %v1153_v39 = vshll.u32 %v5877_v21, 16  ;;  %v1150_v47 = vshrl.u32 %v5877_v21, 16  ;;  %v1094_v27 = vunpack.c.l.b16 %v1058_v10  ;;  %v1095_v30 = vunpack.c.l.b16 %v1059_v1 }
 0x1ca   : > { %v1014_v1 = vsel %vm978_vm11, %v958_v41, %v996_v55  ;;  %vm1956_vm11 = vcmask 293888  }
 0x1cb   : > { %v2441_v50 = vrot.slane %v1153_v39, 1  ;;  %v1042_v19 = vsel %vm5931_vm12, %v1014_v1, 0.0  ;;  %v1235_v18 = vpack.c.bf16 %v1014_v1, %v1014_v1 }
 0x1cd   : > { %2490 = vrot.lane.b32.xlu0 %v5850_v52, %s8821_s18  ;;  %2457 = vrot.lane.b32.xlu2 %v5834_v37, %s8817_s22  ;;  %v2442_v9 = vor.u32 %v2441_v50, %v1150_v47 }
 0x1ce   : > { %2455 = vrot.lane.b32.xlu1 %v5775_v61, %s8817_s22 }
 0x1cf   : > { %v5858_v53 = vpop.permute.xlu2 %2451  ;;  %v5913_v23 = vsel %vm477_vm0, %v2442_v9, %v5661_v25  ;;  %v5929_v9 = vpack.c.b16 %v1095_v30, %v1094_v27  ;;  %v1060_v30 = vpack.c.bf16 %v1042_v19, %v1042_v19 }
 0x1d0   : > { %v5861_v48 = vpop.permute.xlu1 %3115  ;;  %v5863_v60 = vpop.permute.xlu0 %3805  ;;  %8883 = vst [vmem:[#allocation21_spill] sm:$0xff] %v5913_v23 }
 0x1d1   : > { %8877 = vst [vmem:[#allocation15_spill] sm:$0xff] %v5861_v48 }
 0x1d2   : > { %8878 = vst [vmem:[#allocation16_spill] sm:$0xff] %v5863_v60  ;;  %v1160_v60 = vshll.u32 %v5929_v9, 16 }
 0x1d3   : > { %8886 = vst [vmem:[#allocation24_spill] sm:$0xff] %v5929_v9 }
 0x1d5   : > { %2397 = vrot.lane.b32.xlu0 %v5834_v37, %s5358_s23  ;;  %1192 = vrot.lane.b32.xlu2 %v1145_v11, %s5359_s25 }
 0x1d6   : > { %2525 = vrot.lane.b32.xlu1 %v5850_v52, %s8840_s27 }
 0x1d7   : > { %v5870_v16 = vpop.permute.xlu2 %1180 }
 0x1d8   : > { %v5873_v20 = vpop.permute.xlu1 %3164  ;;  %v5875_v17 = vpop.permute.xlu0 %1176 }
 0x1d9   : > { %8879 = vst [vmem:[#allocation17_spill] sm:$0xff] %v5873_v20 }
 0x1dd   : > { %1283 = vrot.lane.b32.xlu2 %v1145_v11, %s5360_s26  ;;  %1470 = vrot.lane.b32.xlu0 %v5877_v21, %s5359_s25  ;;  %v5923_v11 = vrot.slane %v1150_v47, 7  ;;  %v959_v47 = vpop.f32.mrf.mxu0 }
 0x1de   : > { %1468 = vrot.lane.b32.xlu1 %v5834_v37, %s5359_s25  ;;  %v960_v20 = vadd.f32 %v5643_v54, %v959_v47 }
 0x1df   : > { %v5886_v29 = vpop.permute.xlu2 %1271  ;;  %v1155_v26 = vor.u32 %v1153_v39, %v5923_v11 }
 0x1e0   : > { %v5888_v31 = vpop.permute.xlu1 %2519  ;;  %v5890_v38 = vpop.permute.xlu0 %1267  ;;  %vm979_vm13 = vcmp.ge.f32.partialorder %v960_v20, 0.0  ;;  %v997_v41 = vmul.f32 0.01, %v960_v20 }
 0x1e2   : > { %v1015_v55 = vsel %vm979_vm13, %v960_v20, %v997_v41 }
 0x1e3   : > { %v1236_v61 = vpack.c.bf16 %v1015_v55, %v1015_v55 }
 0x1e5   : > { %2527 = vrot.lane.b32.xlu2 %v5895_v43, %s8840_s27  ;;  %1622 = vrot.lane.b32.xlu0 %v5877_v21, %s8838_s29  ;;  %v1244_v35 = vunpack.c.l.b16 %v1236_v61  ;;  %v1634_v61 = vshll.u32 %v5808_v13, 16 }
 0x1e6   : > { %1620 = vrot.lane.b32.xlu1 %v5834_v37, %s8838_s29  ;;  %v1043_v37 = vsel %vm5931_vm12, %v1015_v55, 0.0 }
 0x1e7   : > { %v5905_v58 = vpop.permute.xlu2 %2521  ;;  %v1061_v48 = vpack.c.bf16 %v1043_v37, %v1043_v37  ;;  %v1157_v37 = vshrl.u32 %v5929_v9, 16 }
 0x1e8   : > { %v5907_v62 = vpop.permute.xlu1 %3789  ;;  %v5909_v4 = vpop.permute.xlu0 %2484 }
 0x1e9   : > { %8882 = vst [vmem:[#allocation20_spill] sm:$0xff] %v5907_v62  ;;  %v1097_v54 = vunpack.c.l.b16 %v1061_v48  ;;  %v1159_v41 = vrot.slane %v1157_v37, 7 }
 0x1eb   : > { %v1162_v63 = vor.u32 %v1160_v60, %v1159_v41 }
 0x1ed   : > { %2459 = vrot.lane.b32.xlu0 %v5877_v21, %s8817_s22  ;;  %2494 = vrot.lane.b32.xlu2 %v5913_v23, %s8821_s18 }
 0x1ee   : > { %1190 = vrot.lane.b32.xlu1 %v1148_v22, %s5359_s25 }
 0x1ef   : > { %v5921_v50 = vpop.permute.xlu2 %2488 }
 0x1f0   : > { %8884 = vst [vmem:[#allocation22_spill] sm:$0xff] %v5921_v50  ;;  %v5925_v2 = vpop.permute.xlu1 %3840  ;;  %v5927_v51 = vpop.permute.xlu0 %2391 }
 0x1f1   : > { %8885 = vst [vmem:[#allocation23_spill] sm:$0xff] %v5925_v2  ;;  %v1096_v2 = vunpack.c.l.b16 %v1060_v30 }
 0x1f5   : > { %1194 = vrot.lane.b32.xlu0 %v1155_v26, %s5359_s25  ;;  %1472 = vrot.lane.b32.xlu2 %v5929_v9, %s5359_s25 }
 0x1f6   : > { %1281 = vrot.lane.b32.xlu1 %v1148_v22, %s5360_s26  ;;  %v5958_v22 = vpack.c.b16 %v1097_v54, %v1096_v2 }
 0x1f7   : > { %v5943_v27 = vpop.permute.xlu2 %1466 }
 0x1f8   : > { %8889 = vst [vmem:[#allocation25_spill] sm:$0xff] %v5943_v27  ;;  %v5945_v42 = vpop.permute.xlu1 %1462  ;;  %v5947_v39 = vpop.permute.xlu0 %1464  ;;  %v8790_v10 = vshll.u32 %v5958_v22, 16  ;;  %v8791_v48 = vshrl.u32 %v5958_v22, 16 }
 0x1f9   : > { %8890 = vst [vmem:[#allocation26_spill] sm:$0xff] %v5947_v39 }
 0x1fa   : > { %8892 = vst [vmem:[#allocation28_spill] sm:$0xff] %v5958_v22 }
 0x1fd   : > { %1285 = vrot.lane.b32.xlu0 %v1155_v26, %s5360_s26  ;;  %1624 = vrot.lane.b32.xlu2 %v5929_v9, %s8838_s29  ;;  %v3837_v26 = vrot.slane %v8790_v10, 1 }
 0x1fe   : > { %2492 = vrot.lane.b32.xlu1 %v5895_v43, %s8821_s18  ;;  %v1243_v43 = vunpack.c.l.b16 %v1235_v18  ;;  %v6037_v18 = vsel %vm6007_vm5, 0, %v5832_v36 }
 0x1ff   : > { %v5956_v19 = vpop.permute.xlu2 %1618  ;;  %v5977_v2 = vor.u32 %v3837_v26, %v8791_v48 }
 0x200   : > { %8891 = vst [vmem:[#allocation27_spill] sm:$0xff] %v5956_v19  ;;  %v5960_v47 = vpop.permute.xlu1 %1614  ;;  %v5962_v20 = vpop.permute.xlu0 %1616 }
 0x201   : > { %8893 = vst [vmem:[#allocation29_spill] sm:$0xff] %v5977_v2 }
 0x205   : > { %2529 = vrot.lane.b32.xlu0 %v5913_v23, %s8840_s27  ;;  %2401 = vrot.lane.b32.xlu2 %v5929_v9, %s5358_s23  ;;  %v2444_v23 = vrot.slane %v1160_v60, 1  ;;  %v6028_v60 = vpack.c.b16 %v1244_v35, %v1243_v43 }
 0x206   : > { %1772 = vrot.lane.b32.xlu1 %v5877_v21, %s8821_s18 }
 0x207   : > { %v5979_v30 = vpop.permute.xlu2 %2395  ;;  %v2445_v55 = vor.u32 %v2444_v23, %v1157_v37  ;;  %8901 = vst [vmem:[#allocation35_spill] sm:$0xff] %v6028_v60 }
 0x208   : > { %8894 = vst [vmem:[#allocation30_spill] sm:$0xff] %v5979_v30  ;;  %v5981_v54 = vpop.permute.xlu1 %1178  ;;  %v5983_v10 = vpop.permute.xlu0 %2453 }
 0x209   : > { %8895 = vst [vmem:[#allocation31_spill] sm:$0xff] %v5983_v10  ;;  %v6032_v30 = vsel %vm477_vm0, %v2445_v55, %v5661_v25  ;;  %v1636_v55 = vrot.slane %v1634_v61, 1 }
 0x20a   : > { %8902 = vst [vmem:[#allocation36_spill] sm:$0xff] %v6032_v30 }
 0x20d   : > { %1774 = vrot.lane.b32.xlu0 %v5929_v9, %s8821_s18  ;;  %1198 = vrot.lane.b32.xlu2 %v1162_v63, %s5359_s25 }
 0x20e   : > { %2399 = vrot.lane.b32.xlu1 %v5877_v21, %s5358_s23  ;;  %s8918_s23 = smov 28  }
 0x20f   : > { %v5991_v26 = vpop.permute.xlu2 %1186 }
 0x210   : > { %v5993_v48 = vpop.permute.xlu1 %1269  ;;  %v5995_v2 = vpop.permute.xlu0 %1182 }
 0x215   : > { %1200 = vrot.lane.b32.xlu0 %v1159_v41, %s5359_s25  ;;  %1289 = vrot.lane.b32.xlu2 %v1162_v63, %s5360_s26  ;;  %v6014_v63 = vsel %vm6007_vm5, 0, %v5823_v45 }
 0x216   : > { %1196 = vrot.lane.b32.xlu1 %v5923_v11, %s5359_s25  ;;  %8898 = vst [vmem:[#allocation32_spill] sm:$0xff] %v6014_v63  ;;  %v1629_v1 = vshll.u32 %v6014_v63, 16  ;;  %v1627_v35 = vshrl.u32 %v6014_v63, 16 }
 0x217   : > { %v6001_v62 = vpop.permute.xlu2 %1277 }
 0x218   : > { %v6003_v12 = vpop.permute.xlu1 %2486  ;;  %v6005_v21 = vpop.permute.xlu0 %1273 }
 0x21d   : > { %1291 = vrot.lane.b32.xlu0 %v1159_v41, %s5360_s26  ;;  %1594 = vrot.lane.b32.xlu2 %v6014_v63, %s8817_s22  ;;  %v1631_v41 = vrot.slane %v1629_v1, 1  ;;  %v1258_v1 = vshll.u32 %v6028_v60, 16 }
 0x21e   : > { %1287 = vrot.lane.b32.xlu1 %v5923_v11, %s5360_s26  ;;  %v1477_v11 = vshll.u32 %v6037_v18, 16 }
 0x21f   : > { %v6021_v52 = vpop.permute.xlu2 %1770  ;;  %v1632_v23 = vor.u32 %v1631_v41, %v1627_v35  ;;  %v2516_v19 = vrot.slane %v1258_v1, 1  ;;  %v1475_v41 = vshrl.u32 %v6037_v18, 16  ;;  %v1255_v35 = vshrl.u32 %v6028_v60, 16 }
 0x220   : > { %8899 = vst [vmem:[#allocation33_spill] sm:$0xff] %v6021_v52  ;;  %v6024_v27 = vpop.permute.xlu1 %1766  ;;  %v6026_v45 = vpop.permute.xlu0 %2523  ;;  %v1479_v52 = vrot.slane %v1477_v11, 1 }
 0x221   : > { %8900 = vst [vmem:[#allocation34_spill] sm:$0xff] %v6024_v27  ;;  %v1637_v13 = vsel %vm477_vm0, %v1632_v23, %v1636_v55  ;;  %v2517_v55 = vor.u32 %v2516_v19, %v1255_v35 }
 0x222   : > { %v1480_v61 = vor.u32 %v1479_v52, %v1475_v41  ;;  %v6082_v52 = vsel %vm6007_vm5, 0, %v5828_v32  ;;  %v6099_v32 = vsel %vm6007_vm5, 0, %v5819_v57 }
 0x223   : > { %8907 = vst [vmem:[#allocation41_spill] sm:$0xff] %v6099_v32  ;;  %v1641_v39 = vshll.u32 %v6099_v32, 16 }
 0x225   : > { %2496 = vrot.lane.b32.xlu0 %v6032_v30, %s8821_s18  ;;  %1776 = vrot.lane.b32.xlu2 %v6028_v60, %s8821_s18 }
 0x226   : > { %2461 = vrot.lane.b32.xlu1 %v5929_v9, %s8817_s22  ;;  %v1482_v9 = vshll.u32 %v5821_v24, 16 }
 0x227   : > { %v6047_v43 = vpop.permute.xlu2 %2457 }
 0x228   : > { %8903 = vst [vmem:[#allocation37_spill] sm:$0xff] %v6047_v43  ;;  %v6050_v36 = vpop.permute.xlu1 %2393  ;;  %v6052_v37 = vpop.permute.xlu0 %1768  ;;  %v1484_v43 = vrot.slane %v1482_v9, 1 }
 0x229   : > { %8904 = vst [vmem:[#allocation38_spill] sm:$0xff] %v6050_v36  ;;  %v1646_v36 = vshll.u32 %v5875_v17, 16 }
 0x22a   : > { %8905 = vst [vmem:[#allocation39_spill] sm:$0xff] %v6052_v37  ;;  %v6071_v37 = vsel %vm477_vm0, %v2517_v55, %v5661_v25  ;;  %v1485_v24 = vsel %vm477_vm0, %v1480_v61, %v1484_v43  ;;  %v1489_v43 = vshll.u32 %v6082_v52, 16  ;;  %v1257_v61 = vrot.slane %v1255_v35, 7 }
 0x22b   : > { %8906 = vst [vmem:[#allocation40_spill] sm:$0xff] %v6071_v37  ;;  %v1494_v55 = vshll.u32 %v5890_v38, 16 }
 0x22d   : > { %3083 = vrot.lane.b32.xlu0 %v1637_v13, %s8819_s19  ;;  %3739 = vrot.lane.b32.xlu2 %v1637_v13, %s5353_s21  ;;  %v1496_v35 = vrot.slane %v1494_v55, 1 }
 0x22e   : > { %2531 = vrot.lane.b32.xlu1 %v6032_v30, %s8840_s27  ;;  %v1487_v30 = vshrl.u32 %v6082_v52, 16 }
 0x22f   : > { %v6063_v63 = vpop.permute.xlu2 %1192 }
 0x230   : > { %v6065_v11 = vpop.permute.xlu1 %1184  ;;  %v6067_v23 = vpop.permute.xlu0 %1188 }
 0x235   : > { %2533 = vrot.lane.b32.xlu0 %v6071_v37, %s8840_s27  ;;  %2403 = vrot.lane.b32.xlu2 %v1485_v24, %s5353_s21  ;;  %v1491_v37 = vrot.slane %v1489_v43, 1  ;;  %v8911_v43 = vshrl.u32 %v5958_v22, 16 }
 0x236   : > { %2498 = vrot.lane.b32.xlu1 %v6028_v60, %s8838_s29 }
 0x237   : > { %v6084_v9 = vpop.permute.xlu2 %1283  ;;  %v1492_v10 = vor.u32 %v1491_v37, %v1487_v30  ;;  %v1166_v56 = vrot.slane %v8911_v43, 7 }
 0x238   : > { %v6086_v19 = vpop.permute.xlu1 %1275  ;;  %v6088_v41 = vpop.permute.xlu0 %1279 }
 0x239   : > { %v1497_v57 = vsel %vm477_vm0, %v1492_v10, %v1496_v35 }
 0x23d   : > { %3099 = vrot.lane.b32.xlu0 %v6082_v52, %s8817_s22  ;;  %1295 = vrot.lane.b32.xlu2 %v1257_v61, %s5360_s26  ;;  %s8927_s22 = smov 12  }
 0x23e   : > { %1722 = vrot.lane.b32.xlu1 %v1637_v13, %s8821_s18 }
 0x23f   : > { %v6101_v60 = vpop.permute.xlu2 %2527 }
 0x240   : > { %8908 = vst [vmem:[#allocation42_spill] sm:$0xff] %v6101_v60  ;;  %v6104_v50 = vpop.permute.xlu1 %2455  ;;  %v6106_v38 = vpop.permute.xlu0 %2490  ;;  %v1643_v60 = vrot.slane %v1641_v39, 1 }
 0x241   : > { %8909 = vst [vmem:[#allocation43_spill] sm:$0xff] %v6104_v50  ;;  %v1648_v50 = vrot.slane %v1646_v36, 1 }
 0x242   : > { %8910 = vst [vmem:[#allocation44_spill] sm:$0xff] %v6106_v38  ;;  %v1639_v38 = vshrl.u32 %v6099_v32, 16 }
 0x244   : > { %v1644_v43 = vor.u32 %v1643_v60, %v1639_v38  ;;  %v1455_v60 = vld [vmem:[%s8777_s5] sm:$0x3] }
 0x245   : > { %1204 = vrot.lane.b32.xlu2 %v1166_v56, %s5359_s25  ;;  %1572 = vrot.lane.b32.xlu0 %v1497_v57, %s8819_s19 }
 0x246   : > { %2463 = vrot.lane.b32.xlu1 %v1637_v13, %s8838_s29  ;;  %v6124_v17 = vsel %vm477_vm0, %v1644_v43, %v1648_v50  ;;  %v1260_v13 = vor.u32 %v1258_v1, %v1257_v61  ;;  %v1331_v50 = vld [vmem:[%s8779_s7] sm:$0x3]  ;;  %v6151_v61 = vsel %vm1396_vm6, %v1455_v60, 0  ;;  %v5076_v43 = vld [vmem:[%s5479_s16 + $0xc] sm:$0xff] }
 0x247   : > { %v6116_v55 = vpop.permute.xlu2 %2494  ;;  %v1398_v1 = vsel %vm1396_vm6, %v1331_v50, 0  ;;  %8920 = vst [vmem:[#allocation52_spill] sm:$0xff] %v6151_v61  ;;  %2086 = vmatpush.bf16.msrb.mxu0 %v6151_v61  ;;  %5088 = vmatpush.bf16.msra.mxu3 %v6151_v61 }
 0x248   : > { %8912 = vst [vmem:[#allocation45_spill] sm:$0xff] %v6116_v55  ;;  %v6119_v30 = vpop.permute.xlu1 %2525  ;;  %v6121_v37 = vpop.permute.xlu0 %2397  ;;  %1407 = vmatpush.bf16.msra.mxu1 %v1398_v1  ;;  %5087 = vmatpush.bf16.msra.mxu2 %v1398_v1 }
 0x249   : > { %8913 = vst [vmem:[#allocation46_spill] sm:$0xff] %v6119_v30  ;;  %v5081_v30 = vld [vmem:[%s5479_s16 + $0x48] sm:$0xff] }
 0x24a   : > { %8914 = vst [vmem:[#allocation47_spill] sm:$0xff] %v6121_v37 }
 0x24b   : > { %2784 = vmatpush.bf16.msrb.mxu3 %v6151_v61  ;;  %3456 = vmatpush.bf16.msra.mxu0 %v6151_v61 }
 0x24c   : > { %4921 = vmatmul.msk.bf16.vlgmr.msra.gmra.mxu1 %vm820_vm1, %v5076_v43  ;;  %4926 = vmatmul.msk.bf16.vlgmr.msra.gmra.mxu2 %vm820_vm1, %v5081_v30 }
 0x24d   : > { %1746 = vrot.lane.b32.xlu2 %v6082_v52, %s8840_s27  ;;  %1724 = vrot.lane.b32.xlu0 %v6124_v17, %s8821_s18  ;;  %s8928_s18 = smov 32  }
 0x24e   : > { %1570 = vrot.lane.b32.xlu1 %v1485_v24, %s8819_s19  ;;  %s8926_s19 = smov 20  }
 0x24f   : > { %v6131_v39 = vpop.permute.xlu2 %1472 }
 0x250   : > { %8915 = vst [vmem:[#allocation48_spill] sm:$0xff] %v6131_v39  ;;  %v6133_v10 = vpop.permute.xlu1 %1468  ;;  %v6135_v36 = vpop.permute.xlu0 %1470 }
 0x251   : > { %8916 = vst [vmem:[#allocation49_spill] sm:$0xff] %v6133_v10 }
 0x252   : > { %8917 = vst [vmem:[#allocation50_spill] sm:$0xff] %v6135_v36 }
 0x255   : > { %3148 = vrot.lane.b32.xlu2 %v6099_v32, %s8840_s27  ;;  %2500 = vrot.lane.b32.xlu0 %v1497_v57, %s8918_s23 }
 0x256   : > { %1293 = vrot.lane.b32.xlu1 %v1260_v13, %s5360_s26  ;;  %v8923_v13 = vshll.u32 %v5958_v22, 16  ;;  %v6190_v22 = vsel %vm6007_vm5, 0, %v5993_v48  ;;  %v6207_v48 = vsel %vm6007_vm5, 0, %v5981_v54  ;;  %s8951_s26 = smov 24  }
 0x257   : > { %v6147_v24 = vpop.permute.xlu2 %1624  ;;  %8930 = vst [vmem:[#allocation58_spill] sm:$0xff] %v6207_v48  ;;  %v1499_v55 = vshrl.u32 %v6190_v22, 16  ;;  %v1653_v36 = vshll.u32 %v6207_v48, 16 }
 0x258   : > { %8919 = vst [vmem:[#allocation51_spill] sm:$0xff] %v6147_v24  ;;  %v6153_v35 = vpop.permute.xlu1 %1620  ;;  %v6155_v38 = vpop.permute.xlu0 %1622  ;;  %v1169_v50 = vor.u32 %v8923_v13, %v1166_v56 }
 0x259   : > { %8921 = vst [vmem:[#allocation53_spill] sm:$0xff] %v6153_v35  ;;  %v1655_v10 = vrot.slane %v1653_v36, 1  ;;  %v1518_v35 = vshll.u32 %v6086_v19, 16  ;;  %v6269_v19 = vsel %vm6007_vm5, 0, %v5995_v2  ;;  %v1670_v2 = vshll.u32 %v6065_v11, 16 }
 0x25a   : > { %8922 = vst [vmem:[#allocation54_spill] sm:$0xff] %v6155_v38 }
 0x25d   : > { %2465 = vrot.lane.b32.xlu2 %v6124_v17, %s8838_s29  ;;  %2405 = vrot.lane.b32.xlu0 %v1497_v57, %s5353_s21 }
 0x25e   : > { %1202 = vrot.lane.b32.xlu1 %v1169_v50, %s5359_s25  ;;  %v5077_v50 = vld [vmem:[%s5479_s16 + $0x18] sm:$0xff]  ;;  %s8934_s25 = smov 8  }
 0x25f   : > { %v6169_v60 = vpop.permute.xlu2 %2401  ;;  %4922 = vmatmul.msk.bf16.gmra.mxu1 %vm820_vm1, %v5077_v50 }
 0x260   : > { %8924 = vst [vmem:[#allocation55_spill] sm:$0xff] %v6169_v60  ;;  %v6171_v1 = vpop.permute.xlu1 %1190  ;;  %v6173_v39 = vpop.permute.xlu0 %2459 }
 0x261   : > { %8925 = vst [vmem:[#allocation56_spill] sm:$0xff] %v6173_v39 }
 0x265   : > { %3773 = vrot.lane.b32.xlu2 %v1497_v57, %s8838_s29  ;;  %3131 = vrot.lane.b32.xlu0 %v1497_v57, %s8926_s19 }
 0x266   : > { %1596 = vrot.lane.b32.xlu1 %v6099_v32, %s8927_s22  ;;  %v1501_v32 = vshll.u32 %v6190_v22, 16 }
 0x267   : > { %v6179_v56 = vpop.permute.xlu2 %1198 }
 0x268   : > { %v6181_v43 = vpop.permute.xlu1 %1281  ;;  %v6183_v13 = vpop.permute.xlu0 %1194  ;;  %v1503_v24 = vrot.slane %v1501_v32, 1 }
 0x26a   : > { %v1504_v54 = vor.u32 %v1503_v24, %v1499_v55  ;;  %v1658_v55 = vshll.u32 %v5870_v16, 16  ;;  %v1651_v24 = vshrl.u32 %v6207_v48, 16 }
 0x26d   : > { %3821 = vrot.lane.b32.xlu2 %v6124_v17, %s8918_s23  ;;  %3192 = vrot.lane.b32.xlu0 %v6124_v17, %s8928_s18 }
 0x26e   : > { %1790 = vrot.lane.b32.xlu1 %v1497_v57, %s8928_s18  ;;  %v1506_v57 = vshll.u32 %v5886_v29, 16 }
 0x26f   : > { %v6197_v61 = vpop.permute.xlu2 %1289 }
 0x270   : > { %v6200_v60 = vpop.permute.xlu1 %2492  ;;  %v6202_v50 = vpop.permute.xlu0 %1285  ;;  %v1508_v37 = vrot.slane %v1506_v57, 1 }
 0x271   : > { %8929 = vst [vmem:[#allocation57_spill] sm:$0xff] %v6200_v60  ;;  %v5078_v60 = vld [vmem:[%s5479_s16 + $0x24] sm:$0xff] }
 0x272   : > { %4923 = vmatmul.msk.bf16.gmra.mxu1 %vm820_vm1, %v5078_v60  ;;  %v6227_v29 = vsel %vm477_vm0, %v1504_v54, %v1508_v37  ;;  %v1656_v60 = vor.u32 %v1655_v10, %v1651_v24  ;;  %v6242_v37 = vsel %vm6007_vm5, 0, %v6005_v21  ;;  %v6262_v21 = vsel %vm6007_vm5, 0, %v6001_v62 }
 0x273   : > { %8933 = vst [vmem:[#allocation61_spill] sm:$0xff] %v6227_v29  ;;  %v1513_v16 = vshll.u32 %v6242_v37, 16  ;;  %v1665_v62 = vshll.u32 %v6269_v19, 16 }
 0x274   : > { %8936 = vst [vmem:[#allocation63_spill] sm:$0xff] %v6242_v37 }
 0x275   : > { %3741 = vrot.lane.b32.xlu2 %v6124_v17, %s5353_s21  ;;  %1598 = vrot.lane.b32.xlu0 %v6207_v48, %s8927_s22  ;;  %v1515_v10 = vrot.slane %v1513_v16, 1  ;;  %v1672_v48 = vrot.slane %v1670_v2, 1 }
 0x276   : > { %1748 = vrot.lane.b32.xlu1 %v6190_v22, %s8840_s27 }
 0x277   : > { %v6217_v39 = vpop.permute.xlu2 %1594 }
 0x278   : > { %v6220_v38 = vpop.permute.xlu1 %1772  ;;  %v6222_v32 = vpop.permute.xlu0 %2529 }
 0x279   : > { %8931 = vst [vmem:[#allocation59_spill] sm:$0xff] %v6220_v38  ;;  %v1660_v38 = vrot.slane %v1658_v55, 1 }
 0x27a   : > { %8932 = vst [vmem:[#allocation60_spill] sm:$0xff] %v6222_v32 }
 0x27b   : > { %v6250_v32 = vsel %vm477_vm0, %v1656_v60, %v1660_v38  ;;  %v5079_v60 = vld [vmem:[%s5479_s16 + $0x30] sm:$0xff] }
 0x27c   : > { %8939 = vst [vmem:[#allocation66_spill] sm:$0xff] %v6250_v32 }
 0x27d   : > { %1574 = vrot.lane.b32.xlu2 %v6227_v29, %s8934_s25  ;;  %1792 = vrot.lane.b32.xlu0 %v6227_v29, %s8928_s18 }
 0x27e   : > { %2502 = vrot.lane.b32.xlu1 %v6227_v29, %s8918_s23 }
 0x27f   : > { %v6237_v57 = vpop.permute.xlu2 %1776 }
 0x280   : > { %8935 = vst [vmem:[#allocation62_spill] sm:$0xff] %v6237_v57  ;;  %v6244_v36 = vpop.permute.xlu1 %2399  ;;  %v6246_v54 = vpop.permute.xlu0 %1774  ;;  %v1511_v57 = vshrl.u32 %v6242_v37, 16 }
 0x281   : > { %8937 = vst [vmem:[#allocation64_spill] sm:$0xff] %v6244_v36  ;;  %v1525_v36 = vshll.u32 %v6262_v21, 16 }
 0x282   : > { %8938 = vst [vmem:[#allocation65_spill] sm:$0xff] %v6246_v54  ;;  %v1520_v54 = vrot.slane %v1518_v35, 1  ;;  %v1516_v16 = vor.u32 %v1515_v10, %v1511_v57  ;;  %4924 = vmatmul.msk.bf16.gmra.mxu1 %vm820_vm1, %v5079_v60  ;;  %v6294_v57 = vsel %vm6007_vm5, 0, %v5991_v26 }
 0x283   : > { %v1527_v35 = vrot.slane %v1525_v36, 1  ;;  %8941 = vst [vmem:[#allocation68_spill] sm:$0xff] %v6294_v57  ;;  %v1663_v36 = vshrl.u32 %v6269_v19, 16 }
 0x285   : > { %1726 = vrot.lane.b32.xlu2 %v6250_v32, %s8926_s19  ;;  %2467 = vrot.lane.b32.xlu0 %v6250_v32, %s8838_s29  ;;  %v6283_v32 = vsel %vm477_vm0, %v1516_v16, %v1520_v54  ;;  %v1523_v54 = vshrl.u32 %v6262_v21, 16 }
 0x286   : > { %2407 = vrot.lane.b32.xlu1 %v6227_v29, %s5353_s21 }
 0x287   : > { %v6264_v55 = vpop.permute.xlu2 %3739  ;;  %v1528_v29 = vor.u32 %v1527_v35, %v1523_v54 }
 0x288   : > { %8940 = vst [vmem:[#allocation67_spill] sm:$0xff] %v6264_v55  ;;  %v6271_v38 = vpop.permute.xlu1 %1196  ;;  %v6273_v24 = vpop.permute.xlu0 %1200  ;;  %v1530_v55 = vshll.u32 %v6088_v41, 16  ;;  %v1667_v41 = vrot.slane %v1665_v62, 1  ;;  %v1682_v62 = vshll.u32 %v6067_v23, 16  ;;  %v1675_v23 = vshrl.u32 %v6294_v57, 16 }
 0x28a   : > { %v1532_v10 = vrot.slane %v1530_v55, 1  ;;  %v1668_v26 = vor.u32 %v1667_v41, %v1663_v36  ;;  %v1684_v35 = vrot.slane %v1682_v62, 1 }
 0x28c   : > { %v6309_v27 = vsel %vm477_vm0, %v1528_v29, %v1532_v10  ;;  %v6312_v55 = vsel %vm477_vm0, %v1668_v26, %v1672_v48  ;;  %v5080_v48 = vld [vmem:[%s5479_s16 + $0x3c] sm:$0xff]  ;;  %v1453_v10 = vld [vmem:[%s8775_s3 + $0x10] sm:$0x3] }
 0x28d   : > { %1600 = vrot.lane.b32.xlu2 %v6269_v19, %s8927_s22  ;;  %1750 = vrot.lane.b32.xlu0 %v6242_v37, %s8840_s27  ;;  %v1677_v37 = vshll.u32 %v6294_v57, 16  ;;  %8942 = vst [vmem:[#allocation69_spill] sm:$0xff] %v6309_v27 }
 0x28e   : > { %1576 = vrot.lane.b32.xlu1 %v6283_v32, %s8934_s25 }
 0x28f   : > { %v6296_v11 = vpop.permute.xlu2 %2403  ;;  %v1679_v2 = vrot.slane %v1677_v37, 1  ;;  %v1950_v37 = vunpack.c.l.b16 %v1453_v10  ;;  %v5084_v10 = vld [vmem:[%s8775_s3] sm:$0xff] }
 0x290   : > { %v6299_v60 = vpop.permute.xlu1 %1287  ;;  %v6301_v16 = vpop.permute.xlu0 %1291 }
 0x291   : > { %v1680_v54 = vor.u32 %v1679_v2, %v1675_v23  ;;  %v1953_v26 = vpack.c.b16 %v1950_v37, %v1950_v37 }
 0x292   : > { %4925 = vmatmul.msk.bf16.gmra.mxu1 %vm820_vm1, %v5080_v48 }
 0x293   : > { %v6333_v36 = vsel %vm477_vm0, %v1680_v54, %v1684_v35  ;;  %v1974_v2 = vsel %vm1396_vm6, %v1953_v26, 0  ;;  %v5082_v35 = vld [vmem:[%s5479_s16 + $0x54] sm:$0xff]  ;;  %v5085_v54 = vld [vmem:[%s8775_s3 + $0x8] sm:$0xff] }
 0x294   : > { %8945 = vst [vmem:[#allocation72_spill] sm:$0xff] %v6333_v36  ;;  %2685 = vmatpush.bf16.msrb.mxu1 %v1974_v2  ;;  %1981 = vmatpush.bf16.msrb.mxu2 %v1974_v2 }
 0x295   : > { %1794 = vrot.lane.b32.xlu2 %v6283_v32, %s8928_s18  ;;  %1578 = vrot.lane.b32.xlu0 %v6309_v27, %s8934_s25 }
 0x296   : > { %1728 = vrot.lane.b32.xlu1 %v6312_v55, %s8926_s19  ;;  %4927 = vmatmul.msk.bf16.gmra.mxu2 %vm820_vm1, %v5082_v35 }
 0x297   : > { %v6320_v30 = vpop.permute.xlu2 %1295 }
 0x298   : > { %v6323_v29 = vpop.permute.xlu1 %2461  ;;  %v6325_v41 = vpop.permute.xlu0 %2496  ;;  %2686 = vmatpush.bf16.msrb.mxu1 %v5085_v54  ;;  %1982 = vmatpush.bf16.msrb.mxu2 %v5085_v54 }
 0x299   : > { %8943 = vst [vmem:[#allocation70_spill] sm:$0xff] %v6323_v29 }
 0x29a   : > { %8944 = vst [vmem:[#allocation71_spill] sm:$0xff] %v6325_v41  ;;  %v6391_v41 = vsel %vm6007_vm5, 0, %v6171_v1 }
 0x29b   : > { %8954 = vst [vmem:[#allocation80_spill] sm:$0xff] %v6391_v41 }
 0x29c   : > { %2687 = vmatpush.bf16.msrb.mxu1 %v5084_v10  ;;  %1983 = vmatpush.bf16.msrb.mxu2 %v5084_v10 }
 0x29d   : > { %2504 = vrot.lane.b32.xlu2 %v6283_v32, %s8918_s23  ;;  %1730 = vrot.lane.b32.xlu0 %v6333_v36, %s8926_s19 }
 0x29e   : > { %2469 = vrot.lane.b32.xlu1 %v6312_v55, %s8838_s29  ;;  %s8955_s29 = smov 16  }
 0x29f   : > { %v6341_v62 = vpop.permute.xlu2 %1204 }
 0x2a0   : > { %8946 = vst [vmem:[#allocation73_spill] sm:$0xff] %v6341_v62  ;;  %v6344_v23 = vpop.permute.xlu1 %2531  ;;  %v6346_v48 = vpop.permute.xlu0 %3083  ;;  %3998 = vmatpush.bf16.msra.mxu1 %v1974_v2  ;;  %3357 = vmatpush.bf16.msra.mxu2 %v1974_v2  ;;  %v6371_v62 = vsel %vm6007_vm5, 0, %v6181_v43  ;;  %v5083_v43 = vld [vmem:[%s5479_s16 + $0x60] sm:$0xff] }
 0x2a1   : > { %8947 = vst [vmem:[#allocation74_spill] sm:$0xff] %v6344_v23  ;;  %v1537_v2 = vshll.u32 %v6371_v62, 16  ;;  %v2425_v23 = vsel %vm477_vm0, %v5664_v34, %v5661_v25  ;;  %v6429_v34 = vsel %vm6007_vm5, 0, %v6202_v50 }
 0x2a2   : > { %8948 = vst [vmem:[#allocation75_spill] sm:$0xff] %v6346_v48 }
 0x2a4   : > { %3999 = vmatpush.bf16.msra.mxu1 %v5085_v54  ;;  %3358 = vmatpush.bf16.msra.mxu2 %v5085_v54  ;;  %v1542_v54 = vshll.u32 %v6084_v9, 16 }
 0x2a5   : > { %2409 = vrot.lane.b32.xlu2 %v6283_v32, %s5353_s21  ;;  %2506 = vrot.lane.b32.xlu0 %v6309_v27, %s8918_s23 }
 0x2a6   : > { %1602 = vrot.lane.b32.xlu1 %v6294_v57, %s8927_s22  ;;  %4928 = vmatmul.msk.bf16.gmra.mxu2 %vm820_vm1, %v5083_v43  ;;  %v1539_v57 = vrot.slane %v1537_v2, 1  ;;  %v1689_v43 = vshll.u32 %v6391_v41, 16  ;;  %v1544_v29 = vrot.slane %v1542_v54, 1 }
 0x2a7   : > { %v6362_v37 = vpop.permute.xlu2 %1746 }
 0x2a8   : > { %v6364_v26 = vpop.permute.xlu1 %2498  ;;  %v6366_v35 = vpop.permute.xlu0 %2533  ;;  %4000 = vmatpush.bf16.msra.mxu1 %v5084_v10  ;;  %3359 = vmatpush.bf16.msra.mxu2 %v5084_v10 }
 0x2a9   : > { %8949 = vst [vmem:[#allocation76_spill] sm:$0xff] %v6364_v26 }
 0x2aa   : > { %8950 = vst [vmem:[#allocation77_spill] sm:$0xff] %v6366_v35 }
 0x2ad   : > { %1752 = vrot.lane.b32.xlu2 %v6262_v21, %s8951_s26  ;;  %2411 = vrot.lane.b32.xlu0 %v6309_v27, %s5353_s21 }
 0x2ae   : > { %1796 = vrot.lane.b32.xlu1 %v6309_v27, %s8928_s18  ;;  %v1691_v27 = vrot.slane %v1689_v43, 1 }
 0x2af   : > { %v6379_v48 = vpop.permute.xlu2 %3148 }
 0x2b0   : > { %8952 = vst [vmem:[#allocation78_spill] sm:$0xff] %v6379_v48  ;;  %v6382_v35 = vpop.permute.xlu1 %1722  ;;  %v6384_v26 = vpop.permute.xlu0 %3099  ;;  %v1535_v48 = vshrl.u32 %v6371_v62, 16 }
 0x2b1   : > { %8953 = vst [vmem:[#allocation79_spill] sm:$0xff] %v6384_v26 }
 0x2b2   : > { %v1540_v1 = vor.u32 %v1539_v57, %v1535_v48  ;;  %v1694_v57 = vshll.u32 %v6063_v63, 16  ;;  %v1687_v48 = vshrl.u32 %v6391_v41, 16 }
 0x2b4   : > { %v6410_v9 = vsel %vm477_vm0, %v1540_v1, %v1544_v29  ;;  %v1692_v29 = vor.u32 %v1691_v27, %v1687_v48  ;;  %v1696_v1 = vrot.slane %v1694_v57, 1  ;;  %v1554_v27 = vshll.u32 %v6299_v60, 16 }
 0x2b5   : > { %2471 = vrot.lane.b32.xlu2 %v6333_v36, %s8955_s29  ;;  %1604 = vrot.lane.b32.xlu0 %v6391_v41, %s8927_s22  ;;  %v2537_v36 = vsel %vm820_vm1, %v5792_v6, %v6296_v11  ;;  %8956 = vst [vmem:[#allocation81_spill] sm:$0xff] %v6410_v9 }
 0x2b6   : > { %1754 = vrot.lane.b32.xlu1 %v6371_v62, %s8951_s26  ;;  %v2560_v6 = vsel %vm839_vm2, %v2537_v36, %v2425_v23  ;;  %v1549_v23 = vshll.u32 %v6429_v34, 16  ;;  %v6438_v25 = vsel %vm477_vm0, %v1692_v29, %v1696_v1  ;;  %v1556_v29 = vrot.slane %v1554_v27, 1 }
 0x2b7   : > { %v6401_v10 = vpop.permute.xlu2 %2465  ;;  %v2576_v63 = vsel %vm858_vm3, %v2560_v6, %v5796_v8  ;;  %8957 = vst [vmem:[#allocation82_spill] sm:$0xff] %v6438_v25  ;;  %v6452_v8 = vsel %vm6007_vm5, 0, %v6197_v61  ;;  %v1547_v61 = vshrl.u32 %v6429_v34, 16 }
 0x2b8   : > { %v2464_v26 = vpop.permute.xlu1 %2463  ;;  %v6404_v2 = vpop.permute.xlu0 %1572  ;;  %v1561_v1 = vshll.u32 %v6452_v8, 16 }
 0x2b9   : > { %v2592_v36 = vsel %vm889_vm4, %v2576_v63, %v2464_v26  ;;  %v1551_v26 = vrot.slane %v1549_v23, 1 }
 0x2ba   : > { %v2608_v50 = vsel %vm1870_vm7, %v2592_v36, %v5761_v49  ;;  %v6459_v49 = vsel %vm6007_vm5, 0, %v6183_v13  ;;  %v1563_v27 = vrot.slane %v1561_v1, 1 }
 0x2bb   : > { %v2623_v48 = vsel %vm1887_vm8, %v2608_v50, %v5783_v0  ;;  %v1701_v13 = vshll.u32 %v6459_v49, 16  ;;  %v1552_v23 = vor.u32 %v1551_v26, %v1547_v61  ;;  %v1706_v50 = vshll.u32 %v6271_v38, 16 }
 0x2bc   : > { %v1559_v26 = vshrl.u32 %v6452_v8, 16 }
 0x2bd   : > { %1580 = vrot.lane.b32.xlu2 %v6410_v9, %s8934_s25  ;;  %1798 = vrot.lane.b32.xlu0 %v6410_v9, %s8928_s18  ;;  %v6475_v41 = vsel %vm477_vm0, %v1552_v23, %v1556_v29  ;;  %v1708_v1 = vrot.slane %v1706_v50, 1 }
 0x2be   : > { %2508 = vrot.lane.b32.xlu1 %v6410_v9, %s8918_s23 }
 0x2bf   : > { %v6424_v11 = vpop.permute.xlu2 %3773 }
 0x2c0   : > { %v1571_v54 = vpop.permute.xlu1 %1570  ;;  %v6431_v43 = vpop.permute.xlu0 %1724 }
 0x2c5   : > { %1732 = vrot.lane.b32.xlu2 %v6438_v25, %s8926_s19  ;;  %2473 = vrot.lane.b32.xlu0 %v6438_v25, %s8955_s29  ;;  %v1566_v25 = vshll.u32 %v6301_v16, 16  ;;  %v1703_v16 = vrot.slane %v1701_v13, 1  ;;  %v1564_v13 = vor.u32 %v1563_v27, %v1559_v26 }
 0x2c6   : > { %2413 = vrot.lane.b32.xlu1 %v6410_v9, %s5353_s21  ;;  %v1718_v9 = vshll.u32 %v6273_v24, 16 }
 0x2c7   : > { %v6454_v60 = vpop.permute.xlu2 %3821 }
 0x2c8   : > { %v6461_v57 = vpop.permute.xlu1 %1293  ;;  %v2501_v6 = vpop.permute.xlu0 %2500 }
 0x2c9   : > { %v2633_v63 = vsel %vm1904_vm10, %v2623_v48, %v2501_v6  ;;  %v1568_v48 = vrot.slane %v1566_v25, 1  ;;  %v1807_v6 = vsel %vm820_vm1, %v6037_v18, %v5810_v5 }
 0x2ca   : > { %v2649_v36 = vsel %vm1921_vm9, %v2633_v63, %v5888_v31  ;;  %v6486_v31 = vsel %vm6007_vm5, 0, %v6179_v56  ;;  %v1699_v63 = vshrl.u32 %v6459_v49, 16 }
 0x2cb   : > { %4953 = vmatmul.msk.bf16.vlgmr.msrb.gmra.mxu1 %vm1956_vm11, %v2649_v36  ;;  %8958 = vst [vmem:[#allocation83_spill] sm:$0xff] %v6486_v31  ;;  %v1823_v36 = vsel %vm839_vm2, %v1807_v6, %v1571_v54  ;;  %v1713_v56 = vshll.u32 %v6486_v31, 16  ;;  %v6501_v25 = vsel %vm477_vm0, %v1564_v13, %v1568_v48  ;;  %v1711_v27 = vshrl.u32 %v6486_v31, 16 }
 0x2cc   : > { %v1704_v23 = vor.u32 %v1703_v16, %v1699_v63  ;;  %v1839_v5 = vsel %vm858_vm3, %v1823_v36, %v6217_v39  ;;  %v1720_v39 = vrot.slane %v1718_v9, 1 }
 0x2cd   : > { %1606 = vrot.lane.b32.xlu2 %v6459_v49, %s8927_s22  ;;  %1756 = vrot.lane.b32.xlu0 %v6429_v34, %s8951_s26  ;;  %v1715_v54 = vrot.slane %v1713_v56, 1  ;;  %v1855_v24 = vsel %vm889_vm4, %v1839_v5, %v5785_v3 }
 0x2ce   : > { %1582 = vrot.lane.b32.xlu1 %v6475_v41, %s8934_s25  ;;  %v6506_v18 = vsel %vm477_vm0, %v1704_v23, %v1708_v1  ;;  %v1872_v6 = vsel %vm1870_vm7, %v1855_v24, %v6382_v35 }
 0x2cf   : > { %v6488_v38 = vpop.permute.xlu2 %3741  ;;  %v1716_v48 = vor.u32 %v1715_v54, %v1711_v27  ;;  %v1889_v3 = vsel %vm1887_vm8, %v1872_v6, %v6362_v37  ;;  %v1809_v37 = vsel %vm820_vm1, %v6082_v52, %v5773_v59  ;;  %v6569_v27 = vsel %vm6007_vm5, 0, %v6461_v57 }
 0x2d0   : > { %v6494_v61 = vpop.permute.xlu1 %1202  ;;  %v2406_v29 = vpop.permute.xlu0 %2405  ;;  %v1906_v35 = vsel %vm1904_vm10, %v1889_v3, %v5846_v28  ;;  %v1825_v28 = vsel %vm839_vm2, %v1809_v37, %v6404_v2 }
 0x2d1   : > { %v6522_v63 = vsel %vm477_vm0, %v1716_v48, %v1720_v39  ;;  %v2540_v56 = vsel %vm820_vm1, %v5794_v7, %v2406_v29 }
 0x2d2   : > { %v2562_v23 = vsel %vm839_vm2, %v2540_v56, %v5717_v15 }
 0x2d3   : > { %v2578_v59 = vsel %vm858_vm3, %v2562_v23, %v5844_v46 }
 0x2d4   : > { %v2594_v54 = vsel %vm889_vm4, %v2578_v59, %v6401_v10 }
 0x2d5   : > { %1800 = vrot.lane.b32.xlu2 %v6475_v41, %s8928_s18  ;;  %1584 = vrot.lane.b32.xlu0 %v6501_v25, %s8934_s25 }
 0x2d6   : > { %1734 = vrot.lane.b32.xlu1 %v6506_v18, %s8926_s19 }
 0x2d7   : > { %v1575_v50 = vpop.permute.xlu2 %1574 }
 0x2d8   : > { %v1597_v16 = vpop.permute.xlu1 %1596  ;;  %v6517_v26 = vpop.permute.xlu0 %3131 }
 0x2d9   : > { %v1841_v7 = vsel %vm858_vm3, %v1825_v28, %v1597_v16 }
 0x2da   : > { %v1857_v2 = vsel %vm889_vm4, %v1841_v7, %v5783_v0  ;;  %v2610_v0 = vsel %vm1870_vm7, %v2594_v54, %v5909_v4 }
 0x2db   : > { %v1874_v24 = vsel %vm1870_vm7, %v1857_v2, %v6431_v43  ;;  %v1781_v43 = vshll.u32 %v6569_v27, 16  ;;  %v2624_v57 = vsel %vm1887_vm8, %v2610_v0, %v5960_v47 }
 0x2dd   : > { %2510 = vrot.lane.b32.xlu2 %v6475_v41, %s8918_s23  ;;  %1736 = vrot.lane.b32.xlu0 %v6522_v63, %s8926_s19 }
 0x2de   : > { %2475 = vrot.lane.b32.xlu1 %v6506_v18, %s8955_s29 }
 0x2df   : > { %v6532_v9 = vpop.permute.xlu2 %1726 }
 0x2e0   : > { %v1791_v1 = vpop.permute.xlu1 %1790  ;;  %v6536_v36 = vpop.permute.xlu0 %3192 }
 0x2e1   : > { %v1923_v13 = vsel %vm1921_vm9, %v1906_v35, %v1791_v1  ;;  %v1783_v35 = vrot.slane %v1781_v43, 1  ;;  %v1779_v1 = vshrl.u32 %v6569_v27, 16  ;;  %v8959_v43 = vld [vmem:[#allocation34_spill] sm:$0xff] }
 0x2e2   : > { %4937 = vmatmul.msk.bf16.vlgmr.msrb.gmra.mxu2 %vm1956_vm11, %v1923_v13 }
 0x2e3   : > { %v1784_v13 = vor.u32 %v1783_v35, %v1779_v1 }
 0x2e5   : > { %2415 = vrot.lane.b32.xlu2 %v6475_v41, %s5353_s21  ;;  %2512 = vrot.lane.b32.xlu0 %v6501_v25, %s8918_s23 }
 0x2e6   : > { %1608 = vrot.lane.b32.xlu1 %v6486_v31, %s8927_s22 }
 0x2e7   : > { %v6558_v52 = vpop.permute.xlu2 %1600 }
 0x2e8   : > { %v1749_v29 = vpop.permute.xlu1 %1748  ;;  %v1599_v5 = vpop.permute.xlu0 %1598 }
 0x2e9   : > { %v1891_v46 = vsel %vm1887_vm8, %v1874_v24, %v1749_v29 }
 0x2ea   : > { %v1908_v48 = vsel %vm1904_vm10, %v1891_v46, %v5840_v40  ;;  %v1786_v40 = vshll.u32 %v6320_v30, 16 }
 0x2ec   : > { %v1788_v7 = vrot.slane %v1786_v40, 1  ;;  %v8963_v40 = vld [vmem:[#allocation31_spill] sm:$0xff] }
 0x2ed   : > { %1758 = vrot.lane.b32.xlu2 %v6452_v8, %s8951_s26  ;;  %2417 = vrot.lane.b32.xlu0 %v6501_v25, %s5353_s21 }
 0x2ee   : > { %1802 = vrot.lane.b32.xlu1 %v6501_v25, %s8928_s18 }
 0x2ef   : > { %v1795_v10 = vpop.permute.xlu2 %1794 }
 0x2f0   : > { %v2503_v39 = vpop.permute.xlu1 %2502  ;;  %v1793_v16 = vpop.permute.xlu0 %1792 }
 0x2f1   : > { %v2635_v6 = vsel %vm1904_vm10, %v2624_v57, %v2503_v39  ;;  %v1925_v3 = vsel %vm1921_vm9, %v1908_v48, %v1793_v16  ;;  %v8960_v16 = vld [vmem:[#allocation38_spill] sm:$0xff] }
 0x2f2   : > { %4938 = vmatmul.msk.bf16.gmra.mxu2 %vm1956_vm11, %v1925_v3  ;;  %v2651_v4 = vsel %vm1921_vm9, %v2635_v6, %v5905_v58  ;;  %v1811_v58 = vsel %vm820_vm1, %v6190_v22, %v5945_v42  ;;  %v6612_v42 = vsel %vm477_vm0, %v1784_v13, %v1788_v7  ;;  %v8961_v6 = vld [vmem:[#allocation61_spill] sm:$0xff]  ;;  %v8965_v13 = vld [vmem:[#allocation63_spill] sm:$0xff]  ;;  %v8967_v7 = vld [vmem:[#allocation58_spill] sm:$0xff] }
 0x2f3   : > { %4954 = vmatmul.msk.bf16.gmra.mxu1 %vm1956_vm11, %v2651_v4  ;;  %v1827_v28 = vsel %vm839_vm2, %v1811_v58, %v1575_v50 }
 0x2f4   : > { %v1843_v30 = vsel %vm858_vm3, %v1827_v28, %v1599_v5  ;;  %v8966_v28 = vld [vmem:[#allocation22_spill] sm:$0xff] }
 0x2f5   : > { %2477 = vrot.lane.b32.xlu2 %v6522_v63, %s8955_s29  ;;  %3085 = vrot.lane.b32.xlu0 %v6124_v17, %s8934_s25  ;;  %v1859_v50 = vsel %vm889_vm4, %v1843_v30, %v5960_v47 }
 0x2f6   : > { %1760 = vrot.lane.b32.xlu1 %v6569_v27, %s8951_s26  ;;  %v1876_v47 = vsel %vm1870_vm7, %v1859_v50, %v6532_v9 }
 0x2f7   : > { %v2505_v56 = vpop.permute.xlu2 %2504 }
 0x2f8   : > { %v2408_v37 = vpop.permute.xlu1 %2407  ;;  %v2468_v23 = vpop.permute.xlu0 %2467 }
 0x2f9   : > { %v2543_v17 = vsel %vm820_vm1, %v5927_v51, %v2408_v37 }
 0x2fa   : > { %v2564_v59 = vsel %vm839_vm2, %v2543_v17, %v5753_v44 }
 0x2fb   : > { %v2580_v29 = vsel %vm858_vm3, %v2564_v59, %v5858_v53 }
 0x2fc   : > { %v2596_v2 = vsel %vm889_vm4, %v2580_v29, %v2468_v23 }
 0x2fd   : > { %v2612_v51 = vsel %vm1870_vm7, %v2596_v2, %v6003_v12  ;;  %3071 = vrot.lane.b32.xlu2 %v5712_v14, %s5353_s21  ;;  %1804 = vrot.lane.b32.xlu0 %v6612_v42, %s8928_s18  ;;  %v8968_v2 = vld [vmem:[#allocation27_spill] sm:$0xff] }
 0x2fe   : > { %3757 = vrot.lane.b32.xlu1 %v5717_v15, %s8934_s25  ;;  %v2625_v53 = vsel %vm1887_vm8, %v2612_v51, %v5962_v20 }
 0x2ff   : > { %v2410_v5 = vpop.permute.xlu2 %2409  ;;  %v2637_v54 = vsel %vm1904_vm10, %v2625_v53, %v2505_v56  ;;  %v8964_v56 = vld [vmem:[#allocation26_spill] sm:$0xff] }
 0x300   : > { %v1577_v24 = vpop.permute.xlu1 %1576  ;;  %v1751_v12 = vpop.permute.xlu0 %1750  ;;  %v2653_v0 = vsel %vm1921_vm9, %v2637_v54, %v6026_v45  ;;  %v2546_v48 = vsel %vm820_vm1, %v8960_v16, %v2410_v5  ;;  %v1813_v58 = vsel %vm820_vm1, %v8965_v13, %v8964_v56  ;;  %v8973_v16 = vld [vmem:[#allocation25_spill] sm:$0xff] }
 0x301   : > { %v1893_v46 = vsel %vm1887_vm8, %v1876_v47, %v1751_v12  ;;  %v1829_v23 = vsel %vm839_vm2, %v1813_v58, %v1577_v24  ;;  %v8969_v24 = vld [vmem:[#allocation46_spill] sm:$0xff] }
 0x302   : > { %v1910_v39 = vsel %vm1904_vm10, %v1893_v46, %v8959_v43  ;;  %v1845_v30 = vsel %vm858_vm3, %v1829_v23, %v6558_v52  ;;  %v8970_v12 = vld [vmem:[#allocation66_spill] sm:$0xff]  ;;  %v8971_v43 = vld [vmem:[#allocation39_spill] sm:$0xff] }
 0x303   : > { %4955 = vmatmul.msk.bf16.gmra.mxu1 %vm1956_vm11, %v2653_v0  ;;  %v1927_v15 = vsel %vm1921_vm9, %v1910_v39, %v1795_v10  ;;  %v8962_v10 = vld [vmem:[#allocation8_spill] sm:$0xff]  ;;  %v1861_v53 = vsel %vm889_vm4, %v1845_v30, %v5962_v20 }
 0x304   : > { %4939 = vmatmul.msk.bf16.gmra.mxu2 %vm1956_vm11, %v1927_v15  ;;  %v2566_v3 = vsel %vm839_vm2, %v2546_v48, %v8962_v10  ;;  %v8972_v15 = vld [vmem:[#allocation30_spill] sm:$0xff]  ;;  %v1815_v48 = vsel %vm820_vm1, %v6262_v21, %v8973_v16  ;;  %v8984_v16 = vld [vmem:[#allocation47_spill] sm:$0xff] }
 0x305   : > { %2514 = vrot.lane.b32.xlu2 %v6612_v42, %s8918_s23  ;;  %3101 = vrot.lane.b32.xlu0 %v6190_v22, %s8927_s22  ;;  %v2582_v1 = vsel %vm858_vm3, %v2566_v3, %v8963_v40 }
 0x306   : > { %3117 = vrot.lane.b32.xlu1 %v5712_v14, %s8934_s25 }
 0x307   : > { %v1753_v9 = vpop.permute.xlu2 %1752 }
 0x308   : > { %v1729_v45 = vpop.permute.xlu1 %1728  ;;  %v1579_v57 = vpop.permute.xlu0 %1578 }
 0x309   : > { %v1878_v54 = vsel %vm1870_vm7, %v1861_v53, %v1729_v45 }
 0x30a   : > { %v1895_v52 = vsel %vm1887_vm8, %v1878_v54, %v1753_v9  ;;  %v8980_v54 = vld [vmem:[#allocation33_spill] sm:$0xff] }
 0x30b   : > { %v1912_v39 = vsel %vm1904_vm10, %v1895_v52, %v8971_v43  ;;  %v8983_v43 = vld [vmem:[#allocation49_spill] sm:$0xff] }
 0x30d   : > { %3775 = vrot.lane.b32.xlu2 %v8961_v6, %s8955_s29  ;;  %3133 = vrot.lane.b32.xlu0 %v8961_v6, %s8926_s19  ;;  %v8974_v6 = vld [vmem:[#allocation14_spill] sm:$0xff] }
 0x30e   : > { %3791 = vrot.lane.b32.xlu1 %v5753_v44, %s8927_s22 }
 0x30f   : > { %v2472_v22 = vpop.permute.xlu2 %2471 }
 0x310   : > { %v2470_v4 = vpop.permute.xlu1 %2469  ;;  %v1731_v35 = vpop.permute.xlu0 %1730 }
 0x311   : > { %v2598_v37 = vsel %vm889_vm4, %v2582_v1, %v2470_v4  ;;  %v1831_v4 = vsel %vm839_vm2, %v1815_v48, %v1579_v57  ;;  %v8975_v1 = vld [vmem:[#allocation43_spill] sm:$0xff] }
 0x312   : > { %v2614_v17 = vsel %vm1870_vm7, %v2598_v37, %v8966_v28  ;;  %v6711_v28 = vpop.f32.mrf.mxu2 }
 0x313   : > { %v2626_v50 = vsel %vm1887_vm8, %v2614_v17, %v8968_v2  ;;  %8976 = vst [vmem:[#allocation34_spill] sm:$0xff] %v6711_v28 }
 0x315   : > { %3150 = vrot.lane.b32.xlu2 %v8967_v7, %s8951_s26  ;;  %3807 = vrot.lane.b32.xlu0 %v5712_v14, %s8951_s26 }
 0x316   : > { %3166 = vrot.lane.b32.xlu1 %v5712_v14, %s8918_s23 }
 0x317   : > { %v1581_v59 = vpop.permute.xlu2 %1580 }
 0x318   : > { %v1603_v29 = vpop.permute.xlu1 %1602  ;;  %v2507_v51 = vpop.permute.xlu0 %2506 }
 0x319   : > { %v2639_v5 = vsel %vm1904_vm10, %v2626_v50, %v2507_v51  ;;  %v1847_v40 = vsel %vm858_vm3, %v1831_v4, %v1603_v29  ;;  %v8978_v50 = vld [vmem:[#allocation44_spill] sm:$0xff]  ;;  %v8985_v4 = vld [vmem:[#allocation19_spill] sm:$0xff] }
 0x31a   : > { %v2655_v47 = vsel %vm1921_vm9, %v2639_v5, %v8969_v24  ;;  %v1863_v57 = vsel %vm889_vm4, %v1847_v40, %v8968_v2  ;;  %v8979_v5 = vld [vmem:[#allocation53_spill] sm:$0xff] }
 0x31b   : > { %4956 = vmatmul.msk.bf16.gmra.mxu1 %vm1956_vm11, %v2655_v47  ;;  %v1880_v30 = vsel %vm1870_vm7, %v1863_v57, %v1731_v35  ;;  %v8986_v40 = vld [vmem:[#allocation37_spill] sm:$0xff] }
 0x31c   : > { %v8987_v57 = vld [vmem:[#allocation57_spill] sm:$0xff] }
 0x31d   : > { %3823 = vrot.lane.b32.xlu2 %v8970_v12, %s8918_s23  ;;  %3194 = vrot.lane.b32.xlu0 %v8970_v12, %s8928_s18 }
 0x31e   : > { %3842 = vrot.lane.b32.xlu1 %v5753_v44, %s8928_s18 }
 0x31f   : > { %v1733_v20 = vpop.permute.xlu2 %1732 }
 0x320   : > { %v1797_v46 = vpop.permute.xlu1 %1796  ;;  %v2412_v0 = vpop.permute.xlu0 %2411 }
 0x321   : > { %v2549_v45 = vsel %vm820_vm1, %v8972_v15, %v2412_v0  ;;  %v1929_v9 = vsel %vm1921_vm9, %v1912_v39, %v1797_v46  ;;  %v6734_v46 = vpop.f32.mrf.mxu2  ;;  %v1817_v39 = vsel %vm820_vm1, %v6371_v62, %v8983_v43  ;;  %v8993_v43 = vld [vmem:[#allocation64_spill] sm:$0xff] }
 0x322   : > { %4940 = vmatmul.msk.bf16.gmra.mxu2 %vm1956_vm11, %v1929_v9  ;;  %v2568_v3 = vsel %vm839_vm2, %v2549_v45, %v8974_v6  ;;  %8982 = vst [vmem:[#allocation38_spill] sm:$0xff] %v6734_v46  ;;  %v1833_v9 = vsel %vm839_vm2, %v1817_v39, %v1581_v59 }
 0x323   : > { %v2584_v56 = vsel %vm858_vm3, %v2568_v3, %v8975_v1 }
 0x324   : > { %v2600_v17 = vsel %vm889_vm4, %v2584_v56, %v2472_v22 }
 0x325   : > { %3743 = vrot.lane.b32.xlu2 %v8970_v12, %s5353_s21  ;;  %3087 = vrot.lane.b32.xlu0 %v8970_v12, %s8934_s25  ;;  %v2616_v51 = vsel %vm1870_vm7, %v2600_v17, %v8978_v50 }
 0x326   : > { %3759 = vrot.lane.b32.xlu1 %v5753_v44, %s8934_s25  ;;  %v8977_v44 = vld [vmem:[#allocation7_spill] sm:$0xff]  ;;  %v2627_v22 = vsel %vm1887_vm8, %v2616_v51, %v8979_v5 }
 0x327   : > { %v6707_v58 = vpop.permute.xlu2 %1606 }
 0x328   : > { %v1755_v37 = vpop.permute.xlu1 %1754  ;;  %v1605_v23 = vpop.permute.xlu0 %1604 }
 0x329   : > { %v1897_v29 = vsel %vm1887_vm8, %v1880_v30, %v1755_v37  ;;  %v1849_v3 = vsel %vm858_vm3, %v1833_v9, %v1605_v23  ;;  %v6762_v59 = vpop.f32.mrf.mxu2  ;;  %v8989_v23 = vld [vmem:[#allocation54_spill] sm:$0xff] }
 0x32a   : > { %v1914_v24 = vsel %vm1904_vm10, %v1897_v29, %v8980_v54  ;;  %v1865_v37 = vsel %vm889_vm4, %v1849_v3, %v8979_v5  ;;  %8988 = vst [vmem:[#allocation61_spill] sm:$0xff] %v6762_v59  ;;  %v8996_v3 = vld [vmem:[#allocation50_spill] sm:$0xff] }
 0x32d   : > { %3073 = vrot.lane.b32.xlu2 %v8977_v44, %s5353_s21  ;;  %3103 = vrot.lane.b32.xlu0 %v8965_v13, %s8927_s22  ;;  %v8981_v13 = vld [vmem:[#allocation42_spill] sm:$0xff] }
 0x32e   : > { %3119 = vrot.lane.b32.xlu1 %v8977_v44, %s8934_s25 }
 0x32f   : > { %v1801_v2 = vpop.permute.xlu2 %1800 }
 0x330   : > { %v2509_v53 = vpop.permute.xlu1 %2508  ;;  %v1799_v35 = vpop.permute.xlu0 %1798 }
 0x331   : > { %v2641_v47 = vsel %vm1904_vm10, %v2627_v22, %v2509_v53  ;;  %v1931_v52 = vsel %vm1921_vm9, %v1914_v24, %v1799_v35  ;;  %v1882_v53 = vsel %vm1870_vm7, %v1865_v37, %v1733_v20  ;;  %v8990_v35 = vld [vmem:[#allocation60_spill] sm:$0xff]  ;;  %v8991_v24 = vld [vmem:[#allocation59_spill] sm:$0xff] }
 0x332   : > { %4941 = vmatmul.msk.bf16.gmra.mxu2 %vm1956_vm11, %v1931_v52  ;;  %v2657_v12 = vsel %vm1921_vm9, %v2641_v47, %v8981_v13  ;;  %v6784_v13 = vpop.f32.mrf.mxu2 }
 0x333   : > { %4957 = vmatmul.msk.bf16.gmra.mxu1 %vm1956_vm11, %v2657_v12  ;;  %8992 = vst [vmem:[#allocation8_spill] sm:$0xff] %v6784_v13 }
 0x335   : > { %3777 = vrot.lane.b32.xlu2 %v6283_v32, %s8955_s29  ;;  %3135 = vrot.lane.b32.xlu0 %v6283_v32, %s8926_s19 }
 0x336   : > { %3793 = vrot.lane.b32.xlu1 %v8962_v10, %s8927_s22 }
 0x337   : > { %v2511_v0 = vpop.permute.xlu2 %2510 }
 0x338   : > { %v2414_v15 = vpop.permute.xlu1 %2413  ;;  %v2474_v45 = vpop.permute.xlu0 %2473 }
 0x339   : > { %v2552_v48 = vsel %vm820_vm1, %v8984_v16, %v2414_v15 }
 0x33a   : > { %v2570_v32 = vsel %vm839_vm2, %v2552_v48, %v8985_v4  ;;  %v6796_v48 = vpop.f32.mrf.mxu2 }
 0x33b   : > { %v2586_v1 = vsel %vm858_vm3, %v2570_v32, %v8986_v40  ;;  %8995 = vst [vmem:[#allocation31_spill] sm:$0xff] %v6796_v48  ;;  %v1819_v32 = vsel %vm820_vm1, %v6429_v34, %v8996_v3  ;;  %v8997_v40 = vld [vmem:[#allocation56_spill] sm:$0xff] }
 0x33c   : > { %v2602_v56 = vsel %vm889_vm4, %v2586_v1, %v2474_v45 }
 0x33d   : > { %v2618_v17 = vsel %vm1870_vm7, %v2602_v56, %v8987_v57  ;;  %3152 = vrot.lane.b32.xlu2 %v6269_v19, %s8951_s26  ;;  %3809 = vrot.lane.b32.xlu0 %v8977_v44, %s8951_s26  ;;  %v8999_v57 = vld [vmem:[#allocation45_spill] sm:$0xff] }
 0x33e   : > { %3168 = vrot.lane.b32.xlu1 %v8977_v44, %s8918_s23  ;;  %v2628_v30 = vsel %vm1887_vm8, %v2618_v17, %v8989_v23 }
 0x33f   : > { %v2416_v29 = vpop.permute.xlu2 %2415  ;;  %v2643_v50 = vsel %vm1904_vm10, %v2628_v30, %v2511_v0 }
 0x340   : > { %v1583_v51 = vpop.permute.xlu1 %1582  ;;  %v1757_v5 = vpop.permute.xlu0 %1756  ;;  %v2659_v54 = vsel %vm1921_vm9, %v2643_v50, %v8990_v35  ;;  %v2555_v39 = vsel %vm820_vm1, %v8993_v43, %v2416_v29  ;;  %v9004_v43 = vld [vmem:[#allocation65_spill] sm:$0xff] }
 0x341   : > { %v1899_v22 = vsel %vm1887_vm8, %v1882_v53, %v1757_v5 }
 0x342   : > { %v1916_v47 = vsel %vm1904_vm10, %v1899_v22, %v8991_v24  ;;  %v9001_v22 = vld [vmem:[#allocation74_spill] sm:$0xff] }
 0x343   : > { %4958 = vmatmul.msk.bf16.gmra.mxu1 %vm1956_vm11, %v2659_v54  ;;  %v1933_v52 = vsel %vm1921_vm9, %v1916_v47, %v1801_v2  ;;  %v8994_v2 = vld [vmem:[#allocation21_spill] sm:$0xff]  ;;  %v6825_v54 = vpop.f32.mrf.mxu2 }
 0x344   : > { %4942 = vmatmul.msk.bf16.gmra.mxu2 %vm1956_vm11, %v1933_v52  ;;  %v2572_v15 = vsel %vm839_vm2, %v2555_v39, %v8994_v2  ;;  %9002 = vst [vmem:[#allocation26_spill] sm:$0xff] %v6825_v54  ;;  %v9003_v47 = vld [vmem:[#allocation69_spill] sm:$0xff] }
 0x345   : > { %3825 = vrot.lane.b32.xlu2 %v6312_v55, %s8918_s23  ;;  %3196 = vrot.lane.b32.xlu0 %v6312_v55, %s8928_s18  ;;  %v2588_v1 = vsel %vm858_vm3, %v2572_v15, %v8997_v40 }
 0x346   : > { %3844 = vrot.lane.b32.xlu1 %v8962_v10, %s8928_s18 }
 0x347   : > { %v1759_v20 = vpop.permute.xlu2 %1758 }
 0x348   : > { %v1735_v12 = vpop.permute.xlu1 %1734  ;;  %v1585_v0 = vpop.permute.xlu0 %1584 }
 0x34d   : > { %3745 = vrot.lane.b32.xlu2 %v6312_v55, %s5353_s21  ;;  %3089 = vrot.lane.b32.xlu0 %v6312_v55, %s8934_s25  ;;  %v1835_v55 = vsel %vm839_vm2, %v1819_v32, %v1583_v51  ;;  %v9000_v51 = vld [vmem:[#allocation51_spill] sm:$0xff]  ;;  %v9006_v32 = vld [vmem:[#allocation36_spill] sm:$0xff] }
 0x34e   : > { %3761 = vrot.lane.b32.xlu1 %v8962_v10, %s8934_s25  ;;  %v8998_v10 = vld [vmem:[#allocation9_spill] sm:$0xff]  ;;  %v1851_v37 = vsel %vm858_vm3, %v1835_v55, %v6707_v58 }
 0x34f   : > { %v2478_v45 = vpop.permute.xlu2 %2477  ;;  %v1867_v50 = vsel %vm889_vm4, %v1851_v37, %v8989_v23  ;;  %v6833_v23 = vpop.f32.mrf.mxu1 }
 0x350   : > { %v2476_v9 = vpop.permute.xlu1 %2475  ;;  %v1737_v16 = vpop.permute.xlu0 %1736 }
 0x351   : > { %v2604_v56 = vsel %vm889_vm4, %v2588_v1, %v2476_v9  ;;  %v9007_v1 = vld [vmem:[#allocation70_spill] sm:$0xff] }
 0x352   : > { %v2620_v17 = vsel %vm1870_vm7, %v2604_v56, %v8999_v57  ;;  %v9008_v56 = vld [vmem:[#allocation48_spill] sm:$0xff] }
 0x353   : > { %v2629_v53 = vsel %vm1887_vm8, %v2620_v17, %v9000_v51  ;;  %v1821_v37 = vsel %vm820_vm1, %v6452_v8, %v9008_v56 }
 0x355   : > { %3075 = vrot.lane.b32.xlu2 %v8998_v10, %s5353_s21  ;;  %3105 = vrot.lane.b32.xlu0 %v6262_v21, %s8927_s22  ;;  %v1884_v21 = vsel %vm1870_vm7, %v1867_v50, %v1735_v12  ;;  %v9009_v50 = vld [vmem:[#allocation68_spill] sm:$0xff] }
 0x356   : > { %3121 = vrot.lane.b32.xlu1 %v8998_v10, %s8934_s25  ;;  %v1901_v24 = vsel %vm1887_vm8, %v1884_v21, %v1759_v20  ;;  %v9005_v20 = vld [vmem:[#allocation55_spill] sm:$0xff] }
 0x357   : > { %v6815_v30 = vpop.permute.xlu2 %3071  ;;  %v1918_v39 = vsel %vm1904_vm10, %v1901_v24, %v9004_v43  ;;  %v6865_v24 = vpop.f32.mrf.mxu1 }
 0x358   : > { %v1609_v29 = vpop.permute.xlu1 %1608  ;;  %v2513_v5 = vpop.permute.xlu0 %2512 }
 0x359   : > { %v2645_v58 = vsel %vm1904_vm10, %v2629_v53, %v2513_v5  ;;  %v1837_v53 = vsel %vm839_vm2, %v1821_v37, %v1585_v0  ;;  %v9010_v5 = vld [vmem:[#allocation71_spill] sm:$0xff]  ;;  %v9016_v37 = vld [vmem:[#allocation72_spill] sm:$0xff] }
 0x35a   : > { %v2661_v35 = vsel %vm1921_vm9, %v2645_v58, %v9001_v22  ;;  %v1853_v58 = vsel %vm858_vm3, %v1837_v53, %v1609_v29  ;;  %v9012_v0 = vld [vmem:[#allocation67_spill] sm:$0xff]  ;;  %v6876_v29 = vld [vmem:[%s8776_s4] ss:$0 sm:$0xff] }
 0x35b   : > { %4959 = vmatmul.msk.bf16.gmra.mxu1 %vm1956_vm11, %v2661_v35  ;;  %v9017_v53 = vld [vmem:[#allocation11_spill] sm:$0xff] }
 0x35d   : > { %3779 = vrot.lane.b32.xlu2 %v9003_v47, %s8955_s29  ;;  %3137 = vrot.lane.b32.xlu0 %v9003_v47, %s8926_s19 }
 0x35e   : > { %3795 = vrot.lane.b32.xlu1 %v8974_v6, %s8927_s22 }
 0x35f   : > { %v2515_v52 = vpop.permute.xlu2 %2514 }
 0x360   : > { %v1803_v12 = vpop.permute.xlu1 %1802  ;;  %v2418_v15 = vpop.permute.xlu0 %2417 }
 0x361   : > { %v1935_v9 = vsel %vm1921_vm9, %v1918_v39, %v1803_v12  ;;  %v2558_v3 = vsel %vm820_vm1, %v9005_v20, %v2418_v15  ;;  %v9013_v39 = vld [vmem:[#allocation4_spill] sm:$0xff]  ;;  %v9014_v20 = vld [vmem:[#allocation77_spill] sm:$0xff] }
 0x362   : > { %4943 = vmatmul.msk.bf16.gmra.mxu2 %vm1956_vm11, %v1935_v9  ;;  %v2574_v40 = vsel %vm839_vm2, %v2558_v3, %v9006_v32  ;;  %v3857_v15 = vsel %vm820_vm1, %v9013_v39, %v9012_v0  ;;  %v1869_v9 = vsel %vm889_vm4, %v1853_v58, %v9000_v51  ;;  %v6911_v0 = vpop.f32.mrf.mxu1 }
 0x363   : > { %v2590_v55 = vsel %vm858_vm3, %v2574_v40, %v9007_v1 }
 0x364   : > { %v2606_v57 = vsel %vm889_vm4, %v2590_v55, %v2478_v45  ;;  %v9011_v45 = vld [vmem:[#allocation76_spill] sm:$0xff]  ;;  %v1886_v55 = vsel %vm1870_vm7, %v1869_v9, %v1737_v16 }
 0x365   : > { %v1985_v17 = vpop.f32.mrf.mxu2  ;;  %3154 = vrot.lane.b32.xlu2 %v9009_v50, %s8951_s26  ;;  %3811 = vrot.lane.b32.xlu0 %v8998_v10, %s8951_s26  ;;  %v2622_v21 = vsel %vm1870_vm7, %v2606_v57, %v9010_v5  ;;  %v9019_v9 = vld [vmem:[#allocation20_spill] sm:$0xff] }
 0x366   : > { %3170 = vrot.lane.b32.xlu1 %v8998_v10, %s8918_s23  ;;  %v2631_v35 = vsel %vm1887_vm8, %v2622_v21, %v9011_v45  ;;  %v6883_v40 = vadd.f32 %v6876_v29, %v1985_v17 }
 0x367   : > { %v6861_v22 = vpop.permute.xlu2 %3775  ;;  %v2647_v12 = vsel %vm1904_vm10, %v2631_v35, %v2515_v52  ;;  %v9015_v52 = vld [vmem:[#allocation12_spill] sm:$0xff] }
 0x368   : > { %v1761_v47 = vpop.permute.xlu1 %1760  ;;  %v6868_v43 = vpop.permute.xlu0 %3085  ;;  %v2663_v3 = vsel %vm1921_vm9, %v2647_v12, %v9014_v20  ;;  %v3873_v1 = vsel %vm839_vm2, %v3857_v15, %v9015_v52  ;;  %v2025_v5 = vmul.f32 %v6883_v40, %v6883_v40  ;;  %v9021_v52 = vld [vmem:[#allocation32_spill] sm:$0xff] }
 0x369   : > { %v1903_v51 = vsel %vm1887_vm8, %v1886_v55, %v1761_v47  ;;  %v3888_v16 = vsel %vm858_vm3, %v3873_v1, %v9017_v53  ;;  %v9018_v47 = vld [vmem:[#allocation62_spill] sm:$0xff]  ;;  %v9022_v55 = vld [vmem:[#allocation75_spill] sm:$0xff] }
 0x36a   : > { %v3898_v45 = vsel %vm889_vm4, %v3888_v16, %v6424_v11  ;;  %v1920_v12 = vsel %vm1904_vm10, %v1903_v51, %v9018_v47  ;;  %v9023_v51 = vld [vmem:[#allocation79_spill] sm:$0xff] }
 0x36b   : > { %4960 = vmatmul.msk.bf16.gmra.mxu1 %vm1956_vm11, %v2663_v3  ;;  %v3914_v20 = vsel %vm1870_vm7, %v3898_v45, %v9019_v9  ;;  %v9020_v3 = vld [vmem:[#allocation10_spill] sm:$0xff] }
 0x36c   : > { %v3209_v11 = vsel %vm820_vm1, %v9021_v52, %v9020_v3  ;;  %v6941_v3 = vpop.f32.mrf.mxu1 }
 0x36d   : > { %v1987_v56 = vpop.f32.mrf.mxu2  ;;  %3827 = vrot.lane.b32.xlu2 %v9016_v37, %s8918_s23  ;;  %3198 = vrot.lane.b32.xlu0 %v9016_v37, %s8928_s18 }
 0x36e   : > { %v6895_v57 = vadd.f32 %v6876_v29, %v1987_v56  ;;  %3846 = vrot.lane.b32.xlu1 %v8974_v6, %s8928_s18  ;;  %v3225_v56 = vsel %vm839_vm2, %v3209_v11, %v9022_v55  ;;  %v9028_v11 = vld [vmem:[#allocation78_spill] sm:$0xff] }
 0x36f   : > { %v6899_v17 = vpop.permute.xlu2 %3150  ;;  %v3241_v16 = vsel %vm858_vm3, %v3225_v56, %v9023_v51 }
 0x370   : > { %v2026_v21 = vmul.f32 %v6895_v57, %v6895_v57  ;;  %v3758_v58 = vpop.permute.xlu1 %3757  ;;  %v1805_v35 = vpop.permute.xlu0 %1804 }
 0x371   : > { %v1937_v15 = vsel %vm1921_vm9, %v1920_v12, %v1805_v35 }
 0x372   : > { %v2041_v39 = vpack.c.bf16 %v2026_v21, %v2025_v5  ;;  %4944 = vmatmul.msk.bf16.gmra.mxu2 %vm1956_vm11, %v1937_v15  ;;  %v9024_v5 = vld [vmem:[#allocation16_spill] sm:$0xff]  ;;  %v9026_v15 = vld [vmem:[#allocation23_spill] sm:$0xff] }
 0x373   : > { %v3930_v21 = vsel %vm1887_vm8, %v3914_v20, %v9024_v5  ;;  %v9029_v5 = vld [vmem:[#allocation17_spill] sm:$0xff] }
 0x374   : > { %4945 = vmatmul.msk.bf16.vlgmr.msrb.gmra.mxu0 %vm820_vm1, %v2041_v39  ;;  %v3946_v35 = vsel %vm1904_vm10, %v3930_v21, %v6454_v60  ;;  %v9025_v39 = vld [vmem:[#allocation15_spill] sm:$0xff]  ;;  %v9027_v60 = vld [vmem:[#allocation13_spill] sm:$0xff] }
 0x375   : > { %v1990_v1 = vpop.f32.mrf.mxu2  ;;  %3747 = vrot.lane.b32.xlu2 %v9016_v37, %s5353_s21  ;;  %3091 = vrot.lane.b32.xlu0 %v9016_v37, %s8934_s25  ;;  %v3257_v37 = vsel %vm889_vm4, %v3241_v16, %v9025_v39  ;;  %v3962_v9 = vsel %vm1921_vm9, %v3946_v35, %v9026_v15 }
 0x376   : > { %3763 = vrot.lane.b32.xlu1 %v8974_v6, %s8934_s25  ;;  %v3273_v6 = vsel %vm1870_vm7, %v3257_v37, %v6517_v26  ;;  %v6944_v52 = vadd.f32 %v6876_v29, %v1990_v1  ;;  %v9030_v37 = vld [vmem:[#allocation6_spill] sm:$0xff] }
 0x377   : > { %v3824_v45 = vpop.permute.xlu2 %3823  ;;  %v3289_v55 = vsel %vm1887_vm8, %v3273_v6, %v9028_v11  ;;  %v3859_v15 = vsel %vm820_vm1, %v9030_v37, %v6488_v38  ;;  %v9031_v6 = vld [vmem:[#allocation81_spill] sm:$0xff]  ;;  %v6985_v38 = vpop.f32.mrf.mxu1 }
 0x378   : > { %v3118_v47 = vpop.permute.xlu1 %3117  ;;  %v3102_v12 = vpop.permute.xlu0 %3101  ;;  %v2027_v1 = vmul.f32 %v6944_v52, %v6944_v52 }
 0x37b   : > { %5017 = vmatmul.msk.bf16.vlgmr.msra.gmra.mxu1 %vm1956_vm11, %v3962_v9  ;;  %v3875_v9 = vsel %vm839_vm2, %v3859_v15, %v3758_v58 }
 0x37d   : > { %v1992_v20 = vpop.f32.mrf.mxu2  ;;  %3077 = vrot.lane.b32.xlu2 %v9027_v60, %s5353_s21  ;;  %3107 = vrot.lane.b32.xlu0 %v6371_v62, %s8927_s22  ;;  %v3305_v62 = vsel %vm1904_vm10, %v3289_v55, %v9029_v5 }
 0x37e   : > { %v6954_v56 = vadd.f32 %v6876_v29, %v1992_v20  ;;  %3123 = vrot.lane.b32.xlu1 %v9027_v60, %s8934_s25  ;;  %v3321_v35 = vsel %vm1921_vm9, %v3305_v62, %v6536_v36  ;;  %v9032_v36 = vld [vmem:[#allocation41_spill] sm:$0xff] }
 0x37f   : > { %v6958_v26 = vpop.permute.xlu2 %3743  ;;  %v3211_v20 = vsel %vm820_vm1, %v9032_v36, %v9017_v53 }
 0x380   : > { %v2028_v51 = vmul.f32 %v6954_v56, %v6954_v56  ;;  %v3792_v16 = vpop.permute.xlu1 %3791  ;;  %v3134_v21 = vpop.permute.xlu0 %3133  ;;  %v3227_v58 = vsel %vm839_vm2, %v3211_v20, %v6868_v43  ;;  %v9033_v43 = vld [vmem:[#allocation80_spill] sm:$0xff] }
 0x381   : > { %v3243_v5 = vsel %vm858_vm3, %v3227_v58, %v3102_v12  ;;  %v7015_v58 = vpop.f32.mrf.mxu1 }
 0x382   : > { %v2042_v39 = vpack.c.bf16 %v2028_v51, %v2027_v1  ;;  %4985 = vmatmul.msk.bf16.vlgmr.msra.gmra.mxu2 %vm1956_vm11, %v3321_v35  ;;  %v3889_v1 = vsel %vm858_vm3, %v3875_v9, %v6815_v30 }
 0x383   : > { %v3900_v35 = vsel %vm889_vm4, %v3889_v1, %v6861_v22 }
 0x384   : > { %4946 = vmatmul.msk.bf16.gmra.mxu0 %vm820_vm1, %v2042_v39  ;;  %v3916_v53 = vsel %vm1870_vm7, %v3900_v35, %v3792_v16  ;;  %v3259_v39 = vsel %vm889_vm4, %v3243_v5, %v3118_v47 }
 0x385   : > { %3781 = vrot.lane.b32.xlu2 %v9031_v6, %s8955_s29  ;;  %3139 = vrot.lane.b32.xlu0 %v9031_v6, %s8926_s19  ;;  %v3275_v37 = vsel %vm1870_vm7, %v3259_v39, %v3134_v21 }
 0x386   : > { %3797 = vrot.lane.b32.xlu1 %v8985_v4, %s8927_s22  ;;  %v3291_v47 = vsel %vm1887_vm8, %v3275_v37, %v6899_v17 }
 0x387   : > { %v1995_v11 = vpop.f32.mrf.mxu2  ;;  %v6983_v55 = vpop.permute.xlu2 %3073 }
 0x388   : > { %v3167_v51 = vpop.permute.xlu1 %3166  ;;  %v3808_v62 = vpop.permute.xlu0 %3807  ;;  %v7003_v12 = vadd.f32 %v6876_v29, %v1995_v11 }
 0x389   : > { %v3932_v15 = vsel %vm1887_vm8, %v3916_v53, %v3808_v62  ;;  %v3307_v36 = vsel %vm1904_vm10, %v3291_v47, %v3167_v51  ;;  %v9034_v51 = vld [vmem:[#allocation82_spill] sm:$0xff] }
 0x38a   : > { %v3948_v6 = vsel %vm1904_vm10, %v3932_v15, %v3824_v45  ;;  %v2029_v1 = vmul.f32 %v7003_v12, %v7003_v12  ;;  %v9035_v47 = vld [vmem:[#allocation18_spill] sm:$0xff] }
 0x38d   : > { %3156 = vrot.lane.b32.xlu2 %v9033_v43, %s8951_s26  ;;  %3813 = vrot.lane.b32.xlu0 %v9027_v60, %s8951_s26 }
 0x38e   : > { %3172 = vrot.lane.b32.xlu1 %v9027_v60, %s8918_s23 }
 0x38f   : > { %v1997_v22 = vpop.f32.mrf.mxu2  ;;  %v3778_v16 = vpop.permute.xlu2 %3777 }
 0x390   : > { %v7010_v21 = vadd.f32 %v6876_v29, %v1997_v22  ;;  %v3843_v9 = vpop.permute.xlu1 %3842  ;;  %v3195_v11 = vpop.permute.xlu0 %3194 }
 0x391   : > { %v3964_v20 = vsel %vm1921_vm9, %v3948_v6, %v3843_v9  ;;  %v3323_v17 = vsel %vm1921_vm9, %v3307_v36, %v3195_v11 }
 0x392   : > { %v2030_v5 = vmul.f32 %v7010_v21, %v7010_v21  ;;  %5018 = vmatmul.msk.bf16.gmra.mxu1 %vm1956_vm11, %v3964_v20  ;;  %4986 = vmatmul.msk.bf16.gmra.mxu2 %vm1956_vm11, %v3323_v17 }
 0x394   : > { %v2043_v45 = vpack.c.bf16 %v2030_v5, %v2029_v1  ;;  %v7066_v5 = vpop.f32.mrf.mxu1 }
 0x395   : > { %3829 = vrot.lane.b32.xlu2 %v9034_v51, %s8918_s23  ;;  %3200 = vrot.lane.b32.xlu0 %v9034_v51, %s8928_s18 }
 0x396   : > { %3848 = vrot.lane.b32.xlu1 %v8985_v4, %s8928_s18  ;;  %4947 = vmatmul.msk.bf16.gmra.mxu0 %vm820_vm1, %v2043_v45 }
 0x397   : > { %v3153_v62 = vpop.permute.xlu2 %3152 }
 0x398   : > { %v3760_v35 = vpop.permute.xlu1 %3759  ;;  %v3088_v53 = vpop.permute.xlu0 %3087 }
 0x39d   : > { %3749 = vrot.lane.b32.xlu2 %v9034_v51, %s5353_s21  ;;  %3093 = vrot.lane.b32.xlu0 %v9034_v51, %s8934_s25 }
 0x39e   : > { %3765 = vrot.lane.b32.xlu1 %v8985_v4, %s8934_s25  ;;  %v3861_v4 = vsel %vm820_vm1, %v5712_v14, %v6958_v26  ;;  %v3213_v14 = vsel %vm820_vm1, %v8967_v7, %v6815_v30 }
 0x39f   : > { %v3826_v39 = vpop.permute.xlu2 %3825  ;;  %v3877_v11 = vsel %vm839_vm2, %v3861_v4, %v3760_v35  ;;  %v3229_v45 = vsel %vm839_vm2, %v3213_v14, %v3088_v53 }
 0x3a0   : > { %v3120_v37 = vpop.permute.xlu1 %3119  ;;  %v3104_v15 = vpop.permute.xlu0 %3103  ;;  %v3890_v17 = vsel %vm858_vm3, %v3877_v11, %v6983_v55 }
 0x3a1   : > { %v3902_v30 = vsel %vm889_vm4, %v3890_v17, %v3778_v16  ;;  %v9036_v16 = vld [vmem:[#allocation52_spill] sm:$0xff] }
 0x3a5   : > { %v2000_v22 = vpop.f32.mrf.mxu2  ;;  %3079 = vrot.lane.b32.xlu2 %v9035_v47, %s5353_s21  ;;  %3109 = vrot.lane.b32.xlu0 %v6429_v34, %s8927_s22 }
 0x3a6   : > { %3125 = vrot.lane.b32.xlu1 %v9035_v47, %s8934_s25  ;;  %v7049_v20 = vadd.f32 %v6876_v29, %v2000_v22  ;;  %v3245_v22 = vsel %vm858_vm3, %v3229_v45, %v3104_v15 }
 0x3a7   : > { %v7043_v9 = vpop.permute.xlu2 %3745  ;;  %v3261_v54 = vsel %vm889_vm4, %v3245_v22, %v3120_v37 }
 0x3a8   : > { %v3794_v6 = vpop.permute.xlu1 %3793  ;;  %v3136_v36 = vpop.permute.xlu0 %3135 }
 0x3a9   : > { %v3277_v53 = vsel %vm1870_vm7, %v3261_v54, %v3136_v36 }
 0x3aa   : > { %v3293_v37 = vsel %vm1887_vm8, %v3277_v53, %v3153_v62 }
 0x3ad   : > { %v2002_v1 = vpop.f32.mrf.mxu2  ;;  %3783 = vrot.lane.b32.xlu2 %v6475_v41, %s8955_s29  ;;  %3141 = vrot.lane.b32.xlu0 %v6475_v41, %s8926_s19  ;;  %v2031_v41 = vmul.f32 %v7049_v20, %v7049_v20 }
 0x3ae   : > { %v7057_v34 = vadd.f32 %v6876_v29, %v2002_v1  ;;  %3799 = vrot.lane.b32.xlu1 %v8994_v2, %s8927_s22  ;;  %v3918_v1 = vsel %vm1870_vm7, %v3902_v30, %v3794_v6 }
 0x3af   : > { %v7064_v26 = vpop.permute.xlu2 %3075 }
 0x3b0   : > { %v2032_v51 = vmul.f32 %v7057_v34, %v7057_v34  ;;  %v3169_v35 = vpop.permute.xlu1 %3168  ;;  %v3810_v4 = vpop.permute.xlu0 %3809 }
 0x3b1   : > { %v3934_v11 = vsel %vm1887_vm8, %v3918_v1, %v3810_v4  ;;  %v3309_v36 = vsel %vm1904_vm10, %v3293_v37, %v3169_v35 }
 0x3b2   : > { %v2044_v7 = vpack.c.bf16 %v2032_v51, %v2031_v41  ;;  %v3950_v54 = vsel %vm1904_vm10, %v3934_v11, %v3826_v39  ;;  %v7093_v41 = vpop.f32.mrf.mxu1 }
 0x3b4   : > { %4948 = vmatmul.msk.bf16.vlgmr.msra.gmra.mxu3 %vm820_vm1, %v2044_v7 }
 0x3b5   : > { %v2005_v14 = vpop.f32.mrf.mxu2  ;;  %3158 = vrot.lane.b32.xlu2 %v6459_v49, %s8951_s26  ;;  %3815 = vrot.lane.b32.xlu0 %v9035_v47, %s8951_s26 }
 0x3b6   : > { %3174 = vrot.lane.b32.xlu1 %v9035_v47, %s8918_s23  ;;  %4097 = vmatpush.bf16.msra.mxu3 %v9036_v16  ;;  %v7099_v22 = vadd.f32 %v6876_v29, %v2005_v14 }
 0x3b7   : > { %v3780_v15 = vpop.permute.xlu2 %3779 }
 0x3b8   : > { %v3845_v6 = vpop.permute.xlu1 %3844  ;;  %v3197_v45 = vpop.permute.xlu0 %3196  ;;  %v2033_v4 = vmul.f32 %v7099_v22, %v7099_v22 }
 0x3b9   : > { %v3966_v17 = vsel %vm1921_vm9, %v3950_v54, %v3845_v6  ;;  %v3325_v51 = vsel %vm1921_vm9, %v3309_v36, %v3197_v45  ;;  %v9037_v54 = vld [vmem:[#allocation24_spill] sm:$0xff] }
 0x3ba   : > { %5019 = vmatmul.msk.bf16.gmra.mxu1 %vm1956_vm11, %v3966_v17  ;;  %4987 = vmatmul.msk.bf16.gmra.mxu2 %vm1956_vm11, %v3325_v51  ;;  %v7114_v11 = vpop.f32.mrf.mxu1 }
 0x3bd   : > { %v2007_v62 = vpop.f32.mrf.mxu2  ;;  %3831 = vrot.lane.b32.xlu2 %v6506_v18, %s8918_s23  ;;  %3202 = vrot.lane.b32.xlu0 %v6506_v18, %s8928_s18 }
 0x3be   : > { %v7106_v39 = vadd.f32 %v6876_v29, %v2007_v62  ;;  %3850 = vrot.lane.b32.xlu1 %v8994_v2, %s8928_s18 }
 0x3bf   : > { %v3155_v35 = vpop.permute.xlu2 %3154 }
 0x3c0   : > { %v2034_v7 = vmul.f32 %v7106_v39, %v7106_v39  ;;  %v3762_v30 = vpop.permute.xlu1 %3761  ;;  %v3090_v1 = vpop.permute.xlu0 %3089 }
 0x3c2   : > { %v2045_v53 = vpack.c.bf16 %v2034_v7, %v2033_v4  ;;  %v7127_v36 = vpop.f32.mrf.mxu1  ;;  %v3863_v7 = vsel %vm820_vm1, %v8977_v44, %v7043_v9 }
 0x3c4   : > { %4949 = vmatmul.msk.bf16.gmra.mxu3 %vm820_vm1, %v2045_v53 }
 0x3c5   : > { %3751 = vrot.lane.b32.xlu2 %v6506_v18, %s5353_s21  ;;  %3095 = vrot.lane.b32.xlu0 %v6506_v18, %s8934_s25 }
 0x3c6   : > { %3767 = vrot.lane.b32.xlu1 %v8994_v2, %s8934_s25 }
 0x3c7   : > { %v2010_v14 = vpop.f32.mrf.mxu2  ;;  %v3828_v16 = vpop.permute.xlu2 %3827 }
 0x3c8   : > { %v3122_v37 = vpop.permute.xlu1 %3121  ;;  %v3106_v6 = vpop.permute.xlu0 %3105  ;;  %v7130_v17 = vadd.f32 %v6876_v29, %v2010_v14  ;;  %v3879_v14 = vsel %vm839_vm2, %v3863_v7, %v3762_v30 }
 0x3c9   : > { %v3891_v44 = vsel %vm858_vm3, %v3879_v14, %v7064_v26 }
 0x3ca   : > { %9038 = vst [vmem:[#allocation63_spill] sm:$0xff] %v7130_v17  ;;  %v2035_v4 = vmul.f32 %v7130_v17, %v7130_v17  ;;  %v3904_v7 = vsel %vm889_vm4, %v3891_v44, %v3780_v15 }
 0x3cd   : > { %3081 = vrot.lane.b32.xlu2 %v9037_v54, %s5353_s21  ;;  %3111 = vrot.lane.b32.xlu0 %v6452_v8, %s8927_s22 }
 0x3ce   : > { %3127 = vrot.lane.b32.xlu1 %v9037_v54, %s8934_s25 }
 0x3cf   : > { %v2012_v18 = vpop.f32.mrf.mxu2  ;;  %v7134_v2 = vpop.permute.xlu2 %3747 }
 0x3d0   : > { %v7137_v45 = vadd.f32 %v6876_v29, %v2012_v18  ;;  %v3796_v51 = vpop.permute.xlu1 %3795  ;;  %v3138_v62 = vpop.permute.xlu0 %3137  ;;  %v3215_v18 = vsel %vm820_vm1, %v6269_v19, %v6983_v55 }
 0x3d1   : > { %v3231_v9 = vsel %vm839_vm2, %v3215_v18, %v3090_v1 }
 0x3d2   : > { %9039 = vst [vmem:[#allocation22_spill] sm:$0xff] %v7137_v45  ;;  %v2036_v8 = vmul.f32 %v7137_v45, %v7137_v45 }
 0x3d4   : > { %v2046_v53 = vpack.c.bf16 %v2036_v8, %v2035_v4  ;;  %v7162_v4 = vpop.f32.mrf.mxu1 }
 0x3d5   : > { %3785 = vrot.lane.b32.xlu2 %v6501_v25, %s8955_s29  ;;  %3143 = vrot.lane.b32.xlu0 %v6501_v25, %s8926_s19  ;;  %v3247_v25 = vsel %vm858_vm3, %v3231_v9, %v3106_v6 }
 0x3d6   : > { %3801 = vrot.lane.b32.xlu1 %v9006_v32, %s8927_s22  ;;  %4950 = vmatmul.msk.bf16.gmra.mxu3 %vm820_vm1, %v2046_v53  ;;  %v3920_v53 = vsel %vm1870_vm7, %v3904_v7, %v3796_v51  ;;  %v3263_v13 = vsel %vm889_vm4, %v3247_v25, %v3122_v37 }
 0x3d7   : > { %v7157_v48 = vpop.permute.xlu2 %3077  ;;  %v3279_v19 = vsel %vm1870_vm7, %v3263_v13, %v3138_v62 }
 0x3d8   : > { %v3171_v30 = vpop.permute.xlu1 %3170  ;;  %v3812_v8 = vpop.permute.xlu0 %3811  ;;  %v3295_v15 = vsel %vm1887_vm8, %v3279_v19, %v3155_v35  ;;  %v7214_v19 = vld [vmem:[%s8778_s6] ss:$0 sm:$0xff] }
 0x3d9   : > { %v3936_v55 = vsel %vm1887_vm8, %v3920_v53, %v3812_v8  ;;  %v3311_v13 = vsel %vm1904_vm10, %v3295_v15, %v3171_v30 }
 0x3da   : > { %v3952_v37 = vsel %vm1904_vm10, %v3936_v55, %v3828_v16 }
 0x3dc   : > { %v7184_v18 = vpop.f32.mrf.mxu1 }
 0x3dd   : > { %3160 = vrot.lane.b32.xlu2 %v6486_v31, %s8951_s26  ;;  %3817 = vrot.lane.b32.xlu0 %v9037_v54, %s8951_s26 }
 0x3de   : > { %3176 = vrot.lane.b32.xlu1 %v9037_v54, %s8918_s23 }
 0x3df   : > { %v7176_v1 = vpop.permute.xlu2 %3781 }
 0x3e0   : > { %v3847_v6 = vpop.permute.xlu1 %3846  ;;  %v3199_v62 = vpop.permute.xlu0 %3198 }
 0x3e1   : > { %v3968_v51 = vsel %vm1921_vm9, %v3952_v37, %v3847_v6  ;;  %v3327_v14 = vsel %vm1921_vm9, %v3311_v13, %v3199_v62  ;;  %v9042_v62 = vld [vmem:[#allocation35_spill] sm:$0xff] }
 0x3e2   : > { %5020 = vmatmul.msk.bf16.gmra.mxu1 %vm1956_vm11, %v3968_v51  ;;  %4988 = vmatmul.msk.bf16.gmra.mxu2 %vm1956_vm11, %v3327_v14 }
 0x3e4   : > { %v7195_v30 = vpop.f32.mrf.mxu1 }
 0x3e5   : > { %v2015_v44 = vpop.f32.mrf.mxu2  ;;  %3833 = vrot.lane.b32.xlu2 %v6522_v63, %s8918_s23  ;;  %3204 = vrot.lane.b32.xlu0 %v6522_v63, %s8928_s18 }
 0x3e6   : > { %3852 = vrot.lane.b32.xlu1 %v9006_v32, %s8928_s18  ;;  %v7198_v25 = vadd.f32 %v6876_v29, %v2015_v44 }
 0x3e7   : > { %v7193_v35 = vpop.permute.xlu2 %3156 }
 0x3e8   : > { %v3764_v16 = vpop.permute.xlu1 %3763  ;;  %v3092_v9 = vpop.permute.xlu0 %3091  ;;  %9040 = vst [vmem:[#allocation58_spill] sm:$0xff] %v7198_v25  ;;  %v2037_v55 = vmul.f32 %v7198_v25, %v7198_v25 }
 0x3ed   : > { %v2017_v8 = vpop.f32.mrf.mxu2  ;;  %3753 = vrot.lane.b32.xlu2 %v6522_v63, %s5353_s21  ;;  %3097 = vrot.lane.b32.xlu0 %v6522_v63, %s8934_s25 }
 0x3ee   : > { %v7205_v7 = vadd.f32 %v6876_v29, %v2017_v8  ;;  %3769 = vrot.lane.b32.xlu1 %v9006_v32, %s8934_s25  ;;  %v7224_v32 = vpop.f32.mrf.mxu1 }
 0x3ef   : > { %v7209_v53 = vpop.permute.xlu2 %3829 }
 0x3f0   : > { %9041 = vst [vmem:[#allocation27_spill] sm:$0xff] %v7205_v7  ;;  %v2038_v15 = vmul.f32 %v7205_v7, %v7205_v7  ;;  %v3124_v63 = vpop.permute.xlu1 %3123  ;;  %v3108_v6 = vpop.permute.xlu0 %3107  ;;  %v3865_v7 = vsel %vm820_vm1, %v8998_v10, %v7134_v2 }
 0x3f1   : > { %v2088_v37 = vpop.f32.mrf.mxu0 }
 0x3f2   : > { %v2047_v13 = vpack.c.bf16 %v2038_v15, %v2037_v55  ;;  %v7221_v51 = vadd.f32 %v7214_v19, %v2088_v37 }
 0x3f4   : > { %4951 = vmatmul.msk.bf16.gmra.mxu3 %vm820_vm1, %v2047_v13  ;;  %5162 = vrsqrt.f32 %v7221_v51  ;;  %vm2135_vm12 = vcmp.eq.f32.partialorder %v7221_v51, inf  ;;  %vm2137_vm13 = vcmp.eq.f32.partialorder %v7221_v51, 0.0 }
 0x3f5   : > { %3113 = vrot.lane.b32.xlu2 %v6569_v27, %s8927_s22  ;;  %3771 = vrot.lane.b32.xlu0 %v9042_v62, %s5353_s21  ;;  %v2020_v14 = vpop.f32.mrf.mxu2  ;;  %v1226_v27 = vsel %vm6007_vm5, 0, %v6494_v61  ;;  %s333_s21 = sand.u32 1, %s5326_s30  }
 0x3f6   : > { %3129 = vrot.lane.b32.xlu1 %v9042_v62, %s8934_s25  ;;  %v3881_v62 = vsel %vm839_vm2, %v3865_v7, %v3764_v16  ;;  %v7247_v25 = vadd.f32 %v6876_v29, %v2020_v14  ;;  %v3183_v10 = vshll.u32 %v1226_v27, 16  ;;  %v7256_v2 = vpop.f32.mrf.mxu1  ;;  %v3217_v16 = vsel %vm820_vm1, %v9009_v50, %v7064_v26  ;;  %s4754_s30 = sshll.u32 %s333_s21, 9  ;;  %s5086_s25 = sshll.u32 (%p5460_p5), %s5334_s11, 4 }
 0x3f7   : > { %v7233_v44 = vpop.permute.xlu2 %3749 }
 0x3f8   : > { %v3798_v8 = vpop.permute.xlu1 %3797  ;;  %v3140_v55 = vpop.permute.xlu0 %3139  ;;  %9043 = vst [vmem:[#allocation46_spill] sm:$0xff] %v7247_v25  ;;  %v2039_v31 = vmul.f32 %v7247_v25, %v7247_v25  ;;  %v3185_v17 = vrot.slane %v3183_v10, 1  ;;  %v3181_v25 = vshrl.u32 %v1226_v27, 16 }
 0x3f9   : > { %v2090_v15 = vpop.f32.mrf.mxu0 }
 0x3fa   : > { %v5163_v37 = vpop.eup %5162  ;;  %v7236_v13 = vadd.f32 %v7214_v19, %v2090_v15  ;;  %v9044_v15 = vld [vmem:[#allocation40_spill] sm:$0xff] }
 0x3fb   : > { %v2129_v59 = vmul.f32 %v5163_v37, %v7221_v51 }
 0x3fc   : > { %5164 = vrsqrt.f32 %v7236_v13  ;;  %vm2147_vm14 = vcmp.eq.f32.partialorder %v7236_v13, inf }
 0x3fd   : > { %3787 = vrot.lane.b32.xlu2 %v6612_v42, %s8955_s29  ;;  %3145 = vrot.lane.b32.xlu0 %v6612_v42, %s8926_s19  ;;  %v2130_v33 = vmul.f32 %v5163_v37, %v2129_v59  ;;  %v2022_v61 = vpop.f32.mrf.mxu2  ;;  %v3892_v42 = vsel %vm858_vm3, %v3881_v62, %v7157_v48  ;;  %v3233_v59 = vsel %vm839_vm2, %v3217_v16, %v3092_v9 }
 0x3fe   : > { %3803 = vrot.lane.b32.xlu1 %v9044_v15, %s8927_s22  ;;  %v7262_v7 = vadd.f32 %v6876_v29, %v2022_v61  ;;  %v3249_v15 = vsel %vm858_vm3, %v3233_v59, %v3108_v6  ;;  %v3906_v62 = vsel %vm889_vm4, %v3892_v42, %v7176_v1 }
 0x3ff   : > { %v7264_v14 = vpop.permute.xlu2 %3079  ;;  %v2131_v46 = vmul.f32 0.5, %v2130_v33  ;;  %v3922_v6 = vsel %vm1870_vm7, %v3906_v62, %v3798_v8  ;;  %v3265_v59 = vsel %vm889_vm4, %v3249_v15, %v3124_v63  ;;  %v9047_v63 = vld [vmem:[#allocation28_spill] sm:$0xff] }
 0x400   : > { %9045 = vst [vmem:[#allocation66_spill] sm:$0xff] %v7262_v7  ;;  %v3173_v45 = vpop.permute.xlu1 %3172  ;;  %v2040_v50 = vmul.f32 %v7262_v7, %v7262_v7  ;;  %v3814_v26 = vpop.permute.xlu0 %3813 }
 0x401   : > { %v2132_v61 = vsub.f32 1.5, %v2131_v46  ;;  %v2093_v54 = vpop.f32.mrf.mxu0  ;;  %v3281_v46 = vsel %vm1870_vm7, %v3265_v59, %v3140_v55  ;;  %v3938_v10 = vsel %vm1887_vm8, %v3922_v6, %v3814_v26  ;;  %v3186_v55 = vor.u32 %v3185_v17, %v3181_v25 }
 0x402   : > { %v5165_v28 = vpop.eup %5164  ;;  %v7277_v9 = vadd.f32 %v7214_v19, %v2093_v54  ;;  %v2048_v33 = vpack.c.bf16 %v2040_v50, %v2039_v31  ;;  %v9046_v31 = vld [vmem:[#allocation73_spill] sm:$0xff]  ;;  %v3297_v17 = vsel %vm1887_vm8, %v3281_v46, %v7193_v35  ;;  %v3954_v26 = vsel %vm1904_vm10, %v3938_v10, %v7209_v53 }
 0x403   : > { %v2133_v16 = vmul.f32 %v5163_v37, %v2132_v61  ;;  %v2141_v7 = vmul.f32 %v5165_v28, %v7236_v13  ;;  %v3188_v54 = vshll.u32 %v9046_v31, 16  ;;  %v7309_v61 = vpop.f32.mrf.mxu1  ;;  %v7318_v53 = vadd.f32 %v6876_v29, %v7184_v18  ;;  %v9048_v18 = vld [vmem:[#allocation5_spill] sm:$0xff] }
 0x404   : > { %5166 = vrsqrt.f32 %v7277_v9  ;;  %4952 = vmatmul.msk.bf16.gmra.mxu3 %vm820_vm1, %v2048_v33  ;;  %v3313_v33 = vsel %vm1904_vm10, %v3297_v17, %v3173_v45  ;;  %vm2159_vm15 = vcmp.eq.f32.partialorder %v7277_v9, inf  ;;  %vm2161_vm5 = vcmp.eq.f32.partialorder %v7277_v9, 0.0 }
 0x405   : > { %3162 = vrot.lane.b32.xlu2 %v1226_v27, %s8951_s26  ;;  %v2134_v1 = vmul.f32 %v2133_v16, %v7221_v51  ;;  %v2142_v8 = vmul.f32 %v5165_v28, %v2141_v7  ;;  %v3361_v37 = vpop.f32.mrf.mxu2  ;;  %3819 = vrot.lane.b32.xlu0 %v9047_v63, %s8951_s26  ;;  %v2138_v27 = vand.u32 2147483648, %v7221_v51  ;;  %v7303_v7 = vld [vmem:[%s8780_s8] ss:$0 sm:$0xff]  ;;  %v3190_v6 = vrot.slane %v3188_v54, 1  ;;  %s5052_s26 = sshll.u32 (%p5460_p5), %s5338_s12, 7 }
 0x406   : > { %3178 = vrot.lane.b32.xlu1 %v9047_v63, %s8918_s23  ;;  %v7329_v63 = vadd.f32 %v6876_v29, %v7162_v4  ;;  %v2730_v4 = vmul.f32 %v7318_v53, %v7318_v53  ;;  %s4390_s29 = sadd.s32 (%p5460_p5), %s5086_s25, %s5052_s26 }
 0x407   : > { %v7297_v42 = vpop.permute.xlu2 %3783  ;;  %v2136_v15 = vsel %vm2135_vm12, %v7221_v51, %v2134_v1  ;;  %v2143_v50 = vmul.f32 0.5, %v2142_v8  ;;  %v3191_v8 = vsel %vm477_vm0, %v3186_v55, %v3190_v6  ;;  %s5053_s27 = sshll.u32 (%p5460_p5), %s4390_s29, 3 }
 0x408   : > { %v3849_v25 = vpop.permute.xlu1 %3848  ;;  %v2139_v62 = vsel %vm2137_vm13, %v2138_v27, %v2136_v15  ;;  %v3201_v16 = vpop.permute.xlu0 %3200  ;;  %v7332_v27 = vadd.f32 %v6876_v29, %v3361_v37  ;;  %v9049_v15 = vld [vmem:[#allocation29_spill] sm:$0xff]  ;;  %v2150_v37 = vand.u32 2147483648, %v7236_v13  ;;  %s8623_s16 = scalar_lea.vmem (%p5460_p5), %s8781_s9, %s5053_s27 }
 0x409   : > { %v3970_v51 = vsel %vm1921_vm9, %v3954_v26, %v3849_v25  ;;  %v2320_v59 = vmul.f32 %v2139_v62, %v6883_v40  ;;  %v2144_v31 = vsub.f32 1.5, %v2143_v50  ;;  %v3329_v1 = vsel %vm1921_vm9, %v3313_v33, %v3201_v16  ;;  %v2095_v35 = vpop.f32.mrf.mxu0 }
 0x40a   : > { %5021 = vmatmul.msk.bf16.gmra.mxu1 %vm1956_vm11, %v3970_v51  ;;  %v5167_v46 = vpop.eup %5166  ;;  %v7321_v45 = vadd.f32 %v7214_v19, %v2095_v35  ;;  %4989 = vmatmul.msk.bf16.gmra.mxu2 %vm1956_vm11, %v3329_v1  ;;  %v3839_v50 = vsel %vm477_vm0, %v9049_v15, %v9048_v18  ;;  %vm2149_vm0 = vcmp.eq.f32.partialorder %v7236_v13, 0.0  ;;  %v2729_v16 = vmul.f32 %v7329_v63, %v7329_v63 }
 0x40b   : > { %v2339_v10 = vadd.f32 %v7303_v7, %v2320_v59  ;;  %v2145_v54 = vmul.f32 %v5165_v28, %v2144_v31  ;;  %v2153_v40 = vmul.f32 %v5167_v46, %v7277_v9  ;;  %v7362_v6 = vpop.f32.mrf.mxu1  ;;  %v3401_v31 = vmul.f32 %v7332_v27, %v7332_v27 }
 0x40c   : > { %5168 = vrsqrt.f32 %v7321_v45  ;;  %vm2171_vm6 = vcmp.eq.f32.partialorder %v7321_v45, inf  ;;  %vm2173_vm12 = vcmp.eq.f32.partialorder %v7321_v45, 0.0 }
 0x40d   : > { %3835 = vrot.lane.b32.xlu2 %v3191_v8, %s8918_s23  ;;  %v2355_v28 = vadd.f32 %v2339_v10, %v6833_v23  ;;  %v2146_v17 = vmul.f32 %v2145_v54, %v7236_v13  ;;  %v2154_v55 = vmul.f32 %v5167_v46, %v2153_v40  ;;  %v3363_v25 = vpop.f32.mrf.mxu2  ;;  %3206 = vrot.lane.b32.xlu0 %v3191_v8, %s8928_s18  ;;  %s7350_s23 = scalar_lea.vmem [#allocation2], %s4754_s30 }
 0x40e   : > { %3854 = vrot.lane.b32.xlu1 %v3839_v50, %s8928_s18  ;;  %v7348_v26 = vadd.f32 %v6876_v29, %v3363_v25  ;;  %v2745_v40 = vpack.c.bf16 %v2730_v4, %v2729_v16 }
 0x40f   : > { %2371 = vst.msk [vmem:[%s7350_s23] sm:$0xff] %vm820_vm1, %v2355_v28  ;;  %v2148_v23 = vsel %vm2147_vm14, %v7236_v13, %v2146_v17  ;;  %v2155_v62 = vmul.f32 0.5, %v2154_v55  ;;  %v7356_v33 = vpop.permute.xlu2 %3158 }
 0x410   : > { %v7358_v51 = vpop.permute.xlu1 %3765  ;;  %v2151_v59 = vsel %vm2149_vm0, %v2150_v37, %v2148_v23  ;;  %v3402_v1 = vmul.f32 %v7348_v26, %v7348_v26  ;;  %v7368_v35 = vpop.permute.xlu0 %3093 }
 0x411   : > { %v2321_v13 = vmul.f32 %v2151_v59, %v6895_v57  ;;  %v2156_v10 = vsub.f32 1.5, %v2155_v62  ;;  %v7391_v59 = vadd.f32 %v6876_v29, %v7224_v32 }
 0x412   : > { %v5169_v54 = vpop.eup %5168  ;;  %v3417_v8 = vpack.c.bf16 %v3402_v1, %v3401_v31 }
 0x413   : > { %v2098_v18 = vpop.f32.mrf.mxu0  ;;  %v2340_v15 = vadd.f32 %v7303_v7, %v2321_v13  ;;  %v2157_v50 = vmul.f32 %v5167_v46, %v2156_v10  ;;  %v2165_v28 = vmul.f32 %v5169_v54, %v7321_v45  ;;  %v2162_v46 = vand.u32 2147483648, %v7277_v9  ;;  %9050 = vst [vmem:[#allocation39_spill] sm:$0xff] %v7391_v59  ;;  %v7396_v10 = vpop.f32.mrf.mxu1 }
 0x414   : > { %v7374_v17 = vadd.f32 %v7214_v19, %v2098_v18  ;;  %4961 = vmatmul.msk.bf16.vlgmr.msrb.gmra.mxu3 %vm820_vm1, %v2745_v40  ;;  %4993 = vmatmul.msk.bf16.vlgmr.msra.gmra.mxu0 %vm820_vm1, %v3417_v8 }
 0x415   : > { %v2356_v57 = vadd.f32 %v2340_v15, %v6865_v24  ;;  %v2158_v55 = vmul.f32 %v2157_v50, %v7277_v9  ;;  %v2166_v25 = vmul.f32 %v5169_v54, %v2165_v28  ;;  %v3366_v4 = vpop.f32.mrf.mxu2  ;;  %v2732_v28 = vmul.f32 %v7391_v59, %v7391_v59 }
 0x416   : > { %5170 = vrsqrt.f32 %v7374_v17  ;;  %v7408_v50 = vadd.f32 %v6876_v29, %v3366_v4  ;;  %vm2183_vm13 = vcmp.eq.f32.partialorder %v7374_v17, inf  ;;  %vm2185_vm14 = vcmp.eq.f32.partialorder %v7374_v17, 0.0 }
 0x417   : > { %2372 = vst.msk [vmem:[%s7350_s23 + $0x8] sm:$0xff] %vm820_vm1, %v2356_v57  ;;  %v2160_v37 = vsel %vm2159_vm15, %v7277_v9, %v2158_v55  ;;  %v2167_v23 = vmul.f32 0.5, %v2166_v25  ;;  %v7394_v13 = vpop.permute.xlu2 %3831  ;;  %v7400_v9 = vadd.f32 %v6876_v29, %v7195_v30 }
 0x418   : > { %v7387_v62 = vpop.permute.xlu1 %3125  ;;  %v2163_v24 = vsel %vm2161_vm5, %v2162_v46, %v2160_v37  ;;  %v3110_v16 = vpop.permute.xlu0 %3109 }
 0x419   : > { %v2322_v31 = vmul.f32 %v2163_v24, %v6944_v52  ;;  %v2168_v1 = vsub.f32 1.5, %v2167_v23  ;;  %v2731_v4 = vmul.f32 %v7400_v9, %v7400_v9 }
 0x41b   : > { %v2100_v40 = vpop.f32.mrf.mxu0  ;;  %v2341_v18 = vadd.f32 %v7303_v7, %v2322_v31  ;;  %v2169_v15 = vmul.f32 %v5169_v54, %v2168_v1  ;;  %v2174_v54 = vand.u32 2147483648, %v7321_v45  ;;  %v3403_v31 = vmul.f32 %v7408_v50, %v7408_v50 }
 0x41c   : > { %v5171_v8 = vpop.eup %5170  ;;  %v7404_v32 = vadd.f32 %v7214_v19, %v2100_v40 }
 0x41d   : > { %v2177_v52 = vmul.f32 %v5171_v8, %v7374_v17  ;;  %v2357_v57 = vadd.f32 %v2341_v18, %v6911_v0  ;;  %v2170_v30 = vmul.f32 %v2169_v15, %v7321_v45  ;;  %v3368_v55 = vpop.f32.mrf.mxu2  ;;  %v7431_v15 = vpop.f32.mrf.mxu1 }
 0x41e   : > { %5172 = vrsqrt.f32 %v7404_v32  ;;  %v7418_v46 = vadd.f32 %v6876_v29, %v3368_v55  ;;  %vm2195_vm0 = vcmp.eq.f32.partialorder %v7404_v32, inf  ;;  %vm2197_vm15 = vcmp.eq.f32.partialorder %v7404_v32, 0.0 }
 0x41f   : > { %v2178_v25 = vmul.f32 %v5171_v8, %v2177_v52  ;;  %2373 = vst.msk [vmem:[%s7350_s23 + $0x10] sm:$0xff] %vm820_vm1, %v2357_v57  ;;  %v2172_v0 = vsel %vm2171_vm6, %v7321_v45, %v2170_v30  ;;  %v2746_v30 = vpack.c.bf16 %v2732_v28, %v2731_v4  ;;  %v3867_v45 = vsel %vm820_vm1, %v9027_v60, %v7233_v44 }
 0x420   : > { %v3800_v37 = vpop.permute.xlu1 %3799  ;;  %v2175_v23 = vsel %vm2173_vm12, %v2174_v54, %v2172_v0  ;;  %v3404_v1 = vmul.f32 %v7418_v46, %v7418_v46  ;;  %v3142_v40 = vpop.permute.xlu0 %3141  ;;  %v3883_v0 = vsel %vm839_vm2, %v3867_v45, %v7358_v51  ;;  %v3219_v60 = vsel %vm820_vm1, %v9033_v43, %v7157_v48 }
 0x421   : > { %v2179_v24 = vmul.f32 0.5, %v2178_v25  ;;  %v2323_v18 = vmul.f32 %v2175_v23, %v6954_v56  ;;  %v7437_v25 = vpop.permute.xlu2 %3751  ;;  %v3893_v51 = vsel %vm858_vm3, %v3883_v0, %v7264_v14  ;;  %v2186_v23 = vand.u32 2147483648, %v7374_v17 }
 0x422   : > { %v3418_v57 = vpack.c.bf16 %v3404_v1, %v3403_v31  ;;  %v7462_v31 = vadd.f32 %v6876_v29, %v7256_v2 }
 0x423   : > { %v2180_v52 = vsub.f32 1.5, %v2179_v24  ;;  %v2342_v54 = vadd.f32 %v7303_v7, %v2323_v18 }
 0x424   : > { %v5173_v55 = vpop.eup %5172  ;;  %4962 = vmatmul.msk.bf16.gmra.mxu3 %vm820_vm1, %v2746_v30  ;;  %4994 = vmatmul.msk.bf16.gmra.mxu0 %vm820_vm1, %v3418_v57  ;;  %v3908_v57 = vsel %vm889_vm4, %v3893_v51, %v7297_v42  ;;  %v2733_v42 = vmul.f32 %v7462_v31, %v7462_v31 }
 0x425   : > { %v2181_v59 = vmul.f32 %v5171_v8, %v2180_v52  ;;  %v2189_v56 = vmul.f32 %v5173_v55, %v7404_v32  ;;  %v2358_v28 = vadd.f32 %v2342_v54, %v6941_v3  ;;  %v3235_v8 = vsel %vm839_vm2, %v3219_v60, %v7368_v35  ;;  %v7474_v30 = vpop.f32.mrf.mxu1 }
 0x426   : > { %v3251_v48 = vsel %vm858_vm3, %v3235_v8, %v3110_v16  ;;  %v7466_v35 = vadd.f32 %v6876_v29, %v7309_v61 }
 0x427   : > { %v2182_v44 = vmul.f32 %v2181_v59, %v7374_v17  ;;  %v2190_v4 = vmul.f32 %v5173_v55, %v2189_v56  ;;  %2374 = vst.msk [vmem:[%s7350_s23 + $0x18] sm:$0xff] %vm820_vm1, %v2358_v28  ;;  %v3267_v16 = vsel %vm889_vm4, %v3251_v48, %v7387_v62 }
 0x428   : > { %v3175_v3 = vpop.permute.xlu1 %3174  ;;  %v3816_v59 = vpop.permute.xlu0 %3815  ;;  %v3283_v61 = vsel %vm1870_vm7, %v3267_v16, %v3142_v40 }
 0x429   : > { %v2184_v24 = vsel %vm2183_vm13, %v7374_v17, %v2182_v44  ;;  %v2191_v43 = vmul.f32 0.5, %v2190_v4  ;;  %v3924_v17 = vsel %vm1870_vm7, %v3908_v57, %v3800_v37  ;;  %v2734_v37 = vmul.f32 %v7466_v35, %v7466_v35 }
 0x42a   : > { %v2187_v1 = vsel %vm2185_vm14, %v2186_v23, %v2184_v24  ;;  %v3940_v54 = vsel %vm1887_vm8, %v3924_v17, %v3816_v59  ;;  %v3299_v40 = vsel %vm1887_vm8, %v3283_v61, %v7356_v33 }
 0x42b   : > { %v2324_v18 = vmul.f32 %v2187_v1, %v7003_v12  ;;  %v2192_v52 = vsub.f32 1.5, %v2191_v43  ;;  %v7479_v12 = vpop.permute.xlu2 %3081  ;;  %v3956_v28 = vsel %vm1904_vm10, %v3940_v54, %v7394_v13  ;;  %v2747_v13 = vpack.c.bf16 %v2734_v37, %v2733_v42 }
 0x42c   : > { %v7515_v1 = vadd.f32 %v6876_v29, %v7396_v10 }
 0x42d   : > { %v2343_v2 = vadd.f32 %v7303_v7, %v2324_v18  ;;  %v2193_v45 = vmul.f32 %v5173_v55, %v2192_v52  ;;  %v2198_v55 = vand.u32 2147483648, %v7404_v32  ;;  %v7519_v18 = vadd.f32 %v6876_v29, %v7362_v6 }
 0x42f   : > { %v2359_v62 = vadd.f32 %v2343_v2, %v6985_v38  ;;  %v2194_v0 = vmul.f32 %v2193_v45, %v7404_v32  ;;  %v3315_v38 = vsel %vm1904_vm10, %v3299_v40, %v3175_v3  ;;  %v2735_v45 = vmul.f32 %v7519_v18, %v7519_v18 }
 0x430   : > { %v3851_v56 = vpop.permute.xlu1 %3850  ;;  %v3203_v4 = vpop.permute.xlu0 %3202 }
 0x431   : > { %2375 = vst.msk [vmem:[%s7350_s23 + $0x20] sm:$0xff] %vm820_vm1, %v2359_v62  ;;  %v2196_v60 = vsel %vm2195_vm0, %v7404_v32, %v2194_v0  ;;  %v3972_v44 = vsel %vm1921_vm9, %v3956_v28, %v3851_v56  ;;  %v3331_v8 = vsel %vm1921_vm9, %v3315_v38, %v3203_v4  ;;  %v7505_v32 = vpop.f32.mrf.mxu1  ;;  %v7538_v62 = vld [vmem:[%s8776_s4] ss:$0 sm:$0xff] }
 0x432   : > { %v2199_v51 = vsel %vm2197_vm15, %v2198_v55, %v2196_v60  ;;  %5022 = vmatmul.msk.bf16.gmra.mxu1 %vm1956_vm11, %v3972_v44  ;;  %4990 = vmatmul.msk.bf16.gmra.mxu2 %vm1956_vm11, %v3331_v8 }
 0x433   : > { %v2325_v33 = vmul.f32 %v2199_v51, %v7010_v21  ;;  %v7508_v48 = vpop.permute.xlu2 %3785 }
 0x434   : > { %4963 = vmatmul.msk.bf16.gmra.mxu3 %vm820_vm1, %v2747_v13 }
 0x435   : > { %v2344_v23 = vadd.f32 %v7303_v7, %v2325_v33 }
 0x437   : > { %v2360_v3 = vadd.f32 %v2344_v23, %v7015_v58  ;;  %v2103_v24 = vpop.f32.mrf.mxu3  ;;  %v2736_v58 = vmul.f32 %v7515_v1, %v7515_v1  ;;  %v7557_v23 = vadd.f32 %v7538_v62, %v7474_v30 }
 0x438   : > { %v2104_v43 = vadd.f32 %v7214_v19, %v2103_v24  ;;  %v3768_v59 = vpop.permute.xlu1 %3767  ;;  %v3096_v21 = vpop.permute.xlu0 %3095  ;;  %v3869_v24 = vsel %vm820_vm1, %v9035_v47, %v7437_v25  ;;  %v3221_v25 = vsel %vm820_vm1, %v6459_v49, %v7264_v14 }
 0x439   : > { %2376 = vst.msk [vmem:[%s7350_s23 + $0x28] sm:$0xff] %vm820_vm1, %v2360_v3  ;;  %v7530_v54 = vpop.f32.mrf.mxu1  ;;  %v2748_v42 = vpack.c.bf16 %v2736_v58, %v2735_v45  ;;  %v3885_v30 = vsel %vm839_vm2, %v3869_v24, %v3768_v59  ;;  %v2738_v47 = vmul.f32 %v7557_v23, %v7557_v23  ;;  %v3237_v59 = vsel %vm839_vm2, %v3221_v25, %v3096_v21 }
 0x43a   : > { %5174 = vrsqrt.f32 %v2104_v43  ;;  %vm2207_vm5 = vcmp.eq.f32.partialorder %v2104_v43, inf  ;;  %v2210_v45 = vand.u32 2147483648, %v2104_v43  ;;  %vm2209_vm6 = vcmp.eq.f32.partialorder %v2104_v43, 0.0 }
 0x43b   : > { %v7532_v29 = vpop.permute.xlu2 %3160 }
 0x43d   : > { %v3371_v52 = vpop.f32.mrf.mxu2 }
 0x43e   : > { %v7541_v0 = vadd.f32 %v7538_v62, %v3371_v52 }
 0x43f   : > { %v2105_v57 = vpop.f32.mrf.mxu3 }
 0x440   : > { %v5175_v17 = vpop.eup %5174  ;;  %v7524_v16 = vadd.f32 %v7214_v19, %v2105_v57  ;;  %v7526_v2 = vpop.permute.xlu1 %3127  ;;  %v3405_v51 = vmul.f32 %v7541_v0, %v7541_v0 }
 0x441   : > { %v2201_v10 = vmul.f32 %v5175_v17, %v2104_v43  ;;  %v3112_v61 = vpop.permute.xlu0 %3111  ;;  %v7559_v3 = vpop.f32.mrf.mxu1 }
 0x442   : > { %5176 = vrsqrt.f32 %v7524_v16  ;;  %vm2219_vm12 = vcmp.eq.f32.partialorder %v7524_v16, inf  ;;  %vm2221_vm13 = vcmp.eq.f32.partialorder %v7524_v16, 0.0 }
 0x443   : > { %v2202_v6 = vmul.f32 %v5175_v17, %v2201_v10  ;;  %v3834_v10 = vpop.permute.xlu2 %3833 }
 0x444   : > { %4964 = vmatmul.msk.bf16.gmra.mxu3 %vm820_vm1, %v2748_v42 }
 0x445   : > { %v2203_v37 = vmul.f32 0.5, %v2202_v6  ;;  %v3373_v55 = vpop.f32.mrf.mxu2 }
 0x446   : > { %v7545_v56 = vadd.f32 %v7538_v62, %v3373_v55  ;;  %v3894_v55 = vsel %vm858_vm3, %v3885_v30, %v7479_v12 }
 0x447   : > { %v2204_v40 = vsub.f32 1.5, %v2203_v37  ;;  %v2108_v28 = vpop.f32.mrf.mxu3  ;;  %v3910_v21 = vsel %vm889_vm4, %v3894_v55, %v7508_v48 }
 0x448   : > { %v5177_v60 = vpop.eup %5176  ;;  %v7548_v38 = vadd.f32 %v7214_v19, %v2108_v28  ;;  %v3802_v44 = vpop.permute.xlu1 %3801  ;;  %v3406_v33 = vmul.f32 %v7545_v56, %v7545_v56 }
 0x449   : > { %v2205_v4 = vmul.f32 %v5175_v17, %v2204_v40  ;;  %v2213_v8 = vmul.f32 %v5177_v60, %v7524_v16  ;;  %v3144_v13 = vpop.permute.xlu0 %3143  ;;  %v7567_v17 = vadd.f32 %v7538_v62, %v7431_v15  ;;  %v7595_v30 = vpop.f32.mrf.mxu1 }
 0x44a   : > { %5178 = vrsqrt.f32 %v7548_v38  ;;  %v3419_v57 = vpack.c.bf16 %v3406_v33, %v3405_v51  ;;  %v3253_v51 = vsel %vm858_vm3, %v3237_v59, %v3112_v61  ;;  %vm2231_vm14 = vcmp.eq.f32.partialorder %v7548_v38, inf }
 0x44b   : > { %v2206_v52 = vmul.f32 %v2205_v4, %v2104_v43  ;;  %v2214_v58 = vmul.f32 %v5177_v60, %v2213_v8  ;;  %v2737_v4 = vmul.f32 %v7567_v17, %v7567_v17  ;;  %v7607_v25 = vpop.permute.xlu2 %3753  ;;  %vm2233_vm0 = vcmp.eq.f32.partialorder %v7548_v38, 0.0 }
 0x44c   : > { %4995 = vmatmul.msk.bf16.gmra.mxu0 %vm820_vm1, %v3419_v57 }
 0x44d   : > { %v2208_v6 = vsel %vm2207_vm5, %v2104_v43, %v2206_v52  ;;  %v2215_v42 = vmul.f32 0.5, %v2214_v58  ;;  %v2749_v52 = vpack.c.bf16 %v2738_v47, %v2737_v4 }
 0x44e   : > { %v2211_v37 = vsel %vm2209_vm6, %v2210_v45, %v2208_v6  ;;  %v3269_v45 = vsel %vm889_vm4, %v3253_v51, %v7526_v2  ;;  %v3926_v6 = vsel %vm1870_vm7, %v3910_v21, %v3802_v44  ;;  %v7634_v21 = vadd.f32 %v7538_v62, %v7505_v32 }
 0x44f   : > { %v2326_v15 = vmul.f32 %v2211_v37, %v7049_v20  ;;  %v2216_v40 = vsub.f32 1.5, %v2215_v42  ;;  %v2110_v43 = vpop.f32.mrf.mxu3  ;;  %v3285_v48 = vsel %vm1870_vm7, %v3269_v45, %v3144_v13 }
 0x450   : > { %v5179_v28 = vpop.eup %5178  ;;  %v7584_v8 = vadd.f32 %v7214_v19, %v2110_v43  ;;  %v3177_v49 = vpop.permute.xlu1 %3176  ;;  %v3301_v44 = vsel %vm1887_vm8, %v3285_v48, %v7532_v29 }
 0x451   : > { %v2345_v14 = vadd.f32 %v7303_v7, %v2326_v15  ;;  %v2217_v20 = vmul.f32 %v5177_v60, %v2216_v40  ;;  %v2225_v33 = vmul.f32 %v5179_v28, %v7548_v38  ;;  %v3818_v24 = vpop.permute.xlu0 %3817  ;;  %v2222_v60 = vand.u32 2147483648, %v7524_v16 }
 0x452   : > { %5180 = vrsqrt.f32 %v7584_v8  ;;  %v3942_v47 = vsel %vm1887_vm8, %v3926_v6, %v3818_v24  ;;  %v3317_v55 = vsel %vm1904_vm10, %v3301_v44, %v3177_v49  ;;  %v2234_v24 = vand.u32 2147483648, %v7548_v38 }
 0x453   : > { %v2361_v58 = vadd.f32 %v2345_v14, %v7066_v5  ;;  %v2218_v61 = vmul.f32 %v2217_v20, %v7524_v16  ;;  %v2226_v57 = vmul.f32 %v5179_v28, %v2225_v33  ;;  %v2739_v6 = vmul.f32 %v7634_v21, %v7634_v21 }
 0x454   : > { %4965 = vmatmul.msk.bf16.gmra.mxu3 %vm820_vm1, %v2749_v52  ;;  %v7640_v52 = vpop.f32.mrf.mxu1  ;;  %vm2243_vm15 = vcmp.eq.f32.partialorder %v7584_v8, inf  ;;  %vm2245_vm5 = vcmp.eq.f32.partialorder %v7584_v8, 0.0 }
 0x455   : > { %2377 = vst.msk [vmem:[%s7350_s23 + $0x30] sm:$0xff] %vm820_vm1, %v2361_v58  ;;  %v2220_v5 = vsel %vm2219_vm12, %v7524_v16, %v2218_v61  ;;  %v2227_v42 = vmul.f32 0.5, %v2226_v57  ;;  %v3958_v16 = vsel %vm1904_vm10, %v3942_v47, %v3834_v10  ;;  %v7624_v10 = vadd.f32 %v7538_v62, %v7530_v54 }
 0x456   : > { %v2223_v2 = vsel %vm2221_vm13, %v2222_v60, %v2220_v5  ;;  %v7645_v60 = vpop.permute.xlu2 %3113 }
 0x457   : > { %v2327_v37 = vmul.f32 %v2223_v2, %v7057_v34  ;;  %v2228_v15 = vsub.f32 1.5, %v2227_v42  ;;  %v2740_v61 = vmul.f32 %v7624_v10, %v7624_v10 }
 0x458   : > { %v5181_v13 = vpop.eup %5180  ;;  %v3853_v59 = vpop.permute.xlu1 %3852 }
 0x459   : > { %v2346_v40 = vadd.f32 %v7303_v7, %v2327_v37  ;;  %v2229_v43 = vmul.f32 %v5179_v28, %v2228_v15  ;;  %v2237_v4 = vmul.f32 %v5181_v13, %v7584_v8  ;;  %v3974_v51 = vsel %vm1921_vm9, %v3958_v16, %v3853_v59  ;;  %v3205_v14 = vpop.permute.xlu0 %3204  ;;  %v2113_v34 = vpop.f32.mrf.mxu3 }
 0x45a   : > { %v3333_v20 = vsel %vm1921_vm9, %v3317_v55, %v3205_v14  ;;  %v7619_v29 = vadd.f32 %v7214_v19, %v2113_v34  ;;  %5023 = vmatmul.msk.bf16.gmra.mxu1 %vm1956_vm11, %v3974_v51  ;;  %v2750_v44 = vpack.c.bf16 %v2740_v61, %v2739_v6  ;;  %v2246_v55 = vand.u32 2147483648, %v7584_v8 }
 0x45b   : > { %v2362_v28 = vadd.f32 %v2346_v40, %v7093_v41  ;;  %v2230_v49 = vmul.f32 %v2229_v43, %v7548_v38  ;;  %v2238_v33 = vmul.f32 %v5181_v13, %v2237_v4  ;;  %4991 = vmatmul.msk.bf16.gmra.mxu2 %vm1956_vm11, %v3333_v20 }
 0x45c   : > { %5182 = vrsqrt.f32 %v7619_v29  ;;  %v2726_v4 = vpop.f32.mrf.mxu1  ;;  %vm2255_vm6 = vcmp.eq.f32.partialorder %v7619_v29, inf  ;;  %vm2257_vm12 = vcmp.eq.f32.partialorder %v7619_v29, 0.0 }
 0x45d   : > { %2378 = vst.msk [vmem:[%s7350_s23 + $0x38] sm:$0xff] %vm820_vm1, %v2362_v28  ;;  %v2232_v54 = vsel %vm2231_vm14, %v7548_v38, %v2230_v49  ;;  %v2239_v41 = vmul.f32 0.5, %v2238_v33 }
 0x45e   : > { %v2235_v58 = vsel %vm2233_vm0, %v2234_v24, %v2232_v54  ;;  %v3788_v33 = vpop.permute.xlu2 %3787 }
 0x45f   : > { %v2328_v57 = vmul.f32 %v2235_v58, %v7099_v22  ;;  %v2240_v45 = vsub.f32 1.5, %v2239_v41 }
 0x460   : > { %v7647_v32 = vpop.permute.xlu1 %3769 }
 0x461   : > { %v2347_v38 = vadd.f32 %v7303_v7, %v2328_v57  ;;  %v2241_v48 = vmul.f32 %v5181_v13, %v2240_v45  ;;  %v7652_v5 = vpop.permute.xlu0 %3097  ;;  %v2115_v42 = vpop.f32.mrf.mxu3 }
 0x462   : > { %v5183_v47 = vpop.eup %5182  ;;  %v7655_v2 = vadd.f32 %v7214_v19, %v2115_v42 }
 0x463   : > { %v2363_v22 = vadd.f32 %v2347_v38, %v7114_v11  ;;  %v2242_v37 = vmul.f32 %v2241_v48, %v7584_v8  ;;  %v2249_v15 = vmul.f32 %v5183_v47, %v7619_v29 }
 0x464   : > { %5184 = vrsqrt.f32 %v7655_v2  ;;  %4966 = vmatmul.msk.bf16.gmra.mxu3 %vm820_vm1, %v2750_v44  ;;  %vm2267_vm13 = vcmp.eq.f32.partialorder %v7655_v2, inf  ;;  %vm2269_vm14 = vcmp.eq.f32.partialorder %v7655_v2, 0.0 }
 0x465   : > { %2379 = vst.msk [vmem:[%s7350_s23 + $0x40] sm:$0xff] %vm820_vm1, %v2363_v22  ;;  %v2244_v13 = vsel %vm2243_vm15, %v7584_v8, %v2242_v37  ;;  %v2250_v59 = vmul.f32 %v5183_v47, %v2249_v15  ;;  %v3376_v16 = vpop.f32.mrf.mxu2  ;;  %v7674_v8 = vadd.f32 %v7538_v62, %v7595_v30 }
 0x466   : > { %v2247_v11 = vsel %vm2245_vm5, %v2246_v55, %v2244_v13  ;;  %v7686_v61 = vadd.f32 %v7538_v62, %v3376_v16  ;;  %v7704_v55 = vpop.f32.mrf.mxu1 }
 0x467   : > { %v2329_v40 = vmul.f32 %v2247_v11, %v7106_v39  ;;  %v2251_v43 = vmul.f32 0.5, %v2250_v59  ;;  %v7680_v39 = vadd.f32 %v7538_v62, %v7559_v3  ;;  %v2742_v30 = vmul.f32 %v7674_v8, %v7674_v8 }
 0x468   : > { %v7669_v51 = vpop.permute.xlu1 %3129  ;;  %v3407_v15 = vmul.f32 %v7686_v61, %v7686_v61 }
 0x469   : > { %v2348_v14 = vadd.f32 %v7303_v7, %v2329_v40  ;;  %v2252_v34 = vsub.f32 1.5, %v2251_v43  ;;  %v3772_v20 = vpop.permute.xlu0 %3771  ;;  %v2741_v38 = vmul.f32 %v7680_v39, %v7680_v39  ;;  %v9052_v40 = vld [vmem:[#allocation34_spill] sm:$0xff] }
 0x46a   : > { %v5185_v28 = vpop.eup %5184 }
 0x46b   : > { %v2364_v49 = vadd.f32 %v2348_v14, %v7127_v36  ;;  %v2253_v24 = vmul.f32 %v5183_v47, %v2252_v34  ;;  %v2261_v54 = vmul.f32 %v5185_v28, %v7655_v2  ;;  %v2258_v36 = vand.u32 2147483648, %v7619_v29  ;;  %v9051_v47 = vld [vmem:[#allocation63_spill] sm:$0xff]  ;;  %v3163_v14 = vpop.permute.xlu2 %3162 }
 0x46c   : > { %v2751_v16 = vpack.c.bf16 %v2742_v30, %v2741_v38  ;;  %v9054_v30 = vld [vmem:[#allocation83_spill] sm:$0xff] }
 0x46d   : > { %2380 = vst.msk [vmem:[%s7350_s23 + $0x48] sm:$0xff] %vm820_vm1, %v2364_v49  ;;  %v2254_v41 = vmul.f32 %v2253_v24, %v7619_v29  ;;  %v2262_v58 = vmul.f32 %v5185_v28, %v2261_v54  ;;  %v3378_v57 = vpop.f32.mrf.mxu2  ;;  %v9053_v49 = vld [vmem:[#allocation24_spill] sm:$0xff]  ;;  %v2270_v54 = vand.u32 2147483648, %v7655_v2 }
 0x46e   : > { %v7695_v6 = vadd.f32 %v7538_v62, %v3378_v57  ;;  %v3871_v24 = vsel %vm820_vm1, %v9053_v49, %v7607_v25 }
 0x46f   : > { %v2256_v45 = vsel %vm2255_vm6, %v7619_v29, %v2254_v41  ;;  %v2263_v3 = vmul.f32 0.5, %v2262_v58 }
 0x470   : > { %v2259_v48 = vsel %vm2257_vm12, %v2258_v36, %v2256_v45  ;;  %v3804_v42 = vpop.permute.xlu1 %3803  ;;  %v3408_v44 = vmul.f32 %v7695_v6, %v7695_v6  ;;  %v3223_v36 = vsel %vm820_vm1, %v9054_v30, %v7479_v12 }
 0x471   : > { %v2330_v22 = vmul.f32 %v2259_v48, %v9051_v47  ;;  %v2264_v37 = vsub.f32 1.5, %v2263_v3  ;;  %v3146_v29 = vpop.permute.xlu0 %3145  ;;  %v3239_v38 = vsel %vm839_vm2, %v3223_v36, %v7652_v5  ;;  %v9055_v48 = vld [vmem:[#allocation22_spill] sm:$0xff]  ;;  %v7740_v5 = vadd.f32 %v7538_v62, %v7640_v52 }
 0x472   : > { %v3420_v11 = vpack.c.bf16 %v3408_v44, %v3407_v15  ;;  %v9056_v44 = vld [vmem:[#allocation38_spill] sm:$0xff] }
 0x473   : > { %v2349_v13 = vadd.f32 %v7303_v7, %v2330_v22  ;;  %v2265_v59 = vmul.f32 %v5185_v28, %v2264_v37  ;;  %v3887_v28 = vsel %vm839_vm2, %v3871_v24, %v7647_v32  ;;  %v4004_v37 = vpop.f32.mrf.mxu1 }
 0x474   : > { %4967 = vmatmul.msk.bf16.gmra.mxu3 %vm820_vm1, %v2751_v16  ;;  %4996 = vmatmul.msk.bf16.gmra.mxu0 %vm820_vm1, %v3420_v11  ;;  %v3896_v25 = vsel %vm858_vm3, %v3887_v28, %v3772_v20  ;;  %v3255_v20 = vsel %vm858_vm3, %v3239_v38, %v7645_v60  ;;  %v3836_v60 = vpop.permute.xlu2 %3835 }
 0x475   : > { %v2365_v43 = vadd.f32 %v2349_v13, %v9052_v40  ;;  %v2266_v34 = vmul.f32 %v2265_v59, %v7655_v2  ;;  %v3912_v12 = vsel %vm889_vm4, %v3896_v25, %v3788_v33 }
 0x476   : > { %v3928_v15 = vsel %vm1870_vm7, %v3912_v12, %v3804_v42 }
 0x477   : > { %2381 = vst.msk [vmem:[%s7350_s23 + $0x50] sm:$0xff] %vm820_vm1, %v2365_v43  ;;  %v2268_v41 = vsel %vm2267_vm13, %v7655_v2, %v2266_v34  ;;  %v2118_v58 = vpop.f32.mrf.mxu3  ;;  %v7731_v2 = vadd.f32 %v7538_v62, %v2726_v4  ;;  %v3271_v4 = vsel %vm889_vm4, %v3255_v20, %v7669_v51  ;;  %v2743_v51 = vmul.f32 %v7740_v5, %v7740_v5 }
 0x478   : > { %v2271_v57 = vsel %vm2269_vm14, %v2270_v54, %v2268_v41  ;;  %v2119_v45 = vadd.f32 %v7214_v19, %v2118_v58  ;;  %v3179_v3 = vpop.permute.xlu1 %3178  ;;  %v3287_v11 = vsel %vm1870_vm7, %v3271_v4, %v3146_v29  ;;  %v7777_v20 = vadd.f32 %v7538_v62, %v7704_v55 }
 0x479   : > { %v2331_v32 = vmul.f32 %v2271_v57, %v9055_v48  ;;  %v3820_v47 = vpop.permute.xlu0 %3819  ;;  %v2744_v33 = vmul.f32 %v7731_v2, %v7731_v2  ;;  %v3303_v29 = vsel %vm1887_vm8, %v3287_v11, %v3163_v14 }
 0x47a   : > { %5186 = vrsqrt.f32 %v2119_v45  ;;  %v3944_v59 = vsel %vm1887_vm8, %v3928_v15, %v3820_v47  ;;  %v3319_v54 = vsel %vm1904_vm10, %v3303_v29, %v3179_v3  ;;  %vm2279_vm2 = vcmp.eq.f32.partialorder %v2119_v45, inf }
 0x47b   : > { %v2350_v22 = vadd.f32 %v7303_v7, %v2331_v32  ;;  %v3960_v43 = vsel %vm1904_vm10, %v3944_v59, %v3836_v60  ;;  %v2752_v28 = vpack.c.bf16 %v2744_v33, %v2743_v51  ;;  %v7763_v30 = vpop.f32.mrf.mxu1  ;;  %v7772_v32 = vadd.f32 %v7538_v62, %v4004_v37  ;;  %v9057_v59 = vld [vmem:[#allocation58_spill] sm:$0xff] }
 0x47c   : > { %v2282_v12 = vand.u32 2147483648, %v2119_v45  ;;  %vm2281_vm3 = vcmp.eq.f32.partialorder %v2119_v45, 0.0 }
 0x47d   : > { %v2366_v13 = vadd.f32 %v2350_v22, %v9056_v44  ;;  %v4043_v37 = vmul.f32 %v7772_v32, %v7772_v32 }
 0x47f   : > { %2382 = vst.msk [vmem:[%s7350_s23 + $0x58] sm:$0xff] %vm820_vm1, %v2366_v13  ;;  %v2120_v42 = vpop.f32.mrf.mxu3 }
 0x480   : > { %v5187_v16 = vpop.eup %5186  ;;  %v7752_v52 = vadd.f32 %v7214_v19, %v2120_v42  ;;  %v3855_v40 = vpop.permute.xlu1 %3854 }
 0x481   : > { %v2273_v34 = vmul.f32 %v5187_v16, %v2119_v45  ;;  %v3976_v49 = vsel %vm1921_vm9, %v3960_v43, %v3855_v40  ;;  %v3207_v24 = vpop.permute.xlu0 %3206 }
 0x482   : > { %5188 = vrsqrt.f32 %v7752_v52  ;;  %5024 = vmatmul.msk.bf16.gmra.mxu1 %vm1956_vm11, %v3976_v49  ;;  %v3335_v58 = vsel %vm1921_vm9, %v3319_v54, %v3207_v24  ;;  %v9058_v49 = vld [vmem:[#allocation61_spill] sm:$0xff]  ;;  %vm2291_vm4 = vcmp.eq.f32.partialorder %v7752_v52, inf  ;;  %vm2293_vm7 = vcmp.eq.f32.partialorder %v7752_v52, 0.0 }
 0x483   : > { %v2274_v41 = vmul.f32 %v5187_v16, %v2273_v34  ;;  %4992 = vmatmul.msk.bf16.gmra.mxu2 %vm1956_vm11, %v3335_v58  ;;  %v4009_v13 = vpop.f32.mrf.mxu1 }
 0x484   : > { %4968 = vmatmul.msk.bf16.gmra.mxu3 %vm820_vm1, %v2752_v28  ;;  %v2294_v28 = vand.u32 2147483648, %v7752_v52 }
 0x485   : > { %v2275_v36 = vmul.f32 0.5, %v2274_v41 }
 0x487   : > { %v2276_v14 = vsub.f32 1.5, %v2275_v36  ;;  %v2123_v25 = vpop.f32.mrf.mxu3 }
 0x488   : > { %v5189_v57 = vpop.eup %5188  ;;  %v7769_v48 = vadd.f32 %v7214_v19, %v2123_v25 }
 0x489   : > { %v2277_v38 = vmul.f32 %v5187_v16, %v2276_v14  ;;  %v2285_v3 = vmul.f32 %v5189_v57, %v7752_v52  ;;  %v4042_v16 = vmul.f32 %v7777_v20, %v7777_v20 }
 0x48a   : > { %5190 = vrsqrt.f32 %v7769_v48  ;;  %vm2303_vm8 = vcmp.eq.f32.partialorder %v7769_v48, inf  ;;  %vm2305_vm9 = vcmp.eq.f32.partialorder %v7769_v48, 0.0 }
 0x48b   : > { %v2278_v47 = vmul.f32 %v2277_v38, %v2119_v45  ;;  %v2286_v22 = vmul.f32 %v5189_v57, %v2285_v3  ;;  %v4058_v29 = vpack.c.bf16 %v4043_v37, %v4042_v16  ;;  %v4012_v14 = vpop.f32.mrf.mxu1  ;;  %v7825_v16 = vadd.f32 %v7538_v62, %v4009_v13 }
 0x48c   : > { %v2306_v13 = vand.u32 2147483648, %v7769_v48 }
 0x48d   : > { %v2280_v15 = vsel %vm2279_vm2, %v2119_v45, %v2278_v47  ;;  %v2287_v44 = vmul.f32 0.5, %v2286_v22  ;;  %v3381_v19 = vpop.f32.mrf.mxu2  ;;  %v7788_v45 = vld [vmem:[%s8778_s6] ss:$0 sm:$0xff]  ;;  %v9059_v47 = vld [vmem:[#allocation27_spill] sm:$0xff] }
 0x48e   : > { %v2283_v4 = vsel %vm2281_vm3, %v2282_v12, %v2280_v15  ;;  %v7808_v38 = vadd.f32 %v7538_v62, %v3381_v19 }
 0x48f   : > { %v2332_v11 = vmul.f32 %v2283_v4, %v9057_v59  ;;  %v2288_v33 = vsub.f32 1.5, %v2287_v44  ;;  %v2125_v60 = vpop.f32.mrf.mxu3 }
 0x490   : > { %v5191_v42 = vpop.eup %5190  ;;  %v7791_v43 = vadd.f32 %v7788_v45, %v2125_v60  ;;  %v3409_v19 = vmul.f32 %v7808_v38, %v7808_v38 }
 0x491   : > { %v2351_v55 = vadd.f32 %v7303_v7, %v2332_v11  ;;  %v2289_v40 = vmul.f32 %v5189_v57, %v2288_v33  ;;  %v2297_v51 = vmul.f32 %v5191_v42, %v7769_v48  ;;  %v3458_v34 = vpop.f32.mrf.mxu0 }
 0x492   : > { %5192 = vrsqrt.f32 %v7791_v43  ;;  %v7804_v36 = vadd.f32 %v7788_v45, %v3458_v34  ;;  %vm2315_vm10 = vcmp.eq.f32.partialorder %v7791_v43, inf  ;;  %vm2317_vm11 = vcmp.eq.f32.partialorder %v7791_v43, 0.0 }
 0x493   : > { %v2367_v24 = vadd.f32 %v2351_v55, %v9058_v49  ;;  %v2290_v54 = vmul.f32 %v2289_v40, %v7752_v52  ;;  %v2298_v41 = vmul.f32 %v5191_v42, %v2297_v51  ;;  %v9060_v55 = vld [vmem:[#allocation8_spill] sm:$0xff]  ;;  %v7832_v49 = vadd.f32 %v7538_v62, %v7763_v30 }
 0x494   : > { %5025 = vmatmul.msk.bf16.vlgmr.msra.gmra.mxu3 %vm820_vm1, %v4058_v29  ;;  %5194 = vrsqrt.f32 %v7804_v36  ;;  %v4045_v30 = vmul.f32 %v7825_v16, %v7825_v16  ;;  %vm3505_vm0 = vcmp.eq.f32.partialorder %v7804_v36, inf  ;;  %vm3507_vm15 = vcmp.eq.f32.partialorder %v7804_v36, 0.0 }
 0x495   : > { %2383 = vst.msk [vmem:[%s7350_s23 + $0x60] sm:$0xff] %vm820_vm1, %v2367_v24  ;;  %v2292_v58 = vsel %vm2291_vm4, %v7752_v52, %v2290_v54  ;;  %v2299_v25 = vmul.f32 0.5, %v2298_v41  ;;  %v3383_v3 = vpop.f32.mrf.mxu2 }
 0x496   : > { %v2295_v57 = vsel %vm2293_vm7, %v2294_v28, %v2292_v58  ;;  %v7813_v15 = vadd.f32 %v7538_v62, %v3383_v3 }
 0x497   : > { %v2333_v22 = vmul.f32 %v2295_v57, %v9059_v47  ;;  %v2300_v12 = vsub.f32 1.5, %v2299_v25  ;;  %v2786_v52 = vpop.f32.mrf.mxu3  ;;  %v4014_v57 = vpop.f32.mrf.mxu1  ;;  %v9061_v25 = vld [vmem:[#allocation46_spill] sm:$0xff] }
 0x498   : > { %v5193_v44 = vpop.eup %5192  ;;  %v7817_v37 = vadd.f32 %v7788_v45, %v2786_v52  ;;  %v3410_v33 = vmul.f32 %v7813_v15, %v7813_v15 }
 0x499   : > { %v2352_v4 = vadd.f32 %v7303_v7, %v2333_v22  ;;  %v2301_v59 = vmul.f32 %v5191_v42, %v2300_v12  ;;  %v2309_v11 = vmul.f32 %v5193_v44, %v7791_v43  ;;  %v3460_v60 = vpop.f32.mrf.mxu0 }
 0x49a   : > { %5196 = vrsqrt.f32 %v7817_v37  ;;  %v3421_v42 = vpack.c.bf16 %v3410_v33, %v3409_v19  ;;  %v5195_v29 = vpop.eup %5194  ;;  %v7839_v24 = vadd.f32 %v7788_v45, %v3460_v60  ;;  %vm2833_vm5 = vcmp.eq.f32.partialorder %v7817_v37, inf }
 0x49b   : > { %v2368_v40 = vadd.f32 %v2352_v4, %v9060_v55  ;;  %v2302_v51 = vmul.f32 %v2301_v59, %v7769_v48  ;;  %v2310_v34 = vmul.f32 %v5193_v44, %v2309_v11  ;;  %v3499_v41 = vmul.f32 %v5195_v29, %v7804_v36 }
 0x49c   : > { %4997 = vmatmul.msk.bf16.gmra.mxu0 %vm820_vm1, %v3421_v42  ;;  %5198 = vrsqrt.f32 %v7839_v24  ;;  %vm2835_vm6 = vcmp.eq.f32.partialorder %v7817_v37, 0.0  ;;  %vm3517_vm12 = vcmp.eq.f32.partialorder %v7839_v24, inf  ;;  %vm3519_vm13 = vcmp.eq.f32.partialorder %v7839_v24, 0.0 }
 0x49d   : > { %2384 = vst.msk [vmem:[%s7350_s23 + $0x68] sm:$0xff] %vm820_vm1, %v2368_v40  ;;  %v2304_v54 = vsel %vm2303_vm8, %v7769_v48, %v2302_v51  ;;  %v2311_v28 = vmul.f32 0.5, %v2310_v34  ;;  %v3500_v22 = vmul.f32 %v5195_v29, %v3499_v41  ;;  %v4044_v48 = vmul.f32 %v7832_v49, %v7832_v49  ;;  %v9062_v34 = vld [vmem:[#allocation31_spill] sm:$0xff] }
 0x49e   : > { %v2307_v58 = vsel %vm2305_vm9, %v2306_v13, %v2304_v54  ;;  %v7857_v40 = vadd.f32 %v7538_v62, %v4012_v14  ;;  %v7860_v51 = vadd.f32 %v7538_v62, %v4014_v57 }
 0x49f   : > { %v2334_v3 = vmul.f32 %v2307_v58, %v9061_v25  ;;  %v2312_v47 = vsub.f32 1.5, %v2311_v28  ;;  %v2788_v12 = vpop.f32.mrf.mxu3  ;;  %v3501_v11 = vmul.f32 0.5, %v3500_v22  ;;  %v4059_v55 = vpack.c.bf16 %v4045_v30, %v4044_v48  ;;  %v4017_v22 = vpop.f32.mrf.mxu1 }
 0x4a0   : > { %v5197_v52 = vpop.eup %5196  ;;  %v7852_v4 = vadd.f32 %v7788_v45, %v2788_v12  ;;  %v2318_v28 = vand.u32 2147483648, %v7791_v43  ;;  %v7878_v25 = vmul.f32 %v7857_v40, %v7857_v40  ;;  %v9063_v12 = vld [vmem:[#allocation66_spill] sm:$0xff] }
 0x4a1   : > { %v2353_v59 = vadd.f32 %v7303_v7, %v2334_v3  ;;  %v2313_v19 = vmul.f32 %v5193_v44, %v2312_v47  ;;  %v2827_v33 = vmul.f32 %v5197_v52, %v7817_v37  ;;  %v3463_v60 = vpop.f32.mrf.mxu0  ;;  %v3502_v7 = vsub.f32 1.5, %v3501_v11 }
 0x4a2   : > { %5200 = vrsqrt.f32 %v7852_v4  ;;  %v5199_v54 = vpop.eup %5198  ;;  %v7869_v14 = vadd.f32 %v7788_v45, %v3463_v60  ;;  %v7882_v3 = vmul.f32 %v7860_v51, %v7860_v51  ;;  %vm2845_vm14 = vcmp.eq.f32.partialorder %v7852_v4, inf }
 0x4a3   : > { %v2369_v42 = vadd.f32 %v2353_v59, %v9062_v34  ;;  %v2314_v13 = vmul.f32 %v2313_v19, %v7791_v43  ;;  %v2828_v44 = vmul.f32 %v5197_v52, %v2827_v33  ;;  %v3503_v30 = vmul.f32 %v5195_v29, %v3502_v7 }
 0x4a4   : > { %5026 = vmatmul.msk.bf16.gmra.mxu3 %vm820_vm1, %v4059_v55  ;;  %v3511_v57 = vmul.f32 %v5199_v54, %v7839_v24  ;;  %5202 = vrsqrt.f32 %v7869_v14  ;;  %v3508_v33 = vand.u32 2147483648, %v7804_v36  ;;  %v7896_v55 = vld [vmem:[%s8780_s8] ss:$0 sm:$0xff]  ;;  %vm2847_vm2 = vcmp.eq.f32.partialorder %v7852_v4, 0.0 }
 0x4a5   : > { %2385 = vst.msk [vmem:[%s7350_s23 + $0x70] sm:$0xff] %vm820_vm1, %v2369_v42  ;;  %v2316_v41 = vsel %vm2315_vm10, %v7791_v43, %v2314_v13  ;;  %v2829_v58 = vmul.f32 0.5, %v2828_v44  ;;  %v3504_v43 = vmul.f32 %v3503_v30, %v7804_v36  ;;  %v9064_v30 = vld [vmem:[#allocation26_spill] sm:$0xff]  ;;  %vm3529_vm3 = vcmp.eq.f32.partialorder %v7869_v14, inf }
 0x4a6   : > { %v2319_v47 = vsel %vm2317_vm11, %v2318_v28, %v2316_v41  ;;  %v3512_v59 = vmul.f32 %v5199_v54, %v3511_v57  ;;  %vm3531_vm4 = vcmp.eq.f32.partialorder %v7869_v14, 0.0 }
 0x4a7   : > { %v2335_v48 = vmul.f32 %v2319_v47, %v9063_v12  ;;  %v2830_v29 = vsub.f32 1.5, %v2829_v58  ;;  %v2791_v19 = vpop.f32.mrf.mxu3  ;;  %v3506_v42 = vsel %vm3505_vm0, %v7804_v36, %v3504_v43 }
 0x4a8   : > { %v5201_v11 = vpop.eup %5200  ;;  %v7891_v60 = vadd.f32 %v7788_v45, %v2791_v19  ;;  %v3513_v7 = vmul.f32 0.5, %v3512_v59  ;;  %v3509_v28 = vsel %vm3507_vm15, %v3508_v33, %v3506_v42  ;;  %v4060_v33 = vpack.c.bf16 %v7882_v3, %v7878_v25 }
 0x4a9   : > { %v2354_v34 = vadd.f32 %v7896_v55, %v2335_v48  ;;  %v2831_v13 = vmul.f32 %v5197_v52, %v2830_v29  ;;  %v3465_v44 = vpop.f32.mrf.mxu0  ;;  %v2839_v41 = vmul.f32 %v5201_v11, %v7852_v4  ;;  %v3690_v57 = vmul.f32 %v3509_v28, %v7332_v27 }
 0x4aa   : > { %5204 = vrsqrt.f32 %v7891_v60  ;;  %v3514_v12 = vsub.f32 1.5, %v3513_v7  ;;  %v5203_v36 = vpop.eup %5202  ;;  %v2836_v52 = vand.u32 2147483648, %v7817_v37  ;;  %v7909_v43 = vadd.f32 %v7788_v45, %v3465_v44 }
 0x4ab   : > { %v2370_v58 = vadd.f32 %v2354_v34, %v9064_v30  ;;  %v2832_v47 = vmul.f32 %v2831_v13, %v7817_v37  ;;  %v2840_v48 = vmul.f32 %v5201_v11, %v2839_v41  ;;  %v3706_v29 = vadd.f32 %v7896_v55, %v3690_v57  ;;  %v4019_v41 = vpop.f32.mrf.mxu1 }
 0x4ac   : > { %v3515_v27 = vmul.f32 %v5199_v54, %v3514_v12  ;;  %v3523_v19 = vmul.f32 %v5203_v36, %v7869_v14  ;;  %5206 = vrsqrt.f32 %v7909_v43  ;;  %v3520_v25 = vand.u32 2147483648, %v7839_v24 }
 0x4ad   : > { %2386 = vst.msk [vmem:[%s7350_s23 + $0x78] sm:$0xff] %vm820_vm1, %v2370_v58  ;;  %v2834_v59 = vsel %vm2833_vm5, %v7817_v37, %v2832_v47  ;;  %v2841_v42 = vmul.f32 0.5, %v2840_v48  ;;  %v7933_v47 = vadd.f32 %v7538_v62, %v4017_v22  ;;  %vm2857_vm7 = vcmp.eq.f32.partialorder %v7891_v60, inf }
 0x4ae   : > { %v2837_v34 = vsel %vm2835_vm6, %v2836_v52, %v2834_v59  ;;  %5001 = vst.msk [vmem:[%s7350_s23 + $0x100] sm:$0xff] %vm820_vm1, %v3706_v29  ;;  %v3516_v7 = vmul.f32 %v3515_v27, %v7839_v24  ;;  %v3524_v44 = vmul.f32 %v5203_v36, %v3523_v19  ;;  %v2848_v19 = vand.u32 2147483648, %v7852_v4 }
 0x4af   : > { %v3018_v13 = vmul.f32 %v2837_v34, %v7329_v63  ;;  %v2793_v37 = vpop.f32.mrf.mxu3  ;;  %v2842_v3 = vsub.f32 1.5, %v2841_v42  ;;  %vm2859_vm8 = vcmp.eq.f32.partialorder %v7891_v60, 0.0  ;;  %vm3541_vm9 = vcmp.eq.f32.partialorder %v7909_v43, inf }
 0x4b0   : > { %v5205_v54 = vpop.eup %5204  ;;  %v7927_v28 = vadd.f32 %v7788_v45, %v2793_v37  ;;  %v3518_v63 = vsel %vm3517_vm12, %v7839_v24, %v3516_v7  ;;  %v3525_v58 = vmul.f32 0.5, %v3524_v44  ;;  %vm3543_vm10 = vcmp.eq.f32.partialorder %v7909_v43, 0.0 }
 0x4b1   : > { %v3034_v30 = vadd.f32 %v7896_v55, %v3018_v13  ;;  %v2851_v57 = vmul.f32 %v5205_v54, %v7891_v60  ;;  %v3521_v12 = vsel %vm3519_vm13, %v3520_v25, %v3518_v63  ;;  %v2843_v52 = vmul.f32 %v5201_v11, %v2842_v3 }
 0x4b2   : > { %5208 = vrsqrt.f32 %v7927_v28  ;;  %v3691_v48 = vmul.f32 %v3521_v12, %v7348_v26  ;;  %v3526_v29 = vsub.f32 1.5, %v3525_v58  ;;  %v5207_v27 = vpop.eup %5206  ;;  %v7947_v26 = vmul.f32 %v7933_v47, %v7933_v47 }
 0x4b3   : > { %4969 = vst.msk [vmem:[%s7350_s23 + $0x80] sm:$0xff] %vm820_vm1, %v3034_v30  ;;  %v2852_v59 = vmul.f32 %v5205_v54, %v2851_v57  ;;  %v2844_v24 = vmul.f32 %v2843_v52, %v7852_v4  ;;  %v3535_v42 = vmul.f32 %v5207_v27, %v7909_v43  ;;  %v3532_v63 = vand.u32 2147483648, %v7869_v14  ;;  %v7961_v58 = vpop.f32.mrf.mxu1 }
 0x4b4   : > { %5027 = vmatmul.msk.bf16.gmra.mxu3 %vm820_vm1, %v4060_v33  ;;  %v3707_v22 = vadd.f32 %v7896_v55, %v3691_v48  ;;  %v3527_v11 = vmul.f32 %v5203_v36, %v3526_v29  ;;  %v7966_v29 = vadd.f32 %v7538_v62, %v4019_v41  ;;  %vm2869_vm11 = vcmp.eq.f32.partialorder %v7927_v28, inf }
 0x4b5   : > { %v2853_v34 = vmul.f32 0.5, %v2852_v59  ;;  %v3386_v13 = vpop.f32.mrf.mxu2  ;;  %v2846_v7 = vsel %vm2845_vm14, %v7852_v4, %v2844_v24  ;;  %v3536_v37 = vmul.f32 %v5207_v27, %v3535_v42  ;;  %vm2871_vm0 = vcmp.eq.f32.partialorder %v7927_v28, 0.0 }
 0x4b6   : > { %5002 = vst.msk [vmem:[%s7350_s23 + $0x108] sm:$0xff] %vm820_vm1, %v3707_v22  ;;  %v2849_v33 = vsel %vm2847_vm2, %v2848_v19, %v2846_v7  ;;  %v3528_v44 = vmul.f32 %v3527_v11, %v7869_v14 }
 0x4b7   : > { %v2854_v36 = vsub.f32 1.5, %v2853_v34  ;;  %v2796_v25 = vpop.f32.mrf.mxu3  ;;  %v3019_v30 = vmul.f32 %v2849_v33, %v7318_v53  ;;  %v3537_v52 = vmul.f32 0.5, %v3536_v37  ;;  %v4049_v33 = vmul.f32 %v7966_v29, %v7966_v29 }
 0x4b8   : > { %v5209_v3 = vpop.eup %5208  ;;  %v7959_v4 = vadd.f32 %v7788_v45, %v2796_v25  ;;  %v3530_v57 = vsel %vm3529_vm3, %v7869_v14, %v3528_v44  ;;  %v2860_v14 = vand.u32 2147483648, %v7891_v60 }
 0x4b9   : > { %v2855_v12 = vmul.f32 %v5205_v54, %v2854_v36  ;;  %v2863_v48 = vmul.f32 %v5209_v3, %v7927_v28  ;;  %v3035_v53 = vadd.f32 %v7896_v55, %v3019_v30  ;;  %v3533_v59 = vsel %vm3531_vm4, %v3532_v63, %v3530_v57 }
 0x4ba   : > { %5210 = vrsqrt.f32 %v7959_v4  ;;  %v3692_v24 = vmul.f32 %v3533_v59, %v7408_v50  ;;  %v3538_v22 = vsub.f32 1.5, %v3537_v52  ;;  %v7978_v54 = vadd.f32 %v7538_v62, %v3386_v13 }
 0x4bb   : > { %v2856_v19 = vmul.f32 %v2855_v12, %v7891_v60  ;;  %v2864_v11 = vmul.f32 %v5209_v3, %v2863_v48  ;;  %4970 = vst.msk [vmem:[%s7350_s23 + $0x88] sm:$0xff] %vm820_vm1, %v3035_v53  ;;  %v3544_v30 = vand.u32 2147483648, %v7909_v43  ;;  %v4061_v59 = vpack.c.bf16 %v4049_v33, %v7947_v26 }
 0x4bc   : > { %v3708_v41 = vadd.f32 %v7896_v55, %v3692_v24  ;;  %v3539_v34 = vmul.f32 %v5207_v27, %v3538_v22  ;;  %v3411_v63 = vmul.f32 %v7978_v54, %v7978_v54  ;;  %v4024_v22 = vpop.f32.mrf.mxu1  ;;  %vm2881_vm15 = vcmp.eq.f32.partialorder %v7959_v4, inf }
 0x4bd   : > { %v2858_v50 = vsel %vm2857_vm7, %v7891_v60, %v2856_v19  ;;  %v2865_v42 = vmul.f32 0.5, %v2864_v11  ;;  %v3388_v7 = vpop.f32.mrf.mxu2  ;;  %vm2883_vm5 = vcmp.eq.f32.partialorder %v7959_v4, 0.0 }
 0x4be   : > { %v2861_v44 = vsel %vm2859_vm8, %v2860_v14, %v2858_v50  ;;  %v7986_v36 = vadd.f32 %v7538_v62, %v3388_v7  ;;  %5003 = vst.msk [vmem:[%s7350_s23 + $0x110] sm:$0xff] %vm820_vm1, %v3708_v41  ;;  %v3540_v37 = vmul.f32 %v3539_v34, %v7909_v43  ;;  %v9065_v34 = vld [vmem:[#allocation39_spill] sm:$0xff] }
 0x4bf   : > { %v3020_v13 = vmul.f32 %v2861_v44, %v7400_v9  ;;  %v2866_v60 = vsub.f32 1.5, %v2865_v42  ;;  %v2798_v27 = vpop.f32.mrf.mxu3 }
 0x4c0   : > { %v5211_v25 = vpop.eup %5210  ;;  %v3412_v57 = vmul.f32 %v7986_v36, %v7986_v36  ;;  %v7999_v12 = vadd.f32 %v7788_v45, %v2798_v27  ;;  %v3542_v52 = vsel %vm3541_vm9, %v7909_v43, %v3540_v37  ;;  %v2872_v43 = vand.u32 2147483648, %v7927_v28 }
 0x4c1   : > { %v3036_v9 = vadd.f32 %v7896_v55, %v3020_v13  ;;  %v2867_v48 = vmul.f32 %v5209_v3, %v2866_v60  ;;  %v2875_v53 = vmul.f32 %v5211_v25, %v7959_v4  ;;  %v3545_v24 = vsel %vm3543_vm10, %v3544_v30, %v3542_v52 }
 0x4c2   : > { %v3422_v19 = vpack.c.bf16 %v3412_v57, %v3411_v63  ;;  %5212 = vrsqrt.f32 %v7999_v12  ;;  %v3693_v11 = vmul.f32 %v3545_v24, %v7418_v46  ;;  %vm2893_vm6 = vcmp.eq.f32.partialorder %v7999_v12, inf }
 0x4c3   : > { %4971 = vst.msk [vmem:[%s7350_s23 + $0x90] sm:$0xff] %vm820_vm1, %v3036_v9  ;;  %v2868_v14 = vmul.f32 %v2867_v48, %v7927_v28  ;;  %v2876_v41 = vmul.f32 %v5211_v25, %v2875_v53  ;;  %v2884_v48 = vand.u32 2147483648, %v7959_v4  ;;  %vm2895_vm12 = vcmp.eq.f32.partialorder %v7999_v12, 0.0 }
 0x4c4   : > { %4998 = vmatmul.msk.bf16.gmra.mxu0 %vm820_vm1, %v3422_v19  ;;  %5028 = vmatmul.msk.bf16.gmra.mxu3 %vm820_vm1, %v4061_v59  ;;  %v3709_v26 = vadd.f32 %v7896_v55, %v3693_v11  ;;  %v4027_v63 = vpop.f32.mrf.mxu1 }
 0x4c5   : > { %v2870_v3 = vsel %vm2869_vm11, %v7927_v28, %v2868_v14  ;;  %v2877_v50 = vmul.f32 0.5, %v2876_v41  ;;  %v8026_v28 = vadd.f32 %v7538_v62, %v4024_v22 }
 0x4c6   : > { %v2873_v46 = vsel %vm2871_vm0, %v2872_v43, %v2870_v3  ;;  %5004 = vst.msk [vmem:[%s7350_s23 + $0x118] sm:$0xff] %vm820_vm1, %v3709_v26 }
 0x4c7   : > { %v3021_v42 = vmul.f32 %v2873_v46, %v9065_v34  ;;  %v2878_v7 = vsub.f32 1.5, %v2877_v50  ;;  %v2801_v33 = vpop.f32.mrf.mxu3  ;;  %v4051_v24 = vmul.f32 %v8026_v28, %v8026_v28 }
 0x4c8   : > { %v5213_v44 = vpop.eup %5212  ;;  %v8021_v13 = vadd.f32 %v7788_v45, %v2801_v33 }
 0x4c9   : > { %v3037_v37 = vadd.f32 %v7896_v55, %v3021_v42  ;;  %v2879_v60 = vmul.f32 %v5211_v25, %v2878_v7  ;;  %v2887_v27 = vmul.f32 %v5213_v44, %v7999_v12  ;;  %v3468_v30 = vpop.f32.mrf.mxu0  ;;  %v8037_v25 = vadd.f32 %v7538_v62, %v7961_v58 }
 0x4ca   : > { %5214 = vrsqrt.f32 %v8021_v13  ;;  %v8033_v52 = vadd.f32 %v7788_v45, %v3468_v30  ;;  %v2896_v7 = vand.u32 2147483648, %v7999_v12  ;;  %vm2905_vm13 = vcmp.eq.f32.partialorder %v8021_v13, inf }
 0x4cb   : > { %4972 = vst.msk [vmem:[%s7350_s23 + $0x98] sm:$0xff] %vm820_vm1, %v3037_v37  ;;  %v2880_v57 = vmul.f32 %v2879_v60, %v7959_v4  ;;  %v2888_v9 = vmul.f32 %v5213_v44, %v2887_v27  ;;  %v4050_v14 = vmul.f32 %v8037_v25, %v8037_v25  ;;  %vm2907_vm14 = vcmp.eq.f32.partialorder %v8021_v13, 0.0 }
 0x4cc   : > { %5216 = vrsqrt.f32 %v8033_v52  ;;  %vm3553_vm2 = vcmp.eq.f32.partialorder %v8033_v52, inf  ;;  %vm3555_vm3 = vcmp.eq.f32.partialorder %v8033_v52, 0.0 }
 0x4cd   : > { %v2882_v53 = vsel %vm2881_vm15, %v7959_v4, %v2880_v57  ;;  %v2889_v59 = vmul.f32 0.5, %v2888_v9  ;;  %v4062_v50 = vpack.c.bf16 %v4051_v24, %v4050_v14 }
 0x4ce   : > { %v2885_v19 = vsel %vm2883_vm5, %v2884_v48, %v2882_v53 }
 0x4cf   : > { %v3022_v22 = vmul.f32 %v2885_v19, %v7462_v31  ;;  %v2890_v62 = vsub.f32 1.5, %v2889_v59  ;;  %v2803_v58 = vpop.f32.mrf.mxu3  ;;  %v8075_v19 = vld [vmem:[%s8776_s4] ss:$0 sm:$0xff] }
 0x4d0   : > { %v5215_v11 = vpop.eup %5214  ;;  %v8050_v41 = vadd.f32 %v7788_v45, %v2803_v58 }
 0x4d1   : > { %v3038_v4 = vadd.f32 %v7896_v55, %v3022_v22  ;;  %v2891_v43 = vmul.f32 %v5213_v44, %v2890_v62  ;;  %v2899_v26 = vmul.f32 %v5215_v11, %v8021_v13  ;;  %v3470_v3 = vpop.f32.mrf.mxu0  ;;  %v4029_v44 = vpop.f32.mrf.mxu1 }
 0x4d2   : > { %5218 = vrsqrt.f32 %v8050_v41  ;;  %v5217_v46 = vpop.eup %5216  ;;  %v8059_v42 = vadd.f32 %v7788_v45, %v3470_v3  ;;  %v8083_v58 = vadd.f32 %v8075_v19, %v4029_v44  ;;  %vm2917_vm4 = vcmp.eq.f32.partialorder %v8050_v41, inf }
 0x4d3   : > { %4973 = vst.msk [vmem:[%s7350_s23 + $0xa0] sm:$0xff] %vm820_vm1, %v3038_v4  ;;  %v2892_v31 = vmul.f32 %v2891_v43, %v7999_v12  ;;  %v2900_v34 = vmul.f32 %v5215_v11, %v2899_v26  ;;  %v3547_v33 = vmul.f32 %v5217_v46, %v8033_v52  ;;  %vm2919_vm7 = vcmp.eq.f32.partialorder %v8050_v41, 0.0 }
 0x4d4   : > { %5029 = vmatmul.msk.bf16.gmra.mxu3 %vm820_vm1, %v4062_v50  ;;  %5220 = vrsqrt.f32 %v8059_v42  ;;  %v4053_v44 = vmul.f32 %v8083_v58, %v8083_v58  ;;  %vm3565_vm8 = vcmp.eq.f32.partialorder %v8059_v42, inf  ;;  %vm3567_vm9 = vcmp.eq.f32.partialorder %v8059_v42, 0.0 }
 0x4d5   : > { %v2894_v37 = vsel %vm2893_vm6, %v7999_v12, %v2892_v31  ;;  %v2901_v60 = vmul.f32 0.5, %v2900_v34  ;;  %v3548_v30 = vmul.f32 %v5217_v46, %v3547_v33  ;;  %v8078_v12 = vadd.f32 %v8075_v19, %v4027_v63 }
 0x4d6   : > { %v2897_v27 = vsel %vm2895_vm12, %v2896_v7, %v2894_v37  ;;  %v2908_v63 = vand.u32 2147483648, %v8021_v13 }
 0x4d7   : > { %v3023_v57 = vmul.f32 %v2897_v27, %v7466_v35  ;;  %v2902_v9 = vsub.f32 1.5, %v2901_v60  ;;  %v2806_v48 = vpop.f32.mrf.mxu3  ;;  %v3549_v59 = vmul.f32 0.5, %v3548_v30  ;;  %v4052_v50 = vmul.f32 %v8078_v12, %v8078_v12 }
 0x4d8   : > { %v5219_v53 = vpop.eup %5218  ;;  %v8070_v24 = vadd.f32 %v7788_v45, %v2806_v48  ;;  %v3556_v30 = vand.u32 2147483648, %v8033_v52 }
 0x4d9   : > { %v3039_v22 = vadd.f32 %v7896_v55, %v3023_v57  ;;  %v2903_v62 = vmul.f32 %v5215_v11, %v2902_v9  ;;  %v2911_v35 = vmul.f32 %v5219_v53, %v8050_v41  ;;  %v3550_v14 = vsub.f32 1.5, %v3549_v59  ;;  %v8096_v7 = vpop.f32.mrf.mxu1 }
 0x4da   : > { %5222 = vrsqrt.f32 %v8070_v24  ;;  %v5221_v4 = vpop.eup %5220  ;;  %vm2929_vm10 = vcmp.eq.f32.partialorder %v8070_v24, inf  ;;  %vm2931_vm11 = vcmp.eq.f32.partialorder %v8070_v24, 0.0 }
 0x4db   : > { %4974 = vst.msk [vmem:[%s7350_s23 + $0xa8] sm:$0xff] %vm820_vm1, %v3039_v22  ;;  %v2904_v43 = vmul.f32 %v2903_v62, %v8021_v13  ;;  %v2912_v26 = vmul.f32 %v5219_v53, %v2911_v35  ;;  %v3551_v3 = vmul.f32 %v5217_v46, %v3550_v14  ;;  %v3559_v11 = vmul.f32 %v5221_v4, %v8059_v42 }
 0x4dd   : > { %v2906_v31 = vsel %vm2905_vm13, %v8021_v13, %v2904_v43  ;;  %v2913_v34 = vmul.f32 0.5, %v2912_v26  ;;  %v3552_v60 = vmul.f32 %v3551_v3, %v8033_v52  ;;  %v3560_v46 = vmul.f32 %v5221_v4, %v3559_v11 }
 0x4de   : > { %v3391_v33 = vpop.f32.mrf.mxu2  ;;  %v2909_v37 = vsel %vm2907_vm14, %v2908_v63, %v2906_v31  ;;  %v4063_v43 = vpack.c.bf16 %v4053_v44, %v4052_v50 }
 0x4df   : > { %v3024_v27 = vmul.f32 %v2909_v37, %v7519_v18  ;;  %v2914_v57 = vsub.f32 1.5, %v2913_v34  ;;  %v2808_v13 = vpop.f32.mrf.mxu3  ;;  %v3554_v48 = vsel %vm3553_vm2, %v8033_v52, %v3552_v60  ;;  %v3561_v59 = vmul.f32 0.5, %v3560_v46 }
 0x4e0   : > { %v5223_v9 = vpop.eup %5222  ;;  %v8107_v22 = vadd.f32 %v7788_v45, %v2808_v13  ;;  %v3557_v35 = vsel %vm3555_vm3, %v3556_v30, %v3554_v48  ;;  %v8120_v50 = vadd.f32 %v8075_v19, %v3391_v33  ;;  %v3568_v46 = vand.u32 2147483648, %v8059_v42 }
 0x4e1   : > { %v3040_v62 = vadd.f32 %v7896_v55, %v3024_v27  ;;  %v2915_v18 = vmul.f32 %v5219_v53, %v2914_v57  ;;  %v2923_v14 = vmul.f32 %v5223_v9, %v8070_v24  ;;  %v3694_v26 = vmul.f32 %v3557_v35, %v7541_v0 }
 0x4e2   : > { %v3562_v63 = vsub.f32 1.5, %v3561_v59  ;;  %5224 = vrsqrt.f32 %v8107_v22  ;;  %v2920_v53 = vand.u32 2147483648, %v8050_v41  ;;  %v3413_v48 = vmul.f32 %v8120_v50, %v8120_v50 }
 0x4e3   : > { %4975 = vst.msk [vmem:[%s7350_s23 + $0xb0] sm:$0xff] %vm820_vm1, %v3040_v62  ;;  %v2916_v52 = vmul.f32 %v2915_v18, %v8050_v41  ;;  %v2924_v3 = vmul.f32 %v5223_v9, %v2923_v14  ;;  %v3710_v11 = vadd.f32 %v7896_v55, %v3694_v26  ;;  %vm2941_vm0 = vcmp.eq.f32.partialorder %v8107_v22, inf }
 0x4e4   : > { %v3563_v31 = vmul.f32 %v5221_v4, %v3562_v63  ;;  %5030 = vmatmul.msk.bf16.gmra.mxu3 %vm820_vm1, %v4063_v43  ;;  %vm2943_vm15 = vcmp.eq.f32.partialorder %v8107_v22, 0.0 }
 0x4e5   : > { %v2918_v0 = vsel %vm2917_vm4, %v8050_v41, %v2916_v52  ;;  %v2925_v34 = vmul.f32 0.5, %v2924_v3  ;;  %5005 = vst.msk [vmem:[%s7350_s23 + $0x120] sm:$0xff] %vm820_vm1, %v3710_v11  ;;  %v4034_v41 = vpop.f32.mrf.mxu1 }
 0x4e6   : > { %v3393_v44 = vpop.f32.mrf.mxu2  ;;  %v2921_v37 = vsel %vm2919_vm7, %v2920_v53, %v2918_v0  ;;  %v3564_v60 = vmul.f32 %v3563_v31, %v8059_v42 }
 0x4e7   : > { %v8130_v4 = vadd.f32 %v8075_v19, %v3393_v44  ;;  %v3025_v33 = vmul.f32 %v2921_v37, %v7515_v1  ;;  %v2926_v27 = vsub.f32 1.5, %v2925_v34  ;;  %v2811_v30 = vpop.f32.mrf.mxu3 }
 0x4e8   : > { %v5225_v57 = vpop.eup %5224  ;;  %v3566_v13 = vsel %vm3565_vm8, %v8059_v42, %v3564_v60  ;;  %v8141_v62 = vadd.f32 %v7788_v45, %v2811_v30  ;;  %v8147_v42 = vadd.f32 %v8075_v19, %v4034_v41 }
 0x4e9   : > { %v3414_v59 = vmul.f32 %v8130_v4, %v8130_v4  ;;  %v3041_v1 = vadd.f32 %v7896_v55, %v3025_v33  ;;  %v3569_v35 = vsel %vm3567_vm9, %v3568_v46, %v3566_v13  ;;  %v2927_v18 = vmul.f32 %v5223_v9, %v2926_v27 }
 0x4ea   : > { %v2935_v14 = vmul.f32 %v5225_v57, %v8107_v22  ;;  %v3695_v43 = vmul.f32 %v3569_v35, %v7545_v56  ;;  %5226 = vrsqrt.f32 %v8141_v62  ;;  %v2932_v9 = vand.u32 2147483648, %v8070_v24 }
 0x4eb   : > { %v3423_v26 = vpack.c.bf16 %v3414_v59, %v3413_v48  ;;  %4976 = vst.msk [vmem:[%s7350_s23 + $0xb8] sm:$0xff] %vm820_vm1, %v3041_v1  ;;  %v2928_v63 = vmul.f32 %v2927_v18, %v8070_v24  ;;  %v8158_v56 = vadd.f32 %v8075_v19, %v8096_v7  ;;  %v4055_v0 = vmul.f32 %v8147_v42, %v8147_v42 }
 0x4ec   : > { %v2936_v52 = vmul.f32 %v5225_v57, %v2935_v14  ;;  %v3711_v3 = vadd.f32 %v7896_v55, %v3695_v43  ;;  %v2944_v59 = vand.u32 2147483648, %v8107_v22  ;;  %vm2953_vm5 = vcmp.eq.f32.partialorder %v8141_v62, inf }
 0x4ed   : > { %4999 = vmatmul.msk.bf16.gmra.mxu0 %vm820_vm1, %v3423_v26  ;;  %v2930_v11 = vsel %vm2929_vm10, %v8070_v24, %v2928_v63  ;;  %v4054_v60 = vmul.f32 %v8158_v56, %v8158_v56  ;;  %vm2955_vm6 = vcmp.eq.f32.partialorder %v8141_v62, 0.0 }
 0x4ee   : > { %v2937_v53 = vmul.f32 0.5, %v2936_v52  ;;  %5006 = vst.msk [vmem:[%s7350_s23 + $0x128] sm:$0xff] %vm820_vm1, %v3711_v3  ;;  %v2933_v31 = vsel %vm2931_vm11, %v2932_v9, %v2930_v11 }
 0x4ef   : > { %v3026_v34 = vmul.f32 %v2933_v31, %v7567_v17  ;;  %v2813_v37 = vpop.f32.mrf.mxu3  ;;  %v4064_v30 = vpack.c.bf16 %v4055_v0, %v4054_v60  ;;  %v2956_v0 = vand.u32 2147483648, %v8141_v62 }
 0x4f0   : > { %v2938_v44 = vsub.f32 1.5, %v2937_v53  ;;  %v5227_v7 = vpop.eup %5226  ;;  %v8171_v33 = vadd.f32 %v7788_v45, %v2813_v37 }
 0x4f1   : > { %v3042_v24 = vadd.f32 %v7896_v55, %v3026_v34  ;;  %v2947_v27 = vmul.f32 %v5227_v7, %v8141_v62  ;;  %v3473_v41 = vpop.f32.mrf.mxu0 }
 0x4f2   : > { %v2939_v46 = vmul.f32 %v5225_v57, %v2938_v44  ;;  %5228 = vrsqrt.f32 %v8171_v33  ;;  %v8180_v48 = vadd.f32 %v7788_v45, %v3473_v41  ;;  %vm2965_vm12 = vcmp.eq.f32.partialorder %v8171_v33, inf }
 0x4f3   : > { %4977 = vst.msk [vmem:[%s7350_s23 + $0xc0] sm:$0xff] %vm820_vm1, %v3042_v24  ;;  %v2948_v13 = vmul.f32 %v5227_v7, %v2947_v27  ;;  %vm2967_vm13 = vcmp.eq.f32.partialorder %v8171_v33, 0.0 }
 0x4f4   : > { %v2940_v17 = vmul.f32 %v2939_v46, %v8107_v22  ;;  %5031 = vmatmul.msk.bf16.gmra.mxu3 %vm820_vm1, %v4064_v30  ;;  %5230 = vrsqrt.f32 %v8180_v48  ;;  %vm3577_vm14 = vcmp.eq.f32.partialorder %v8180_v48, inf  ;;  %vm3579_vm2 = vcmp.eq.f32.partialorder %v8180_v48, 0.0 }
 0x4f5   : > { %v2949_v1 = vmul.f32 0.5, %v2948_v13 }
 0x4f6   : > { %v2942_v57 = vsel %vm2941_vm0, %v8107_v22, %v2940_v17 }
 0x4f7   : > { %v2945_v35 = vsel %vm2943_vm15, %v2944_v59, %v2942_v57  ;;  %v2950_v14 = vsub.f32 1.5, %v2949_v1  ;;  %v2816_v43 = vpop.f32.mrf.mxu3 }
 0x4f8   : > { %v3027_v18 = vmul.f32 %v2945_v35, %v7557_v23  ;;  %v5229_v26 = vpop.eup %5228  ;;  %v8190_v63 = vadd.f32 %v7788_v45, %v2816_v43 }
 0x4f9   : > { %v2951_v3 = vmul.f32 %v5227_v7, %v2950_v14  ;;  %v2959_v9 = vmul.f32 %v5229_v26, %v8171_v33  ;;  %v3475_v11 = vpop.f32.mrf.mxu0  ;;  %v2968_v14 = vand.u32 2147483648, %v8171_v33 }
 0x4fa   : > { %v3043_v52 = vadd.f32 %v7896_v55, %v3027_v18  ;;  %5232 = vrsqrt.f32 %v8190_v63  ;;  %v5231_v22 = vpop.eup %5230  ;;  %v8199_v31 = vadd.f32 %v7788_v45, %v3475_v11  ;;  %vm2977_vm3 = vcmp.eq.f32.partialorder %v8190_v63, inf }
 0x4fb   : > { %v2952_v53 = vmul.f32 %v2951_v3, %v8141_v62  ;;  %v2960_v23 = vmul.f32 %v5229_v26, %v2959_v9  ;;  %v3571_v34 = vmul.f32 %v5231_v22, %v8180_v48  ;;  %vm2979_vm4 = vcmp.eq.f32.partialorder %v8190_v63, 0.0 }
 0x4fc   : > { %4978 = vst.msk [vmem:[%s7350_s23 + $0xc8] sm:$0xff] %vm820_vm1, %v3043_v52  ;;  %5234 = vrsqrt.f32 %v8199_v31  ;;  %vm3589_vm7 = vcmp.eq.f32.partialorder %v8199_v31, inf  ;;  %vm3591_vm8 = vcmp.eq.f32.partialorder %v8199_v31, 0.0 }
 0x4fd   : > { %v2954_v44 = vsel %vm2953_vm5, %v8141_v62, %v2952_v53  ;;  %v2961_v37 = vmul.f32 0.5, %v2960_v23  ;;  %v3572_v60 = vmul.f32 %v5231_v22, %v3571_v34 }
 0x4fe   : > { %v2957_v7 = vsel %vm2955_vm6, %v2956_v0, %v2954_v44 }
 0x4ff   : > { %v4037_v24 = vpop.f32.mrf.mxu1  ;;  %v3028_v46 = vmul.f32 %v2957_v7, %v7634_v21  ;;  %v2962_v27 = vsub.f32 1.5, %v2961_v37  ;;  %v2818_v41 = vpop.f32.mrf.mxu3  ;;  %v3573_v17 = vmul.f32 0.5, %v3572_v60 }
 0x500   : > { %v5233_v30 = vpop.eup %5232  ;;  %v8209_v13 = vadd.f32 %v7788_v45, %v2818_v41  ;;  %v8228_v37 = vadd.f32 %v8075_v19, %v4037_v24 }
 0x501   : > { %v3044_v59 = vadd.f32 %v7896_v55, %v3028_v46  ;;  %v2963_v57 = vmul.f32 %v5229_v26, %v2962_v27  ;;  %v2971_v62 = vmul.f32 %v5233_v30, %v8190_v63  ;;  %v3574_v1 = vsub.f32 1.5, %v3573_v17 }
 0x502   : > { %5236 = vrsqrt.f32 %v8209_v13  ;;  %v5235_v35 = vpop.eup %5234  ;;  %vm2989_vm9 = vcmp.eq.f32.partialorder %v8209_v13, inf  ;;  %vm2991_vm10 = vcmp.eq.f32.partialorder %v8209_v13, 0.0 }
 0x503   : > { %4979 = vst.msk [vmem:[%s7350_s23 + $0xd0] sm:$0xff] %vm820_vm1, %v3044_v59  ;;  %v2964_v21 = vmul.f32 %v2963_v57, %v8171_v33  ;;  %v2972_v18 = vmul.f32 %v5233_v30, %v2971_v62  ;;  %v3575_v43 = vmul.f32 %v5231_v22, %v3574_v1  ;;  %v3583_v52 = vmul.f32 %v5235_v35, %v8199_v31 }
 0x504   : > { %v3580_v22 = vand.u32 2147483648, %v8180_v48 }
 0x505   : > { %v2966_v26 = vsel %vm2965_vm12, %v8171_v33, %v2964_v21  ;;  %v2973_v3 = vmul.f32 0.5, %v2972_v18  ;;  %v3576_v11 = vmul.f32 %v3575_v43, %v8180_v48  ;;  %v3584_v53 = vmul.f32 %v5235_v35, %v3583_v52 }
 0x506   : > { %v2969_v9 = vsel %vm2967_vm13, %v2968_v14, %v2966_v26  ;;  %v3396_v23 = vpop.f32.mrf.mxu2  ;;  %v4056_v18 = vmul.f32 %v8228_v37, %v8228_v37 }
 0x507   : > { %v4039_v0 = vpop.f32.mrf.mxu1  ;;  %v3029_v34 = vmul.f32 %v2969_v9, %v7624_v10  ;;  %v2974_v44 = vsub.f32 1.5, %v2973_v3  ;;  %v2821_v33 = vpop.f32.mrf.mxu3  ;;  %v3578_v60 = vsel %vm3577_vm14, %v8180_v48, %v3576_v11  ;;  %v3585_v46 = vmul.f32 0.5, %v3584_v53 }
 0x508   : > { %v5237_v7 = vpop.eup %5236  ;;  %v8232_v27 = vadd.f32 %v7788_v45, %v2821_v33  ;;  %v8235_v41 = vadd.f32 %v8075_v19, %v4039_v0  ;;  %v3581_v17 = vsel %vm3579_vm2, %v3580_v22, %v3578_v60  ;;  %v2980_v48 = vand.u32 2147483648, %v8190_v63 }
 0x509   : > { %v3045_v10 = vadd.f32 %v7896_v55, %v3029_v34  ;;  %v2975_v59 = vmul.f32 %v5233_v30, %v2974_v44  ;;  %v2983_v57 = vmul.f32 %v5237_v7, %v8209_v13  ;;  %v3696_v24 = vmul.f32 %v3581_v17, %v7686_v61 }
 0x50a   : > { %v3586_v62 = vsub.f32 1.5, %v3585_v46  ;;  %5238 = vrsqrt.f32 %v8232_v27  ;;  %v4057_v61 = vmul.f32 %v8235_v41, %v8235_v41  ;;  %v3592_v53 = vand.u32 2147483648, %v8199_v31 }
 0x50b   : > { %4980 = vst.msk [vmem:[%s7350_s23 + $0xd8] sm:$0xff] %vm820_vm1, %v3045_v10  ;;  %v2976_v45 = vmul.f32 %v2975_v59, %v8190_v63  ;;  %v2984_v1 = vmul.f32 %v5237_v7, %v2983_v57  ;;  %v3712_v21 = vadd.f32 %v7896_v55, %v3696_v24  ;;  %v2992_v24 = vand.u32 2147483648, %v8209_v13 }
 0x50c   : > { %v3587_v30 = vmul.f32 %v5235_v35, %v3586_v62  ;;  %v8258_v35 = vadd.f32 %v8075_v19, %v3396_v23  ;;  %v4065_v3 = vpack.c.bf16 %v4057_v61, %v4056_v18  ;;  %v8271_v23 = vld [vmem:[%s8778_s6] ss:$0 sm:$0xff]  ;;  %vm3001_vm11 = vcmp.eq.f32.partialorder %v8232_v27, inf }
 0x50d   : > { %v2978_v14 = vsel %vm2977_vm3, %v8190_v63, %v2976_v45  ;;  %v2985_v43 = vmul.f32 0.5, %v2984_v1  ;;  %5007 = vst.msk [vmem:[%s7350_s23 + $0x130] sm:$0xff] %vm820_vm1, %v3712_v21  ;;  %vm3003_vm0 = vcmp.eq.f32.partialorder %v8232_v27, 0.0 }
 0x50e   : > { %v2981_v52 = vsel %vm2979_vm4, %v2980_v48, %v2978_v14  ;;  %v3588_v26 = vmul.f32 %v3587_v30, %v8199_v31  ;;  %v3398_v9 = vpop.f32.mrf.mxu2  ;;  %5032 = vmatmul.msk.bf16.gmra.mxu3 %vm820_vm1, %v4065_v3 }
 0x50f   : > { %v3030_v11 = vmul.f32 %v2981_v52, %v7680_v39  ;;  %v2986_v0 = vsub.f32 1.5, %v2985_v43  ;;  %v8263_v63 = vadd.f32 %v8075_v19, %v3398_v9  ;;  %v2823_v34 = vpop.f32.mrf.mxu3  ;;  %v3004_v9 = vand.u32 2147483648, %v8232_v27 }
 0x510   : > { %v5239_v22 = vpop.eup %5238  ;;  %v3590_v44 = vsel %vm3589_vm7, %v8199_v31, %v3588_v26  ;;  %v8274_v39 = vadd.f32 %v8271_v23, %v2823_v34  ;;  %v3415_v31 = vmul.f32 %v8258_v35, %v8258_v35 }
 0x511   : > { %v3046_v19 = vadd.f32 %v7896_v55, %v3030_v11  ;;  %v3593_v33 = vsel %vm3591_vm8, %v3592_v53, %v3590_v44  ;;  %v2987_v60 = vmul.f32 %v5237_v7, %v2986_v0  ;;  %v2995_v46 = vmul.f32 %v5239_v22, %v8232_v27 }
 0x512   : > { %v3697_v10 = vmul.f32 %v3593_v33, %v7695_v6  ;;  %v3416_v17 = vmul.f32 %v8263_v63, %v8263_v63  ;;  %5240 = vrsqrt.f32 %v8274_v39  ;;  %vm3013_vm15 = vcmp.eq.f32.partialorder %v8274_v39, inf }
 0x513   : > { %4981 = vst.msk [vmem:[%s7350_s23 + $0xe0] sm:$0xff] %vm820_vm1, %v3046_v19  ;;  %v2988_v59 = vmul.f32 %v2987_v60, %v8209_v13  ;;  %v2996_v57 = vmul.f32 %v5239_v22, %v2995_v46  ;;  %vm3015_vm5 = vcmp.eq.f32.partialorder %v8274_v39, 0.0 }
 0x514   : > { %v3713_v7 = vadd.f32 %v7896_v55, %v3697_v10  ;;  %v3424_v6 = vpack.c.bf16 %v3416_v17, %v3415_v31 }
 0x515   : > { %v2990_v62 = vsel %vm2989_vm9, %v8209_v13, %v2988_v59  ;;  %v2997_v45 = vmul.f32 0.5, %v2996_v57  ;;  %v3016_v57 = vand.u32 2147483648, %v8274_v39 }
 0x516   : > { %5008 = vst.msk [vmem:[%s7350_s23 + $0x138] sm:$0xff] %vm820_vm1, %v3713_v7  ;;  %v2993_v48 = vsel %vm2991_vm10, %v2992_v24, %v2990_v62  ;;  %5000 = vmatmul.msk.bf16.gmra.mxu0 %vm820_vm1, %v3424_v6 }
 0x517   : > { %v3031_v1 = vmul.f32 %v2993_v48, %v7674_v8  ;;  %v2998_v21 = vsub.f32 1.5, %v2997_v45  ;;  %v4099_v30 = vpop.f32.mrf.mxu3 }
 0x518   : > { %v5241_v18 = vpop.eup %5240  ;;  %v8297_v61 = vadd.f32 %v8271_v23, %v4099_v30 }
 0x519   : > { %v3047_v14 = vadd.f32 %v7896_v55, %v3031_v1  ;;  %v2999_v43 = vmul.f32 %v5239_v22, %v2998_v21  ;;  %v3007_v52 = vmul.f32 %v5241_v18, %v8274_v39  ;;  %v3478_v13 = vpop.f32.mrf.mxu0 }
 0x51a   : > { %5242 = vrsqrt.f32 %v8297_v61  ;;  %v8306_v8 = vadd.f32 %v8271_v23, %v3478_v13  ;;  %vm4146_vm6 = vcmp.eq.f32.partialorder %v8297_v61, inf  ;;  %vm4148_vm12 = vcmp.eq.f32.partialorder %v8297_v61, 0.0 }
 0x51b   : > { %4982 = vst.msk [vmem:[%s7350_s23 + $0xe8] sm:$0xff] %vm820_vm1, %v3047_v14  ;;  %v3000_v26 = vmul.f32 %v2999_v43, %v8232_v27  ;;  %v3008_v3 = vmul.f32 %v5241_v18, %v3007_v52 }
 0x51c   : > { %5244 = vrsqrt.f32 %v8306_v8  ;;  %vm3601_vm13 = vcmp.eq.f32.partialorder %v8306_v8, inf  ;;  %vm3603_vm14 = vcmp.eq.f32.partialorder %v8306_v8, 0.0 }
 0x51d   : > { %v3002_v11 = vsel %vm3001_vm11, %v8232_v27, %v3000_v26  ;;  %v3009_v53 = vmul.f32 0.5, %v3008_v3 }
 0x51e   : > { %v3005_v0 = vsel %vm3003_vm0, %v3004_v9, %v3002_v11  ;;  %v4149_v9 = vand.u32 2147483648, %v8297_v61 }
 0x51f   : > { %v3032_v34 = vmul.f32 %v3005_v0, %v7740_v5  ;;  %v3010_v22 = vsub.f32 1.5, %v3009_v53  ;;  %v4101_v44 = vpop.f32.mrf.mxu3 }
 0x520   : > { %v5243_v19 = vpop.eup %5242  ;;  %v8315_v33 = vadd.f32 %v8271_v23, %v4101_v44 }
 0x521   : > { %v3048_v60 = vadd.f32 %v7896_v55, %v3032_v34  ;;  %v3011_v46 = vmul.f32 %v5241_v18, %v3010_v22  ;;  %v4140_v10 = vmul.f32 %v5243_v19, %v8297_v61  ;;  %v3480_v27 = vpop.f32.mrf.mxu0 }
 0x522   : > { %5246 = vrsqrt.f32 %v8315_v33  ;;  %v5245_v31 = vpop.eup %5244  ;;  %v8324_v59 = vadd.f32 %v8271_v23, %v3480_v27  ;;  %vm4158_vm2 = vcmp.eq.f32.partialorder %v8315_v33, inf  ;;  %vm4160_vm3 = vcmp.eq.f32.partialorder %v8315_v33, 0.0 }
 0x523   : > { %4983 = vst.msk [vmem:[%s7350_s23 + $0xf0] sm:$0xff] %vm820_vm1, %v3048_v60  ;;  %v3012_v17 = vmul.f32 %v3011_v46, %v8274_v39  ;;  %v4141_v5 = vmul.f32 %v5243_v19, %v4140_v10  ;;  %v3595_v7 = vmul.f32 %v5245_v31, %v8306_v8  ;;  %v3604_v60 = vand.u32 2147483648, %v8306_v8 }
 0x524   : > { %5248 = vrsqrt.f32 %v8324_v59  ;;  %vm3613_vm4 = vcmp.eq.f32.partialorder %v8324_v59, inf  ;;  %vm3615_vm7 = vcmp.eq.f32.partialorder %v8324_v59, 0.0 }
 0x525   : > { %v3014_v24 = vsel %vm3013_vm15, %v8274_v39, %v3012_v17  ;;  %v4142_v6 = vmul.f32 0.5, %v4141_v5  ;;  %v3596_v45 = vmul.f32 %v5245_v31, %v3595_v7 }
 0x526   : > { %v3017_v62 = vsel %vm3015_vm5, %v3016_v57, %v3014_v24 }
 0x527   : > { %v3033_v48 = vmul.f32 %v3017_v62, %v7731_v2  ;;  %v4143_v1 = vsub.f32 1.5, %v4142_v6  ;;  %v4104_v21 = vpop.f32.mrf.mxu3  ;;  %v3597_v18 = vmul.f32 0.5, %v3596_v45 }
 0x528   : > { %v5247_v30 = vpop.eup %5246  ;;  %v8334_v14 = vadd.f32 %v8271_v23, %v4104_v21 }
 0x529   : > { %v3049_v43 = vadd.f32 %v7896_v55, %v3033_v48  ;;  %v4144_v52 = vmul.f32 %v5243_v19, %v4143_v1  ;;  %v4152_v39 = vmul.f32 %v5247_v30, %v8315_v33  ;;  %v3598_v13 = vsub.f32 1.5, %v3597_v18 }
 0x52a   : > { %5250 = vrsqrt.f32 %v8334_v14  ;;  %v5249_v26 = vpop.eup %5248  ;;  %v4161_v1 = vand.u32 2147483648, %v8315_v33  ;;  %vm4170_vm8 = vcmp.eq.f32.partialorder %v8334_v14, inf  ;;  %vm4172_vm9 = vcmp.eq.f32.partialorder %v8334_v14, 0.0 }
 0x52b   : > { %4984 = vst.msk [vmem:[%s7350_s23 + $0xf8] sm:$0xff] %vm820_vm1, %v3049_v43  ;;  %v4145_v2 = vmul.f32 %v4144_v52, %v8297_v61  ;;  %v4153_v3 = vmul.f32 %v5247_v30, %v4152_v39  ;;  %v3599_v11 = vmul.f32 %v5245_v31, %v3598_v13  ;;  %v3607_v53 = vmul.f32 %v5249_v26, %v8324_v59 }
 0x52c   : > { %v3616_v39 = vand.u32 2147483648, %v8324_v59 }
 0x52d   : > { %v4147_v55 = vsel %vm4146_vm6, %v8297_v61, %v4145_v2  ;;  %v4154_v0 = vmul.f32 0.5, %v4153_v3  ;;  %v3600_v22 = vmul.f32 %v3599_v11, %v8306_v8  ;;  %v3608_v44 = vmul.f32 %v5249_v26, %v3607_v53 }
 0x52e   : > { %v4150_v34 = vsel %vm4148_vm12, %v4149_v9, %v4147_v55 }
 0x52f   : > { %v4331_v19 = vmul.f32 %v4150_v34, %v7777_v20  ;;  %v4155_v46 = vsub.f32 1.5, %v4154_v0  ;;  %v4106_v10 = vpop.f32.mrf.mxu3  ;;  %v3602_v31 = vsel %vm3601_vm13, %v8306_v8, %v3600_v22  ;;  %v3609_v61 = vmul.f32 0.5, %v3608_v44  ;;  %v8359_v20 = vld [vmem:[%s8780_s8] ss:$0 sm:$0xff] }
 0x530   : > { %v5251_v27 = vpop.eup %5250  ;;  %v8354_v17 = vadd.f32 %v8271_v23, %v4106_v10  ;;  %v3605_v57 = vsel %vm3603_vm14, %v3604_v60, %v3602_v31  ;;  %v4173_v22 = vand.u32 2147483648, %v8334_v14 }
 0x531   : > { %v4347_v5 = vadd.f32 %v8359_v20, %v4331_v19  ;;  %v4156_v7 = vmul.f32 %v5247_v30, %v4155_v46  ;;  %v4164_v24 = vmul.f32 %v5251_v27, %v8334_v14  ;;  %v3698_v6 = vmul.f32 %v3605_v57, %v7808_v38 }
 0x532   : > { %v3610_v62 = vsub.f32 1.5, %v3609_v61  ;;  %5252 = vrsqrt.f32 %v8354_v17  ;;  %vm4182_vm10 = vcmp.eq.f32.partialorder %v8354_v17, inf  ;;  %vm4184_vm11 = vcmp.eq.f32.partialorder %v8354_v17, 0.0 }
 0x533   : > { %5033 = vst.msk [vmem:[%s7350_s23 + $0x180] sm:$0xff] %vm820_vm1, %v4347_v5  ;;  %v4157_v8 = vmul.f32 %v4156_v7, %v8315_v33  ;;  %v4165_v45 = vmul.f32 %v5251_v27, %v4164_v24  ;;  %v3714_v48 = vadd.f32 %v8359_v20, %v3698_v6  ;;  %v4185_v6 = vand.u32 2147483648, %v8354_v17 }
 0x534   : > { %v3611_v21 = vmul.f32 %v5249_v26, %v3610_v62 }
 0x535   : > { %v4159_v30 = vsel %vm4158_vm2, %v8315_v33, %v4157_v8  ;;  %v4166_v38 = vmul.f32 0.5, %v4165_v45  ;;  %5009 = vst.msk [vmem:[%s7350_s23 + $0x140] sm:$0xff] %vm820_vm1, %v3714_v48 }
 0x536   : > { %v4162_v18 = vsel %vm4160_vm3, %v4161_v1, %v4159_v30  ;;  %v3612_v43 = vmul.f32 %v3611_v21, %v8324_v59 }
 0x537   : > { %v4332_v52 = vmul.f32 %v4162_v18, %v7772_v32  ;;  %v4167_v13 = vsub.f32 1.5, %v4166_v38  ;;  %v4109_v2 = vpop.f32.mrf.mxu3 }
 0x538   : > { %v5253_v26 = vpop.eup %5252  ;;  %v3614_v3 = vsel %vm3613_vm4, %v8324_v59, %v3612_v43  ;;  %v8382_v33 = vadd.f32 %v8271_v23, %v4109_v2 }
 0x539   : > { %v4348_v9 = vadd.f32 %v8359_v20, %v4332_v52  ;;  %v3617_v11 = vsel %vm3615_vm7, %v3616_v39, %v3614_v3  ;;  %v4168_v53 = vmul.f32 %v5251_v27, %v4167_v13  ;;  %v4176_v32 = vmul.f32 %v5253_v26, %v8354_v17 }
 0x53a   : > { %v3699_v55 = vmul.f32 %v3617_v11, %v7813_v15  ;;  %5254 = vrsqrt.f32 %v8382_v33  ;;  %vm4194_vm0 = vcmp.eq.f32.partialorder %v8382_v33, inf  ;;  %vm4196_vm15 = vcmp.eq.f32.partialorder %v8382_v33, 0.0 }
 0x53b   : > { %5034 = vst.msk [vmem:[%s7350_s23 + $0x188] sm:$0xff] %vm820_vm1, %v4348_v9  ;;  %v4169_v0 = vmul.f32 %v4168_v53, %v8334_v14  ;;  %v4177_v34 = vmul.f32 %v5253_v26, %v4176_v32 }
 0x53c   : > { %v3715_v59 = vadd.f32 %v8359_v20, %v3699_v55 }
 0x53d   : > { %v4171_v44 = vsel %vm4170_vm8, %v8334_v14, %v4169_v0  ;;  %v4178_v19 = vmul.f32 0.5, %v4177_v34 }
 0x53e   : > { %5010 = vst.msk [vmem:[%s7350_s23 + $0x148] sm:$0xff] %vm820_vm1, %v3715_v59  ;;  %v4174_v15 = vsel %vm4172_vm9, %v4173_v22, %v4171_v44 }
 0x53f   : > { %v4333_v60 = vmul.f32 %v4174_v15, %v7832_v49  ;;  %v4179_v46 = vsub.f32 1.5, %v4178_v19  ;;  %v4111_v10 = vpop.f32.mrf.mxu3 }
 0x540   : > { %v5255_v27 = vpop.eup %5254  ;;  %v8400_v31 = vadd.f32 %v8271_v23, %v4111_v10 }
 0x541   : > { %v4349_v61 = vadd.f32 %v8359_v20, %v4333_v60  ;;  %v4180_v5 = vmul.f32 %v5253_v26, %v4179_v46  ;;  %v4188_v57 = vmul.f32 %v5255_v27, %v8382_v33  ;;  %v3483_v7 = vpop.f32.mrf.mxu0  ;;  %v4197_v26 = vand.u32 2147483648, %v8382_v33 }
 0x542   : > { %5256 = vrsqrt.f32 %v8400_v31  ;;  %v8409_v49 = vadd.f32 %v8271_v23, %v3483_v7  ;;  %vm4206_vm5 = vcmp.eq.f32.partialorder %v8400_v31, inf  ;;  %vm4208_vm6 = vcmp.eq.f32.partialorder %v8400_v31, 0.0 }
 0x543   : > { %5035 = vst.msk [vmem:[%s7350_s23 + $0x190] sm:$0xff] %vm820_vm1, %v4349_v61  ;;  %v4181_v14 = vmul.f32 %v4180_v5, %v8354_v17  ;;  %v4189_v24 = vmul.f32 %v5255_v27, %v4188_v57 }
 0x544   : > { %5258 = vrsqrt.f32 %v8409_v49  ;;  %vm3625_vm12 = vcmp.eq.f32.partialorder %v8409_v49, inf  ;;  %vm3627_vm13 = vcmp.eq.f32.partialorder %v8409_v49, 0.0 }
 0x545   : > { %v4183_v62 = vsel %vm4182_vm10, %v8354_v17, %v4181_v14  ;;  %v4190_v8 = vmul.f32 0.5, %v4189_v24 }
 0x546   : > { %v4186_v45 = vsel %vm4184_vm11, %v4185_v6, %v4183_v62 }
 0x547   : > { %v4334_v48 = vmul.f32 %v4186_v45, %v7825_v16  ;;  %v4191_v1 = vsub.f32 1.5, %v4190_v8  ;;  %v4114_v21 = vpop.f32.mrf.mxu3  ;;  %v3628_v8 = vand.u32 2147483648, %v8409_v49 }
 0x548   : > { %v5257_v30 = vpop.eup %5256  ;;  %v8418_v38 = vadd.f32 %v8271_v23, %v4114_v21 }
 0x549   : > { %v4350_v18 = vadd.f32 %v8359_v20, %v4334_v48  ;;  %v4192_v43 = vmul.f32 %v5255_v27, %v4191_v1  ;;  %v4200_v52 = vmul.f32 %v5257_v30, %v8400_v31  ;;  %v3485_v39 = vpop.f32.mrf.mxu0  ;;  %v4209_v27 = vand.u32 2147483648, %v8400_v31 }
 0x54a   : > { %5260 = vrsqrt.f32 %v8418_v38  ;;  %v5259_v17 = vpop.eup %5258  ;;  %v8427_v2 = vadd.f32 %v8271_v23, %v3485_v39  ;;  %vm4218_vm14 = vcmp.eq.f32.partialorder %v8418_v38, inf  ;;  %vm4220_vm2 = vcmp.eq.f32.partialorder %v8418_v38, 0.0 }
 0x54b   : > { %5036 = vst.msk [vmem:[%s7350_s23 + $0x198] sm:$0xff] %vm820_vm1, %v4350_v18  ;;  %v4193_v13 = vmul.f32 %v4192_v43, %v8382_v33  ;;  %v4201_v16 = vmul.f32 %v5257_v30, %v4200_v52  ;;  %v3619_v3 = vmul.f32 %v5259_v17, %v8409_v49 }
 0x54c   : > { %5262 = vrsqrt.f32 %v8427_v2  ;;  %vm3637_vm3 = vcmp.eq.f32.partialorder %v8427_v2, inf  ;;  %vm3639_vm4 = vcmp.eq.f32.partialorder %v8427_v2, 0.0 }
 0x54d   : > { %v4195_v9 = vsel %vm4194_vm0, %v8382_v33, %v4193_v13  ;;  %v4202_v11 = vmul.f32 0.5, %v4201_v16  ;;  %v3620_v32 = vmul.f32 %v5259_v17, %v3619_v3 }
 0x54e   : > { %v4198_v53 = vsel %vm4196_vm15, %v4197_v26, %v4195_v9  ;;  %v4221_v26 = vand.u32 2147483648, %v8418_v38 }
 0x54f   : > { %v4335_v55 = vmul.f32 %v4198_v53, %v7857_v40  ;;  %v4203_v0 = vsub.f32 1.5, %v4202_v11  ;;  %v4116_v34 = vpop.f32.mrf.mxu3  ;;  %v3621_v22 = vmul.f32 0.5, %v3620_v32 }
 0x550   : > { %v5261_v59 = vpop.eup %5260  ;;  %v8437_v44 = vadd.f32 %v8271_v23, %v4116_v34 }
 0x551   : > { %v4351_v19 = vadd.f32 %v8359_v20, %v4335_v55  ;;  %v4204_v15 = vmul.f32 %v5257_v30, %v4203_v0  ;;  %v4212_v33 = vmul.f32 %v5261_v59, %v8418_v38  ;;  %v3622_v60 = vsub.f32 1.5, %v3621_v22 }
 0x552   : > { %5264 = vrsqrt.f32 %v8437_v44  ;;  %v5263_v46 = vpop.eup %5262  ;;  %v3640_v55 = vand.u32 2147483648, %v8427_v2  ;;  %vm4230_vm7 = vcmp.eq.f32.partialorder %v8437_v44, inf  ;;  %vm4232_vm8 = vcmp.eq.f32.partialorder %v8437_v44, 0.0 }
 0x553   : > { %5037 = vst.msk [vmem:[%s7350_s23 + $0x1a0] sm:$0xff] %vm820_vm1, %v4351_v19  ;;  %v4205_v40 = vmul.f32 %v4204_v15, %v8400_v31  ;;  %v4213_v10 = vmul.f32 %v5261_v59, %v4212_v33  ;;  %v3623_v61 = vmul.f32 %v5259_v17, %v3622_v60  ;;  %v3631_v5 = vmul.f32 %v5263_v46, %v8427_v2 }
 0x555   : > { %v4207_v57 = vsel %vm4206_vm5, %v8400_v31, %v4205_v40  ;;  %v4214_v7 = vmul.f32 0.5, %v4213_v10  ;;  %v3624_v24 = vmul.f32 %v3623_v61, %v8409_v49  ;;  %v3632_v6 = vmul.f32 %v5263_v46, %v3631_v5 }
 0x556   : > { %v4210_v14 = vsel %vm4208_vm6, %v4209_v27, %v4207_v57  ;;  %v4233_v10 = vand.u32 2147483648, %v8437_v44 }
 0x557   : > { %v4336_v62 = vmul.f32 %v4210_v14, %v7860_v51  ;;  %v4215_v45 = vsub.f32 1.5, %v4214_v7  ;;  %v4119_v48 = vpop.f32.mrf.mxu3  ;;  %v3626_v21 = vsel %vm3625_vm12, %v8409_v49, %v3624_v24  ;;  %v3633_v31 = vmul.f32 0.5, %v3632_v6 }
 0x558   : > { %v5265_v1 = vpop.eup %5264  ;;  %v8457_v30 = vadd.f32 %v8271_v23, %v4119_v48  ;;  %v3629_v43 = vsel %vm3627_vm13, %v3628_v8, %v3626_v21 }
 0x559   : > { %v4352_v18 = vadd.f32 %v8359_v20, %v4336_v62  ;;  %v4216_v51 = vmul.f32 %v5261_v59, %v4215_v45  ;;  %v4224_v52 = vmul.f32 %v5265_v1, %v8437_v44  ;;  %v3700_v39 = vmul.f32 %v3629_v43, %v7978_v54 }
 0x55a   : > { %v3634_v17 = vsub.f32 1.5, %v3633_v31  ;;  %5266 = vrsqrt.f32 %v8457_v30  ;;  %vm4242_vm9 = vcmp.eq.f32.partialorder %v8457_v30, inf  ;;  %vm4244_vm10 = vcmp.eq.f32.partialorder %v8457_v30, 0.0 }
 0x55b   : > { %5038 = vst.msk [vmem:[%s7350_s23 + $0x1a8] sm:$0xff] %vm820_vm1, %v4352_v18  ;;  %v4217_v49 = vmul.f32 %v4216_v51, %v8418_v38  ;;  %v4225_v13 = vmul.f32 %v5265_v1, %v4224_v52  ;;  %v3716_v16 = vadd.f32 %v8359_v20, %v3700_v39 }
 0x55c   : > { %v3635_v3 = vmul.f32 %v5263_v46, %v3634_v17 }
 0x55d   : > { %v4219_v9 = vsel %vm4218_vm14, %v8418_v38, %v4217_v49  ;;  %v4226_v54 = vmul.f32 0.5, %v4225_v13  ;;  %5011 = vst.msk [vmem:[%s7350_s23 + $0x150] sm:$0xff] %vm820_vm1, %v3716_v16 }
 0x55e   : > { %v4222_v11 = vsel %vm4220_vm2, %v4221_v26, %v4219_v9  ;;  %v3636_v53 = vmul.f32 %v3635_v3, %v8427_v2 }
 0x55f   : > { %v4337_v32 = vmul.f32 %v4222_v11, %v7933_v47  ;;  %v4227_v0 = vsub.f32 1.5, %v4226_v54  ;;  %v4121_v34 = vpop.f32.mrf.mxu3 }
 0x560   : > { %v5267_v59 = vpop.eup %5266  ;;  %v3638_v22 = vsel %vm3637_vm3, %v8427_v2, %v3636_v53  ;;  %v8480_v38 = vadd.f32 %v8271_v23, %v4121_v34 }
 0x561   : > { %v4353_v19 = vadd.f32 %v8359_v20, %v4337_v32  ;;  %v3641_v15 = vsel %vm3639_vm4, %v3640_v55, %v3638_v22  ;;  %v4228_v33 = vmul.f32 %v5265_v1, %v4227_v0  ;;  %v4236_v47 = vmul.f32 %v5267_v59, %v8457_v30 }
 0x562   : > { %v3701_v60 = vmul.f32 %v3641_v15, %v7986_v36  ;;  %5268 = vrsqrt.f32 %v8480_v38  ;;  %v4245_v1 = vand.u32 2147483648, %v8457_v30  ;;  %vm4254_vm11 = vcmp.eq.f32.partialorder %v8480_v38, inf }
 0x563   : > { %5039 = vst.msk [vmem:[%s7350_s23 + $0x1b0] sm:$0xff] %vm820_vm1, %v4353_v19  ;;  %v4229_v46 = vmul.f32 %v4228_v33, %v8437_v44  ;;  %v4237_v40 = vmul.f32 %v5267_v59, %v4236_v47  ;;  %v4257_v54 = vand.u32 2147483648, %v8480_v38  ;;  %vm4256_vm0 = vcmp.eq.f32.partialorder %v8480_v38, 0.0 }
 0x564   : > { %v3717_v2 = vadd.f32 %v8359_v20, %v3701_v60 }
 0x565   : > { %v4231_v27 = vsel %vm4230_vm7, %v8437_v44, %v4229_v46  ;;  %v4238_v61 = vmul.f32 0.5, %v4237_v40 }
 0x566   : > { %5012 = vst.msk [vmem:[%s7350_s23 + $0x158] sm:$0xff] %vm820_vm1, %v3717_v2  ;;  %v4234_v36 = vsel %vm4232_vm8, %v4233_v10, %v4231_v27 }
 0x567   : > { %v4338_v5 = vmul.f32 %v4234_v36, %v7966_v29  ;;  %v4239_v57 = vsub.f32 1.5, %v4238_v61  ;;  %v4124_v7 = vpop.f32.mrf.mxu3 }
 0x568   : > { %v5269_v14 = vpop.eup %5268  ;;  %v8498_v24 = vadd.f32 %v8271_v23, %v4124_v7 }
 0x569   : > { %v4354_v6 = vadd.f32 %v8359_v20, %v4338_v5  ;;  %v4240_v62 = vmul.f32 %v5267_v59, %v4239_v57  ;;  %v4248_v8 = vmul.f32 %v5269_v14, %v8480_v38 }
 0x56a   : > { %v3488_v45 = vpop.f32.mrf.mxu0  ;;  %5270 = vrsqrt.f32 %v8498_v24  ;;  %vm4266_vm15 = vcmp.eq.f32.partialorder %v8498_v24, inf  ;;  %v4269_v10 = vand.u32 2147483648, %v8498_v24  ;;  %vm4268_vm5 = vcmp.eq.f32.partialorder %v8498_v24, 0.0 }
 0x56b   : > { %5040 = vst.msk [vmem:[%s7350_s23 + $0x1b8] sm:$0xff] %vm820_vm1, %v4354_v6  ;;  %v4241_v44 = vmul.f32 %v4240_v62, %v8457_v30  ;;  %v4249_v48 = vmul.f32 %v5269_v14, %v4248_v8  ;;  %v8507_v29 = vadd.f32 %v8271_v23, %v3488_v45 }
 0x56d   : > { %v4243_v21 = vsel %vm4242_vm9, %v8457_v30, %v4241_v44  ;;  %v4250_v31 = vmul.f32 0.5, %v4249_v48  ;;  %5272 = vrsqrt.f32 %v8507_v29  ;;  %vm3649_vm6 = vcmp.eq.f32.partialorder %v8507_v29, inf }
 0x56e   : > { %v4246_v18 = vsel %vm4244_vm10, %v4245_v1, %v4243_v21  ;;  %v3652_v62 = vand.u32 2147483648, %v8507_v29  ;;  %vm3651_vm12 = vcmp.eq.f32.partialorder %v8507_v29, 0.0 }
 0x56f   : > { %v4339_v43 = vmul.f32 %v4246_v18, %v8037_v25  ;;  %v4251_v51 = vsub.f32 1.5, %v4250_v31  ;;  %v4126_v52 = vpop.f32.mrf.mxu3 }
 0x570   : > { %v5271_v39 = vpop.eup %5270  ;;  %v8516_v17 = vadd.f32 %v8271_v23, %v4126_v52 }
 0x571   : > { %v4355_v49 = vadd.f32 %v8359_v20, %v4339_v43  ;;  %v4252_v13 = vmul.f32 %v5269_v14, %v4251_v51  ;;  %v4260_v16 = vmul.f32 %v5271_v39, %v8498_v24 }
 0x572   : > { %v3490_v26 = vpop.f32.mrf.mxu0  ;;  %5274 = vrsqrt.f32 %v8516_v17  ;;  %vm4278_vm13 = vcmp.eq.f32.partialorder %v8516_v17, inf  ;;  %vm4280_vm14 = vcmp.eq.f32.partialorder %v8516_v17, 0.0 }
 0x573   : > { %v5273_v30 = vpop.eup %5272  ;;  %5041 = vst.msk [vmem:[%s7350_s23 + $0x1c0] sm:$0xff] %vm820_vm1, %v4355_v49  ;;  %v4253_v3 = vmul.f32 %v4252_v13, %v8480_v38  ;;  %v4261_v25 = vmul.f32 %v5271_v39, %v4260_v16  ;;  %v8525_v9 = vadd.f32 %v8271_v23, %v3490_v26  ;;  %v4281_v49 = vand.u32 2147483648, %v8516_v17 }
 0x574   : > { %v3643_v11 = vmul.f32 %v5273_v30, %v8507_v29 }
 0x575   : > { %v4255_v53 = vsel %vm4254_vm11, %v8480_v38, %v4253_v3  ;;  %v4262_v32 = vmul.f32 0.5, %v4261_v25  ;;  %5276 = vrsqrt.f32 %v8525_v9  ;;  %vm3661_vm2 = vcmp.eq.f32.partialorder %v8525_v9, inf }
 0x576   : > { %v4258_v55 = vsel %vm4256_vm0, %v4257_v54, %v4255_v53  ;;  %v3644_v0 = vmul.f32 %v5273_v30, %v3643_v11  ;;  %v3664_v25 = vand.u32 2147483648, %v8525_v9  ;;  %vm3663_vm3 = vcmp.eq.f32.partialorder %v8525_v9, 0.0 }
 0x577   : > { %v4340_v34 = vmul.f32 %v4258_v55, %v8026_v28  ;;  %v4263_v59 = vsub.f32 1.5, %v4262_v32  ;;  %v4129_v22 = vpop.f32.mrf.mxu3 }
 0x578   : > { %v5275_v19 = vpop.eup %5274  ;;  %v3645_v15 = vmul.f32 0.5, %v3644_v0  ;;  %v8535_v33 = vadd.f32 %v8271_v23, %v4129_v22 }
 0x579   : > { %v4356_v47 = vadd.f32 %v8359_v20, %v4340_v34  ;;  %v4264_v60 = vmul.f32 %v5271_v39, %v4263_v59  ;;  %v4272_v38 = vmul.f32 %v5275_v19, %v8516_v17 }
 0x57a   : > { %v3646_v46 = vsub.f32 1.5, %v3645_v15  ;;  %5278 = vrsqrt.f32 %v8535_v33  ;;  %vm4290_vm4 = vcmp.eq.f32.partialorder %v8535_v33, inf  ;;  %vm4292_vm7 = vcmp.eq.f32.partialorder %v8535_v33, 0.0 }
 0x57b   : > { %v5277_v40 = vpop.eup %5276  ;;  %5042 = vst.msk [vmem:[%s7350_s23 + $0x1c8] sm:$0xff] %vm820_vm1, %v4356_v47  ;;  %v4265_v28 = vmul.f32 %v4264_v60, %v8498_v24  ;;  %v4273_v2 = vmul.f32 %v5275_v19, %v4272_v38 }
 0x57c   : > { %v3647_v27 = vmul.f32 %v5273_v30, %v3646_v46  ;;  %v3655_v61 = vmul.f32 %v5277_v40, %v8525_v9 }
 0x57d   : > { %v4267_v36 = vsel %vm4266_vm15, %v8498_v24, %v4265_v28  ;;  %v4274_v5 = vmul.f32 0.5, %v4273_v2 }
 0x57e   : > { %v4270_v57 = vsel %vm4268_vm5, %v4269_v10, %v4267_v36  ;;  %v3648_v7 = vmul.f32 %v3647_v27, %v8507_v29  ;;  %v3656_v14 = vmul.f32 %v5277_v40, %v3655_v61 }
 0x57f   : > { %v4341_v6 = vmul.f32 %v4270_v57, %v8078_v12  ;;  %v4275_v8 = vsub.f32 1.5, %v4274_v5  ;;  %v4131_v45 = vpop.f32.mrf.mxu3 }
 0x580   : > { %v5279_v44 = vpop.eup %5278  ;;  %v3650_v48 = vsel %vm3649_vm6, %v8507_v29, %v3648_v7  ;;  %v3657_v24 = vmul.f32 0.5, %v3656_v14  ;;  %v4132_v1 = vadd.f32 %v8271_v23, %v4131_v45 }
 0x581   : > { %v4357_v21 = vadd.f32 %v8359_v20, %v4341_v6  ;;  %v3653_v31 = vsel %vm3651_vm12, %v3652_v62, %v3650_v48  ;;  %v4276_v12 = vmul.f32 %v5275_v19, %v4275_v8  ;;  %v4284_v18 = vmul.f32 %v5279_v44, %v8535_v33 }
 0x582   : > { %v3702_v43 = vmul.f32 %v3653_v31, %v8120_v50  ;;  %v3658_v51 = vsub.f32 1.5, %v3657_v24  ;;  %5280 = vrsqrt.f32 %v4132_v1  ;;  %v4293_v19 = vand.u32 2147483648, %v8535_v33 }
 0x583   : > { %5043 = vst.msk [vmem:[%s7350_s23 + $0x1d0] sm:$0xff] %vm820_vm1, %v4357_v21  ;;  %v4277_v52 = vmul.f32 %v4276_v12, %v8516_v17  ;;  %v4285_v39 = vmul.f32 %v5279_v44, %v4284_v18  ;;  %vm4302_vm8 = vcmp.eq.f32.partialorder %v4132_v1, inf  ;;  %v4305_v10 = vand.u32 2147483648, %v4132_v1 }
 0x584   : > { %v3718_v29 = vadd.f32 %v8359_v20, %v3702_v43  ;;  %v3659_v13 = vmul.f32 %v5277_v40, %v3658_v51  ;;  %vm4304_vm9 = vcmp.eq.f32.partialorder %v4132_v1, 0.0 }
 0x585   : > { %v4279_v16 = vsel %vm4278_vm13, %v8516_v17, %v4277_v52  ;;  %v4286_v26 = vmul.f32 0.5, %v4285_v39 }
 0x586   : > { %5013 = vst.msk [vmem:[%s7350_s23 + $0x160] sm:$0xff] %vm820_vm1, %v3718_v29  ;;  %v4282_v50 = vsel %vm4280_vm14, %v4281_v49, %v4279_v16  ;;  %v3660_v30 = vmul.f32 %v3659_v13, %v8525_v9 }
 0x587   : > { %v4342_v3 = vmul.f32 %v4282_v50, %v8083_v58  ;;  %v4287_v54 = vsub.f32 1.5, %v4286_v26 }
 0x588   : > { %v5281_v11 = vpop.eup %5280  ;;  %v3662_v53 = vsel %vm3661_vm2, %v8525_v9, %v3660_v30 }
 0x589   : > { %v4358_v17 = vadd.f32 %v8359_v20, %v4342_v3  ;;  %v3665_v32 = vsel %vm3663_vm3, %v3664_v25, %v3662_v53  ;;  %v4288_v55 = vmul.f32 %v5279_v44, %v4287_v54  ;;  %v4296_v0 = vmul.f32 %v5281_v11, %v4132_v1 }
 0x58a   : > { %v3703_v34 = vmul.f32 %v3665_v32, %v8130_v4 }
 0x58b   : > { %5044 = vst.msk [vmem:[%s7350_s23 + $0x1d8] sm:$0xff] %vm820_vm1, %v4358_v17  ;;  %v4289_v58 = vmul.f32 %v4288_v55, %v8535_v33  ;;  %v4297_v59 = vmul.f32 %v5281_v11, %v4296_v0 }
 0x58c   : > { %v3719_v22 = vadd.f32 %v8359_v20, %v3703_v34 }
 0x58d   : > { %v4291_v9 = vsel %vm4290_vm4, %v8535_v33, %v4289_v58  ;;  %v4298_v15 = vmul.f32 0.5, %v4297_v59 }
 0x58e   : > { %5014 = vst.msk [vmem:[%s7350_s23 + $0x168] sm:$0xff] %vm820_vm1, %v3719_v22  ;;  %v4294_v4 = vsel %vm4292_vm7, %v4293_v19, %v4291_v9 }
 0x58f   : > { %v4343_v47 = vmul.f32 %v4294_v4, %v8158_v56  ;;  %v4299_v60 = vsub.f32 1.5, %v4298_v15 }
 0x591   : > { %v4359_v38 = vadd.f32 %v8359_v20, %v4343_v47  ;;  %v4300_v46 = vmul.f32 %v5281_v11, %v4299_v60  ;;  %v4134_v2 = vpop.f32.mrf.mxu3 }
 0x592   : > { %v4135_v27 = vadd.f32 %v8271_v23, %v4134_v2  ;;  %v4555_v2 = vld [vmem:[%s7350_s23 + $0x20] sm:$0xff] (%p5460_p5) }
 0x593   : > { %5045 = vst.msk [vmem:[%s7350_s23 + $0x1e0] sm:$0xff] %vm820_vm1, %v4359_v38  ;;  %v4301_v40 = vmul.f32 %v4300_v46, %v4132_v1  ;;  %v3493_v28 = vpop.f32.mrf.mxu0 }
 0x594   : > { %v3494_v33 = vadd.f32 %v8271_v23, %v3493_v28  ;;  %vm4314_vm0 = vcmp.eq.f32.partialorder %v4135_v27, inf  ;;  %v4317_v50 = vand.u32 2147483648, %v4135_v27  ;;  %vm4316_vm15 = vcmp.eq.f32.partialorder %v4135_v27, 0.0  ;;  %v4553_v28 = vld [vmem:[%s7350_s23 + $0x18] sm:$0xff] (%p5460_p5)  ;;  %4556 = vst [vmem:[%s8623_s16 + $0x20] sm:$0xff] (%p5460_p5), %v4555_v2 }
 0x595   : > { %v4303_v61 = vsel %vm4302_vm8, %v4132_v1, %v4301_v40  ;;  %4554 = vst [vmem:[%s8623_s16 + $0x18] sm:$0xff] (%p5460_p5), %v4553_v28 }
 0x596   : > { %v4306_v36 = vsel %vm4304_vm9, %v4305_v10, %v4303_v61  ;;  %5282 = vrsqrt.f32 %v3494_v33  ;;  %vm3673_vm10 = vcmp.eq.f32.partialorder %v3494_v33, inf  ;;  %vm3675_vm11 = vcmp.eq.f32.partialorder %v3494_v33, 0.0  ;;  %v4557_v10 = vld [vmem:[%s7350_s23 + $0x28] sm:$0xff] (%p5460_p5)  ;;  %v4563_v61 = vld [vmem:[%s7350_s23 + $0x40] sm:$0xff] (%p5460_p5) }
 0x597   : > { %v4344_v56 = vmul.f32 %v4306_v36, %v8147_v42  ;;  %5284 = vrsqrt.f32 %v4135_v27  ;;  %v3676_v49 = vand.u32 2147483648, %v3494_v33  ;;  %4558 = vst [vmem:[%s8623_s16 + $0x28] sm:$0xff] (%p5460_p5), %v4557_v10  ;;  %v4565_v36 = vld [vmem:[%s7350_s23 + $0x48] sm:$0xff] (%p5460_p5) }
 0x598   : > { %4564 = vst [vmem:[%s8623_s16 + $0x40] sm:$0xff] (%p5460_p5), %v4563_v61 }
 0x599   : > { %v4360_v5 = vadd.f32 %v8359_v20, %v4344_v56  ;;  %v4136_v7 = vpop.f32.mrf.mxu3  ;;  %v4567_v56 = vld [vmem:[%s7350_s23 + $0x50] sm:$0xff] (%p5460_p5)  ;;  %4566 = vst [vmem:[%s8623_s16 + $0x48] sm:$0xff] (%p5460_p5), %v4565_v36 }
 0x59a   : > { %v4137_v62 = vadd.f32 %v8271_v23, %v4136_v7  ;;  %4568 = vst [vmem:[%s8623_s16 + $0x50] sm:$0xff] (%p5460_p5), %v4567_v56  ;;  %v4573_v7 = vld [vmem:[%s7350_s23 + $0x68] sm:$0xff] (%p5460_p5) }
 0x59b   : > { %5046 = vst.msk [vmem:[%s7350_s23 + $0x1e8] sm:$0xff] %vm820_vm1, %v4360_v5  ;;  %v3495_v57 = vpop.f32.mrf.mxu0  ;;  %v4569_v5 = vld [vmem:[%s7350_s23 + $0x58] sm:$0xff] (%p5460_p5) }
 0x59c   : > { %v5283_v14 = vpop.eup %5282  ;;  %v3496_v6 = vadd.f32 %v8271_v23, %v3495_v57  ;;  %vm4326_vm12 = vcmp.eq.f32.partialorder %v4137_v62, inf  ;;  %vm4328_vm13 = vcmp.eq.f32.partialorder %v4137_v62, 0.0  ;;  %v4571_v57 = vld [vmem:[%s7350_s23 + $0x60] sm:$0xff] (%p5460_p5)  ;;  %4570 = vst [vmem:[%s8623_s16 + $0x58] sm:$0xff] (%p5460_p5), %v4569_v5 }
 0x59d   : > { %v5285_v8 = vpop.eup %5284  ;;  %v3667_v45 = vmul.f32 %v5283_v14, %v3494_v33  ;;  %4572 = vst [vmem:[%s8623_s16 + $0x60] sm:$0xff] (%p5460_p5), %v4571_v57 }
 0x59e   : > { %v4308_v44 = vmul.f32 %v5285_v8, %v4135_v27  ;;  %5286 = vrsqrt.f32 %v3496_v6  ;;  %vm3685_vm5 = vcmp.eq.f32.partialorder %v3496_v6, inf  ;;  %vm3687_vm6 = vcmp.eq.f32.partialorder %v3496_v6, 0.0  ;;  %4574 = vst [vmem:[%s8623_s16 + $0x68] sm:$0xff] (%p5460_p5), %v4573_v7 }
 0x59f   : > { %v3668_v48 = vmul.f32 %v5283_v14, %v3667_v45  ;;  %5288 = vrsqrt.f32 %v4137_v62  ;;  %v4583_v45 = vld [vmem:[%s7350_s23 + $0x90] sm:$0xff] (%p5460_p5) }
 0x5a0   : > { %v4309_v24 = vmul.f32 %v5285_v8, %v4308_v44  ;;  %v4585_v44 = vld [vmem:[%s7350_s23 + $0x98] sm:$0xff] (%p5460_p5)  ;;  %4584 = vst [vmem:[%s8623_s16 + $0x110] sm:$0xff] (%p5460_p5), %v4583_v45 }
 0x5a1   : > { %v3669_v42 = vmul.f32 0.5, %v3668_v48  ;;  %v4587_v48 = vld [vmem:[%s7350_s23 + $0xa0] sm:$0xff] (%p5460_p5)  ;;  %4586 = vst [vmem:[%s8623_s16 + $0x118] sm:$0xff] (%p5460_p5), %v4585_v44 }
 0x5a2   : > { %v4310_v1 = vmul.f32 0.5, %v4309_v24  ;;  %v4589_v24 = vld [vmem:[%s7350_s23 + $0xa8] sm:$0xff] (%p5460_p5)  ;;  %4588 = vst [vmem:[%s8623_s16 + $0x120] sm:$0xff] (%p5460_p5), %v4587_v48 }
 0x5a3   : > { %v3670_v21 = vsub.f32 1.5, %v3669_v42  ;;  %v4591_v42 = vld [vmem:[%s7350_s23 + $0xb0] sm:$0xff] (%p5460_p5)  ;;  %4590 = vst [vmem:[%s8623_s16 + $0x128] sm:$0xff] (%p5460_p5), %v4589_v24 }
 0x5a4   : > { %v5287_v31 = vpop.eup %5286  ;;  %v4311_v12 = vsub.f32 1.5, %v4310_v1  ;;  %v4593_v1 = vld [vmem:[%s7350_s23 + $0xb8] sm:$0xff] (%p5460_p5)  ;;  %4592 = vst [vmem:[%s8623_s16 + $0x130] sm:$0xff] (%p5460_p5), %v4591_v42 }
 0x5a5   : > { %v5289_v18 = vpop.eup %5288  ;;  %v3671_v43 = vmul.f32 %v5283_v14, %v3670_v21  ;;  %v3679_v51 = vmul.f32 %v5287_v31, %v3496_v6  ;;  %v4575_v14 = vld [vmem:[%s7350_s23 + $0x70] sm:$0xff] (%p5460_p5)  ;;  %v4595_v21 = vld [vmem:[%s7350_s23 + $0xc0] sm:$0xff] (%p5460_p5)  ;;  %4594 = vst [vmem:[%s8623_s16 + $0x138] sm:$0xff] (%p5460_p5), %v4593_v1 }
 0x5a6   : > { %v4312_v52 = vmul.f32 %v5285_v8, %v4311_v12  ;;  %v4320_v39 = vmul.f32 %v5289_v18, %v4137_v62  ;;  %4576 = vst [vmem:[%s8623_s16 + $0x70] sm:$0xff] (%p5460_p5), %v4575_v14  ;;  %v4581_v8 = vld [vmem:[%s7350_s23 + $0x88] sm:$0xff] (%p5460_p5)  ;;  %v4599_v12 = vld [vmem:[%s7350_s23 + $0xd0] sm:$0xff] (%p5460_p5) }
 0x5a7   : > { %v3672_v29 = vmul.f32 %v3671_v43, %v3494_v33  ;;  %v3680_v23 = vmul.f32 %v5287_v31, %v3679_v51  ;;  %4582 = vst [vmem:[%s8623_s16 + $0x108] sm:$0xff] (%p5460_p5), %v4581_v8  ;;  %v4603_v43 = vld [vmem:[%s7350_s23 + $0xe0] sm:$0xff] (%p5460_p5)  ;;  %v4605_v51 = vld [vmem:[%s7350_s23 + $0xe8] sm:$0xff] (%p5460_p5) }
 0x5a8   : > { %v4313_v13 = vmul.f32 %v4312_v52, %v4135_v27  ;;  %v4321_v16 = vmul.f32 %v5289_v18, %v4320_v39  ;;  %4596 = vst [vmem:[%s8623_s16 + $0x140] sm:$0xff] (%p5460_p5), %v4595_v21  ;;  %v4607_v52 = vld [vmem:[%s7350_s23 + $0xf0] sm:$0xff] (%p5460_p5)  ;;  %v4609_v39 = vld [vmem:[%s7350_s23 + $0xf8] sm:$0xff] (%p5460_p5) }
 0x5a9   : > { %v3674_v26 = vsel %vm3673_vm10, %v3494_v33, %v3672_v29  ;;  %v3681_v30 = vmul.f32 0.5, %v3680_v23  ;;  %v4559_v33 = vld [vmem:[%s7350_s23 + $0x30] sm:$0xff] (%p5460_p5)  ;;  %4600 = vst [vmem:[%s8623_s16 + $0x150] sm:$0xff] (%p5460_p5), %v4599_v12  ;;  %v4611_v29 = vld [vmem:[%s7350_s23 + $0x100] sm:$0xff] (%p5460_p5)  ;;  %v4613_v23 = vld [vmem:[%s7350_s23 + $0x108] sm:$0xff] (%p5460_p5) }
 0x5aa   : > { %v3677_v3 = vsel %vm3675_vm11, %v3676_v49, %v3674_v26  ;;  %v4315_v25 = vsel %vm4314_vm0, %v4135_v27, %v4313_v13  ;;  %v4322_v54 = vmul.f32 0.5, %v4321_v16  ;;  %v4561_v27 = vld [vmem:[%s7350_s23 + $0x38] sm:$0xff] (%p5460_p5)  ;;  %4560 = vst [vmem:[%s8623_s16 + $0x30] sm:$0xff] (%p5460_p5), %v4559_v33  ;;  %v4615_v49 = vld [vmem:[%s7350_s23 + $0x110] sm:$0xff] (%p5460_p5)  ;;  %v4619_v16 = vld [vmem:[%s7350_s23 + $0x120] sm:$0xff] (%p5460_p5) }
 0x5ab   : > { %v3704_v11 = vmul.f32 %v3677_v3, %v8258_v35  ;;  %v4318_v53 = vsel %vm4316_vm15, %v4317_v50, %v4315_v25  ;;  %v3682_v17 = vsub.f32 1.5, %v3681_v30  ;;  %v3688_v35 = vand.u32 2147483648, %v3496_v6  ;;  %4562 = vst [vmem:[%s8623_s16 + $0x38] sm:$0xff] (%p5460_p5), %v4561_v27  ;;  %v4617_v13 = vld [vmem:[%s7350_s23 + $0x118] sm:$0xff] (%p5460_p5)  ;;  %v4621_v26 = vld [vmem:[%s7350_s23 + $0x128] sm:$0xff] (%p5460_p5)  ;;  %v4623_v50 = vld [vmem:[%s7350_s23 + $0x130] sm:$0xff] (%p5460_p5) }
 0x5ac   : > { %v4345_v32 = vmul.f32 %v4318_v53, %v8228_v37  ;;  %v4323_v55 = vsub.f32 1.5, %v4322_v54  ;;  %v4329_v37 = vand.u32 2147483648, %v4137_v62  ;;  %4604 = vst [vmem:[%s8623_s16 + $0x160] sm:$0xff] (%p5460_p5), %v4603_v43  ;;  %v4625_v30 = vld [vmem:[%s7350_s23 + $0x138] sm:$0xff] (%p5460_p5)  ;;  %v4627_v3 = vld [vmem:[%s7350_s23 + $0x140] sm:$0xff] (%p5460_p5)  ;;  %v4629_v25 = vld [vmem:[%s7350_s23 + $0x148] sm:$0xff] (%p5460_p5) }
 0x5ad   : > { %v3720_v0 = vadd.f32 %v8359_v20, %v3704_v11  ;;  %v3683_v34 = vmul.f32 %v5287_v31, %v3682_v17  ;;  %v4597_v31 = vld [vmem:[%s7350_s23 + $0xc8] sm:$0xff] (%p5460_p5)  ;;  %4606 = vst [vmem:[%s8623_s16 + $0x168] sm:$0xff] (%p5460_p5), %v4605_v51  ;;  %v4631_v54 = vld [vmem:[%s7350_s23 + $0x150] sm:$0xff] (%p5460_p5)  ;;  %v4633_v11 = vld [vmem:[%s7350_s23 + $0x158] sm:$0xff] (%p5460_p5) }
 0x5ae   : > { %v4361_v58 = vadd.f32 %v8359_v20, %v4345_v32  ;;  %v4324_v59 = vmul.f32 %v5289_v18, %v4323_v55  ;;  %v4601_v18 = vld [vmem:[%s7350_s23 + $0xd8] sm:$0xff] (%p5460_p5)  ;;  %4598 = vst [vmem:[%s8623_s16 + $0x148] sm:$0xff] (%p5460_p5), %v4597_v31  ;;  %v4635_v53 = vld [vmem:[%s7350_s23 + $0x160] sm:$0xff] (%p5460_p5)  ;;  %v4637_v17 = vld [vmem:[%s7350_s23 + $0x168] sm:$0xff] (%p5460_p5) }
 0x5af   : > { %5015 = vst.msk [vmem:[%s7350_s23 + $0x170] sm:$0xff] %vm820_vm1, %v3720_v0  ;;  %v3684_v22 = vmul.f32 %v3683_v34, %v3496_v6  ;;  %v4643_v0 = vld [vmem:[%s7350_s23 + $0x180] sm:$0xff] (%p5460_p5)  ;;  %v4645_v34 = vld [vmem:[%s7350_s23 + $0x188] sm:$0xff] (%p5460_p5) }
 0x5b0   : > { %5047 = vst.msk [vmem:[%s7350_s23 + $0x1f0] sm:$0xff] %vm820_vm1, %v4361_v58  ;;  %v4325_v19 = vmul.f32 %v4324_v59, %v4137_v62  ;;  %v4647_v58 = vld [vmem:[%s7350_s23 + $0x190] sm:$0xff] (%p5460_p5)  ;;  %v4649_v59 = vld [vmem:[%s7350_s23 + $0x198] sm:$0xff] (%p5460_p5) }
 0x5b1   : > { %v3686_v9 = vsel %vm3685_vm5, %v3496_v6, %v3684_v22  ;;  %v4577_v6 = vld [vmem:[%s7350_s23 + $0x78] sm:$0xff] (%p5460_p5)  ;;  %4602 = vst [vmem:[%s8623_s16 + $0x158] sm:$0xff] (%p5460_p5), %v4601_v18  ;;  %v4651_v22 = vld [vmem:[%s7350_s23 + $0x1a0] sm:$0xff] (%p5460_p5) }
 0x5b2   : > { %v3689_v15 = vsel %vm3687_vm6, %v3688_v35, %v3686_v9  ;;  %v4327_v4 = vsel %vm4326_vm12, %v4137_v62, %v4325_v19  ;;  %v4579_v62 = vld [vmem:[%s7350_s23 + $0x80] sm:$0xff] (%p5460_p5)  ;;  %4578 = vst [vmem:[%s8623_s16 + $0x78] sm:$0xff] (%p5460_p5), %v4577_v6  ;;  %v4653_v35 = vld [vmem:[%s7350_s23 + $0x1a8] sm:$0xff] (%p5460_p5)  ;;  %v4655_v19 = vld [vmem:[%s7350_s23 + $0x1b0] sm:$0xff] (%p5460_p5) }
 0x5b3   : > { %v3705_v47 = vmul.f32 %v3689_v15, %v8263_v63  ;;  %v4330_v60 = vsel %vm4328_vm13, %v4329_v37, %v4327_v4  ;;  %v4549_v63 = vld [vmem:[%s7350_s23 + $0x8] sm:$0xff] (%p5460_p5)  ;;  %4580 = vst [vmem:[%s8623_s16 + $0x100] sm:$0xff] (%p5460_p5), %v4579_v62  ;;  %v4657_v9 = vld [vmem:[%s7350_s23 + $0x1b8] sm:$0xff] (%p5460_p5)  ;;  %v4659_v37 = vld [vmem:[%s7350_s23 + $0x1c0] sm:$0xff] (%p5460_p5) }
 0x5b4   : > { %v4346_v38 = vmul.f32 %v4330_v60, %v8235_v41  ;;  %4386 = sbr.rel (!%p5460_p5) target bundleno = 1499 (0x5db), region = 60  ;;  %v4547_v41 = vld [vmem:[%s7350_s23] sm:$0xff] (%p5460_p5)  ;;  %4550 = vst [vmem:[%s8623_s16 + $0x8] sm:$0xff] (%p5460_p5), %v4549_v63  ;;  %v4661_v15 = vld [vmem:[%s7350_s23 + $0x1c8] sm:$0xff] (%p5460_p5)  ;;  %v4663_v4 = vld [vmem:[%s7350_s23 + $0x1d0] sm:$0xff] (%p5460_p5) }
 0x5b5   : > { %v3721_v46 = vadd.f32 %v8359_v20, %v3705_v47  ;;  %4548 = vst [vmem:[%s8623_s16] sm:$0xff] (%p5460_p5), %v4547_v41  ;;  %v4665_v47 = vld [vmem:[%s7350_s23 + $0x1d8] sm:$0xff] (%p5460_p5)  ;;  %v4667_v60 = vld [vmem:[%s7350_s23 + $0x1e0] sm:$0xff] (%p5460_p5) }
 0x5b6   : > { %v4362_v40 = vadd.f32 %v8359_v20, %v4346_v38  ;;  %v4551_v20 = vld [vmem:[%s7350_s23 + $0x10] sm:$0xff] (%p5460_p5)  ;;  %4608 = vst [vmem:[%s8623_s16 + $0x170] sm:$0xff] (%p5460_p5), %v4607_v52  ;;  %v4669_v38 = vld [vmem:[%s7350_s23 + $0x1e8] sm:$0xff] (%p5460_p5) }
 0x5b7   : > { %5016 = vst.msk [vmem:[%s7350_s23 + $0x178] sm:$0xff] %vm820_vm1, %v3721_v46  ;;  %v4639_v32 = vld [vmem:[%s7350_s23 + $0x170] sm:$0xff] (%p5460_p5) }
 0x5b8   : > { %5048 = vst.msk [vmem:[%s7350_s23 + $0x1f8] sm:$0xff] %vm820_vm1, %v4362_v40  ;;  %v4671_v46 = vld [vmem:[%s7350_s23 + $0x1f0] sm:$0xff] (%p5460_p5) }
 0x5b9   : > { %4552 = vst [vmem:[%s8623_s16 + $0x10] sm:$0xff] %v4551_v20 }
 0x5ba   : > { %4610 = vst [vmem:[%s8623_s16 + $0x178] sm:$0xff] %v4609_v39 }
 0x5bb   : > { %4612 = vst [vmem:[%s8623_s16 + $0x200] sm:$0xff] %v4611_v29 }
 0x5bc   : > { %4614 = vst [vmem:[%s8623_s16 + $0x208] sm:$0xff] %v4613_v23 }
 0x5bd   : > { %4616 = vst [vmem:[%s8623_s16 + $0x210] sm:$0xff] %v4615_v49 }
 0x5be   : > { %4618 = vst [vmem:[%s8623_s16 + $0x218] sm:$0xff] %v4617_v13  ;;  %v4641_v55 = vld [vmem:[%s7350_s23 + $0x178] sm:$0xff] }
 0x5bf   : > { %4620 = vst [vmem:[%s8623_s16 + $0x220] sm:$0xff] %v4619_v16  ;;  %v4673_v40 = vld [vmem:[%s7350_s23 + $0x1f8] sm:$0xff] }
 0x5c0   : > { %4622 = vst [vmem:[%s8623_s16 + $0x228] sm:$0xff] %v4621_v26 }
 0x5c1   : > { %4624 = vst [vmem:[%s8623_s16 + $0x230] sm:$0xff] %v4623_v50 }
 0x5c2   : > { %4626 = vst [vmem:[%s8623_s16 + $0x238] sm:$0xff] %v4625_v30 }
 0x5c3   : > { %4628 = vst [vmem:[%s8623_s16 + $0x240] sm:$0xff] %v4627_v3 }
 0x5c4   : > { %4630 = vst [vmem:[%s8623_s16 + $0x248] sm:$0xff] %v4629_v25 }
 0x5c5   : > { %4632 = vst [vmem:[%s8623_s16 + $0x250] sm:$0xff] %v4631_v54 }
 0x5c6   : > { %4634 = vst [vmem:[%s8623_s16 + $0x258] sm:$0xff] %v4633_v11 }
 0x5c7   : > { %4636 = vst [vmem:[%s8623_s16 + $0x260] sm:$0xff] %v4635_v53 }
 0x5c8   : > { %4638 = vst [vmem:[%s8623_s16 + $0x268] sm:$0xff] %v4637_v17 }
 0x5c9   : > { %4640 = vst [vmem:[%s8623_s16 + $0x270] sm:$0xff] %v4639_v32 }
 0x5ca   : > { %4642 = vst [vmem:[%s8623_s16 + $0x278] sm:$0xff] %v4641_v55 }
 0x5cb   : > { %4644 = vst [vmem:[%s8623_s16 + $0x300] sm:$0xff] %v4643_v0 }
 0x5cc   : > { %4646 = vst [vmem:[%s8623_s16 + $0x308] sm:$0xff] %v4645_v34 }
 0x5cd   : > { %4648 = vst [vmem:[%s8623_s16 + $0x310] sm:$0xff] %v4647_v58 }
 0x5ce   : > { %4650 = vst [vmem:[%s8623_s16 + $0x318] sm:$0xff] %v4649_v59 }
 0x5cf   : > { %4652 = vst [vmem:[%s8623_s16 + $0x320] sm:$0xff] %v4651_v22 }
 0x5d0   : > { %4654 = vst [vmem:[%s8623_s16 + $0x328] sm:$0xff] %v4653_v35 }
 0x5d1   : > { %4656 = vst [vmem:[%s8623_s16 + $0x330] sm:$0xff] %v4655_v19 }
 0x5d2   : > { %4658 = vst [vmem:[%s8623_s16 + $0x338] sm:$0xff] %v4657_v9 }
 0x5d3   : > { %4660 = vst [vmem:[%s8623_s16 + $0x340] sm:$0xff] %v4659_v37 }
 0x5d4   : > { %4662 = vst [vmem:[%s8623_s16 + $0x348] sm:$0xff] %v4661_v15 }
 0x5d5   : > { %4664 = vst [vmem:[%s8623_s16 + $0x350] sm:$0xff] %v4663_v4 }
 0x5d6   : > { %4666 = vst [vmem:[%s8623_s16 + $0x358] sm:$0xff] %v4665_v47 }
 0x5d7   : > { %4668 = vst [vmem:[%s8623_s16 + $0x360] sm:$0xff] %v4667_v60 }
 0x5d8   : > { %4670 = vst [vmem:[%s8623_s16 + $0x368] sm:$0xff] %v4669_v38 }
 0x5d9   : > { %4672 = vst [vmem:[%s8623_s16 + $0x370] sm:$0xff] %v4671_v46 }
 0x5da   : > { %4674 = vst [vmem:[%s8623_s16 + $0x378] sm:$0xff] %v4673_v40 }
 0x5db PF: > { %s19_s15 = sadd.s32 1, %s5350_s15   ;;  %s9066_s21 = sld [smem:[#allocation3_spill]] }
 0x5dc   : > { %p16_p12 = scmp.ge.s32.totalorder %s19_s15, 6   ;;  %s9067_s30 = smov %s5330_s10 }
 0x5dd   : > { %s9068_s10 = smov %s5471_s24  ;;  %s9069_s11 = smov %s5342_s13 }
 0x5de   : > { %s9070_s12 = smov %s5346_s14  ;;  %s9072_s14 = smov %s9078_s17 }
 0x5df   :  { %18 = sbr.rel (!%p16_p12) target bundleno = 4 (0x4), region = 129 }
 0x5e1   : > { %s9071_s13 = smov %s9066_s21 }

</bundles_post_ra>
